<compile_context>
chip_gen: v7x
topology: tpu7x:2x2x1
jax: 0.10.0
libtpu: 0.0.40
codegen_flags: <defaults>
</compile_context>

<pallas_src>
import functools

import jax
import jax.numpy as jnp
from jax.experimental import pallas as pl
from jax.experimental.pallas import tpu as pltpu


# ------------------------------ Pallas kernel ------------------------------ #

def _generator_kernel(z_ref, wl_ref, bl_ref,
                      w1_ref, g1_ref, bt1_ref,
                      w2_ref, g2_ref, bt2_ref,
                      w3_ref,
                      o_real_ref, o_const_ref,
                      s1_sc, *, batch, batch_padded):
    B, Bp = batch, batch_padded
    eps = 1e-5
    f32, bf16 = jnp.float32, jnp.bfloat16

    zb = z_ref[...]                                          # (Bp, 550) bf16
    # Pad rows of z are zero, but relu(0 @ W + b) != 0; mask their stage-1 conv
    # output so BatchNorm-1 statistics only see the real batch.
    row_ok = None
    if Bp != B:
        row_ok = (jax.lax.broadcasted_iota(jnp.int32, (Bp, 1), 0) < B).astype(f32)

    # ---- Stage 1: Linear(550->1536)+ReLU fused with ConvTranspose1d(256->128,
    # k=1,s=2), streamed per output position l (6 positions).  The Linear
    # weight columns were pre-permuted so the lane slice [l*256:(l+1)*256]
    # yields position-l's 256 channels directly; s1_sc rows are (l, b). ----
    sum1 = jnp.zeros((1, 128), f32)
    sq1 = jnp.zeros((1, 128), f32)
    for l in range(6):
        h_l = jnp.dot(zb, wl_ref[:, l * 256:(l + 1) * 256],
                      preferred_element_type=f32) + bl_ref[:, l * 256:(l + 1) * 256]
        h_l = jnp.maximum(h_l, 0.0)                          # (Bp, 256)
        y_l = jnp.dot(h_l.astype(bf16), w1_ref[...],
                      preferred_element_type=f32)            # (Bp, 128)
        if row_ok is not None:
            y_l = y_l * row_ok                               # zero the pad rows (exact)
        s1_sc[l * Bp:(l + 1) * Bp, :] = y_l                  # sublane-aligned block store
        sum1 = sum1 + jnp.sum(y_l, axis=0, keepdims=True)
        sq1 = sq1 + jnp.sum(y_l * y_l, axis=0, keepdims=True)

    # ---- BatchNorm-1 (training stats over 11*B positions; the 5*B zero-stuffed
    # rows contribute 0 to sum / sumsq) folded into one scale/bias FMA. ----
    inv_n1 = 1.0 / (11.0 * B)
    mean1 = sum1 * inv_n1
    var1 = jnp.maximum(sq1 * inv_n1 - mean1 * mean1, 0.0)    # guard E[x^2]-m^2 cancellation
    scale1 = g1_ref[...] * jax.lax.rsqrt(var1 + eps)
    bias1 = bt1_ref[...] - mean1 * scale1
    hn1 = jnp.maximum(s1_sc[...] * scale1 + bias1, 0.0)      # (6Bp, 128) real rows
    c1 = jnp.maximum(bias1, 0.0)                             # constant zero-stuffed row

    # ---- Stage 2: ConvTranspose1d(128->64) + BatchNorm-2 + ReLU, deduplicated.
    # Only the 6*Bp resident rows hit the MXU; the 5*B zero-stuffed stage-1 rows
    # are all the single constant row c1.  Their BN contribution (and the
    # removal of the Bp-B pad rows, which after BN-1 are exactly c1 as well)
    # is folded in analytically via one scalar count. ----
    y2 = jnp.dot(hn1.astype(bf16), w2_ref[...], preferred_element_type=f32)   # (6Bp, 64)
    y2c = jnp.dot(c1.astype(bf16), w2_ref[...], preferred_element_type=f32)   # (1, 64)
    n_c2 = float(5 * B - 6 * (Bp - B))     # +5B stuffed copies, -6*(Bp-B) pad copies
    inv_n2 = 1.0 / (21.0 * B)
    sum2 = jnp.sum(y2, axis=0, keepdims=True) + n_c2 * y2c
    sq2 = jnp.sum(y2 * y2, axis=0, keepdims=True) + n_c2 * (y2c * y2c)
    mean2 = sum2 * inv_n2
    var2 = jnp.maximum(sq2 * inv_n2 - mean2 * mean2, 0.0)
    scale2 = g2_ref[...] * jax.lax.rsqrt(var2 + eps)
    bias2 = bt2_ref[...] - mean2 * scale2
    hn2 = jnp.maximum(y2 * scale2 + bias2, 0.0)              # (6Bp, 64) real rows
    hn2c = jnp.maximum(y2c * scale2 + bias2, 0.0)            # rows born from c1 positions
    c2 = jnp.maximum(bias2, 0.0)                             # stage-2 zero-stuffed rows

    # ---- Stage 3: ConvTranspose1d(64->11, zero-padded to 128 lanes) + Sigmoid
    # on the 6*Bp real rows plus the two distinct constant rows only. ----
    y3 = jnp.dot(hn2.astype(bf16), w3_ref[...], preferred_element_type=f32)   # (6Bp, 128)
    y3c1 = jnp.dot(hn2c.astype(bf16), w3_ref[...], preferred_element_type=f32)  # (1, 128)
    y3c2 = jnp.dot(c2.astype(bf16), w3_ref[...], preferred_element_type=f32)    # (1, 128)

    def _sigmoid(v):                                         # EUP exp + approx reciprocal
        return pl.reciprocal(1.0 + jnp.exp(-v), approx=True)

    o_real_ref[...] = _sigmoid(y3)[:, :11]                   # rows (l, b), real channels
    o_const_ref[0:1, :] = _sigmoid(y3c1)[:, :11]             # positions 4,12,20,28,36
    o_const_ref[1:2, :] = _sigmoid(y3c2)[:, :11]             # positions 2,6,...,38


def _vmem_specs(n):
    return [pl.BlockSpec(memory_space=pltpu.MemorySpace.VMEM) for _ in range(n)]


def _vmem_limit_bytes(batch_padded):
    # Resident weights ~1.8 MB + roughly 30 KB/sample of activations/scratch/
    # outputs (VMEM lane padding included) + slack.  Capped below v7x's 64 MiB
    # physical VMEM; v5e/v6e could go toward 128 MiB if B >~ 1800 per call.
    weights = 2 * (550 * 1536 + 256 * 128 + 128 * 64 + 64 * 128) + 4 * 2048
    est = weights + batch_padded * (30 * 1024) + (4 << 20)
    return int(min(max(est, 32 << 20), 56 << 20))


# --------------------------- parameters & wrapper --------------------------- #

def init_params(key):
    ks = jax.random.split(key, 10)
    return {
        # nn.Linear(550, 1536): weight (out, in), bias (out,)
        "w_lin": 0.05 * jax.random.normal(ks[0], (1536, 550), jnp.float32),
        "b_lin": 0.05 * jax.random.normal(ks[1], (1536,), jnp.float32),
        # ConvTranspose1d weights: (in_channels, out_channels, kernel=1), no bias
        "w_t1": 0.1 * jax.random.normal(ks[2], (256, 128, 1), jnp.float32),
        "w_t2": 0.1 * jax.random.normal(ks[3], (128, 64, 1), jnp.float32),
        "w_t3": 0.1 * jax.random.normal(ks[4], (64, 11, 1), jnp.float32),
        # BatchNorm1d affine params
        "g1": 1.0 + 0.1 * jax.random.normal(ks[5], (128,), jnp.float32),
        "b1": 0.1 * jax.random.normal(ks[6], (128,), jnp.float32),
        "g2": 1.0 + 0.1 * jax.random.normal(ks[7], (64,), jnp.float32),
        "b2": 0.1 * jax.random.normal(ks[8], (64,), jnp.float32),
    }


def prepare_params(params):
    """One-time weight layout prep + bf16 cast (hoisted out of the forward)."""
    f32, bf16 = jnp.float32, jnp.bfloat16
    # Linear weight -> (in, out) with output columns permuted from PyTorch's
    # (c*6 + l) order to (l*256 + c) so a lane slice yields one position.
    w_lin_p = (params["w_lin"].T.reshape(550, 256, 6)
               .transpose(0, 2, 1).reshape(550, 1536))
    b_lin_p = params["b_lin"].reshape(256, 6).T.reshape(1, 1536)
    # Final projection padded 11 -> 128 output channels (lane-aligned MXU).
    w3p = jnp.zeros((64, 128), f32).at[:, :11].set(params["w_t3"][:, :, 0])
    return {
        "w_lin": w_lin_p.astype(bf16),
        "b_lin": b_lin_p.astype(f32),
        "w1": params["w_t1"][:, :, 0].astype(bf16),
        "w2": params["w_t2"][:, :, 0].astype(bf16),
        "w3p": w3p.astype(bf16),
        "g1": params["g1"].reshape(1, -1).astype(f32),
        "bt1": params["b1"].reshape(1, -1).astype(f32),
        "g2": params["g2"].reshape(1, -1).astype(f32),
        "bt2": params["b2"].reshape(1, -1).astype(f32),
    }


def generator_forward(prep, z):
    B = z.shape[0]
    Bp = ((B + 7) // 8) * 8                     # sublane-aligned padded batch
    z2d = z.reshape(B, 11 * 50).astype(jnp.bfloat16)   # bf16: exactly what the MXU consumes
    if Bp != B:
        z2d = jnp.pad(z2d, ((0, Bp - B), (0, 0)))

    real2d, consts = pl.pallas_call(
        functools.partial(_generator_kernel, batch=B, batch_padded=Bp),
        out_shape=(jax.ShapeDtypeStruct((6 * Bp, 11), jnp.float32),   # real rows (l, b)
                   jax.ShapeDtypeStruct((2, 11), jnp.float32)),       # batch-independent consts
        in_specs=_vmem_specs(10),
        out_specs=(pl.BlockSpec(memory_space=pltpu.MemorySpace.VMEM),
                   pl.BlockSpec(memory_space=pltpu.MemorySpace.VMEM)),
        scratch_shapes=[pltpu.VMEM((6 * Bp, 128), jnp.float32)],      # y1 / BN-1 staging
        compiler_params=pltpu.CompilerParams(
            vmem_limit_bytes=_vmem_limit_bytes(Bp)),
    )(z2d, prep["w_lin"], prep["b_lin"],
      prep["w1"], prep["g1"], prep["bt1"],
      prep["w2"], prep["g2"], prep["bt2"],
      prep["w3p"])

    # Tiny assembly pass (reads ~0.27 KB/sample, writes the final 1.8 KB/sample):
    # scatter the 6 real positions (q = 0,8,...,40) and broadcast the two
    # batch-independent constant columns plus sigmoid(0)=0.5 for odd positions.
    real = real2d.reshape(6, Bp, 11)[:, :B, :].transpose(1, 2, 0)     # (B, 11, 6)
    tmpl = jnp.full((11, 41), 0.5, jnp.float32)
    tmpl = tmpl.at[:, 2::4].set(consts[1][:, None])   # stage-2 zero-stuffed positions
    tmpl = tmpl.at[:, 4::8].set(consts[0][:, None])   # stage-1 zero-stuffed positions
    out = jnp.broadcast_to(tmpl, (B, 11, 41))
    return out.at[:, :, ::8].set(real)                                # (B, 11, 41)


# ----------------------------- pure-JAX reference --------------------------- #

def reference_forward(params, z, *, match_kernel_precision=False):
    """PyTorch-equivalent forward.  With match_kernel_precision=True, matmul
    operands are rounded through bf16 exactly like the Pallas kernel does."""
    f32 = jnp.float32
    rnd = ((lambda x: x.astype(jnp.bfloat16).astype(f32))
           if match_kernel_precision else (lambda x: x))
    B = z.shape[0]
    x = z.reshape(B, 11 * 50).astype(f32)
    h = jnp.maximum(jnp.dot(rnd(x), rnd(params["w_lin"]).T) + params["b_lin"], 0.0)
    x = h.reshape(B, 256, 6)

    def convt(x, w):  # ConvTranspose1d(k=1, stride=2, padding=0, bias=False)
        y = jnp.einsum("bcl,cok->bol", rnd(x), rnd(w))
        L = y.shape[-1]
        up = jnp.zeros((B, y.shape[1], 2 * L - 1), f32)
        return up.at[:, :, ::2].set(y)

    def bn_relu(x, g, b):
        mean = x.mean(axis=(0, 2), keepdims=True)
        var = ((x - mean) ** 2).mean(axis=(0, 2), keepdims=True)
        xn = (x - mean) * jax.lax.rsqrt(var + 1e-5)
        return jnp.maximum(xn * g[None, :, None] + b[None, :, None], 0.0)

    x = bn_relu(convt(x, params["w_t1"]), params["g1"], params["b1"])
    x = bn_relu(convt(x, params["w_t2"]), params["g2"], params["b2"])
    x = jax.nn.sigmoid(convt(x, params["w_t3"]))
    return x.reshape(B, 11, 41)


# ---------------------------------- main ------------------------------------ #

if __name__ == "__main__":
    key = jax.random.PRNGKey(0)
    pkey, zkey = jax.random.split(key)
    params = init_params(pkey)
    prep = prepare_params(params)

    B = 2
    z = jax.random.normal(zkey, (B, 11, 50), jnp.float32)

    fwd = jax.jit(generator_forward)
    out = jax.block_until_ready(fwd(prep, z))
    assert out.shape == (B, 11, 41), out.shape

    with jax.default_matmul_precision("highest"):
        ref_matched = jax.block_until_ready(
            reference_forward(params, z, match_kernel_precision=True))
        ref_f32 = jax.block_until_ready(
            reference_forward(params, z, match_kernel_precision=False))

    err_matched = float(jnp.max(jnp.abs(out - ref_matched)))
    err_f32 = float(jnp.max(jnp.abs(out - ref_f32)))
    assert err_matched < 5e-3, f"matched-precision max abs err {err_matched}"
    assert err_f32 < 5e-2, f"f32-reference max abs err {err_f32}"

    print("KERNEL_OK")
</pallas_src>

<mosaic_0001>
module attributes {stable_mosaic.version = 11 : i64} {
  func.func @_generator_kernel(%arg0: memref<8x550xbf16, #tpu.memory_space<vmem>>, %arg1: memref<550x1536xbf16, #tpu.memory_space<vmem>>, %arg2: memref<1x1536xf32, #tpu.memory_space<vmem>>, %arg3: memref<256x128xbf16, #tpu.memory_space<vmem>>, %arg4: memref<1x128xf32, #tpu.memory_space<vmem>>, %arg5: memref<1x128xf32, #tpu.memory_space<vmem>>, %arg6: memref<128x64xbf16, #tpu.memory_space<vmem>>, %arg7: memref<1x64xf32, #tpu.memory_space<vmem>>, %arg8: memref<1x64xf32, #tpu.memory_space<vmem>>, %arg9: memref<64x128xbf16, #tpu.memory_space<vmem>>, %arg10: memref<48x11xf32, #tpu.memory_space<vmem>>, %arg11: memref<2x11xf32, #tpu.memory_space<vmem>>, %arg12: memref<48x128xf32, #tpu.memory_space<vmem>>) attributes {dimension_semantics = [], scalar_prefetch = 0 : i64, scratch_operands = 1 : i64, tpu.core_type = #tpu.core_type<tc>} {
    %c0 = arith.constant 0 : index
    %c0_0 = arith.constant 0 : index
    %0 = vector.load %arg0[%c0, %c0_0] : memref<8x550xbf16, #tpu.memory_space<vmem>>, vector<8x550xbf16>
    %1 = tpu.iota {dimensions = array<i32: 0>} : vector<8x1xi32>
    %c2_i32 = arith.constant 2 : i32
    %2 = vector.broadcast %c2_i32 : i32 to vector<8x1xi32>
    %3 = arith.cmpi slt, %1, %2 : vector<8x1xi32>
    %4 = arith.extui %3 : vector<8x1xi1> to vector<8x1xi32>
    %5 = arith.sitofp %4 : vector<8x1xi32> to vector<8x1xf32>
    %cst = arith.constant 0.000000e+00 : f32
    %6 = vector.broadcast %cst : f32 to vector<1x128xf32>
    %cst_1 = arith.constant 0.000000e+00 : f32
    %7 = vector.broadcast %cst_1 : f32 to vector<1x128xf32>
    %c0_2 = arith.constant 0 : index
    %c0_3 = arith.constant 0 : index
    %8 = vector.load %arg1[%c0_2, %c0_3] : memref<550x1536xbf16, #tpu.memory_space<vmem>>, vector<550x256xbf16>
    %cst_4 = arith.constant dense<0.000000e+00> : vector<8x256xf32>
    %9 = tpu.matmul %0, %8, %cst_4 {dimension_numbers = #tpu.dot_dimension_numbers<[1], [0], [0], [1], [0, 0, 1, 1], [], []>} : vector<8x550xbf16>, vector<550x256xbf16>, vector<8x256xf32> -> vector<8x256xf32>
    %c0_5 = arith.constant 0 : index
    %c0_6 = arith.constant 0 : index
    %10 = vector.load %arg2[%c0_5, %c0_6] : memref<1x1536xf32, #tpu.memory_space<vmem>>, vector<1x256xf32>
    %11 = vector.broadcast %10 : vector<1x256xf32> to vector<8x256xf32>
    %12 = arith.addf %9, %11 : vector<8x256xf32>
    %cst_7 = arith.constant 0.000000e+00 : f32
    %13 = vector.broadcast %cst_7 : f32 to vector<8x256xf32>
    %14 = arith.maximumf %12, %13 : vector<8x256xf32>
    %15 = arith.truncf %14 : vector<8x256xf32> to vector<8x256xbf16>
    %c0_8 = arith.constant 0 : index
    %c0_9 = arith.constant 0 : index
    %16 = vector.load %arg3[%c0_8, %c0_9] : memref<256x128xbf16, #tpu.memory_space<vmem>>, vector<256x128xbf16>
    %cst_10 = arith.constant dense<0.000000e+00> : vector<8x128xf32>
    %17 = tpu.matmul %15, %16, %cst_10 {dimension_numbers = #tpu.dot_dimension_numbers<[1], [0], [0], [1], [0, 0, 1, 1], [], []>} : vector<8x256xbf16>, vector<256x128xbf16>, vector<8x128xf32> -> vector<8x128xf32>
    %18 = vector.broadcast %5 : vector<8x1xf32> to vector<8x128xf32>
    %19 = arith.mulf %17, %18 : vector<8x128xf32>
    %c0_11 = arith.constant 0 : index
    %c0_12 = arith.constant 0 : index
    %20 = vector.load %arg12[%c0_11, %c0_12] : memref<48x128xf32, #tpu.memory_space<vmem>>, vector<8x128xf32>
    tpu.vector_store %arg12[%c0_11, %c0_12], %19 {strides = array<i32>} : memref<48x128xf32, #tpu.memory_space<vmem>>, vector<8x128xf32>,
    %cst_13 = arith.constant dense<0.000000e+00> : vector<128xf32>
    %21 = vector.multi_reduction <add>, %19, %cst_13 [0] : vector<8x128xf32> to vector<128xf32>
    %22 = vector.shape_cast %21 : vector<128xf32> to vector<1x128xf32>
    %23 = arith.addf %6, %22 : vector<1x128xf32>
    %24 = arith.mulf %19, %19 : vector<8x128xf32>
    %cst_14 = arith.constant dense<0.000000e+00> : vector<128xf32>
    %25 = vector.multi_reduction <add>, %24, %cst_14 [0] : vector<8x128xf32> to vector<128xf32>
    %26 = vector.shape_cast %25 : vector<128xf32> to vector<1x128xf32>
    %27 = arith.addf %7, %26 : vector<1x128xf32>
    %c0_15 = arith.constant 0 : index
    %c256 = arith.constant 256 : index
    %28 = vector.load %arg1[%c0_15, %c256] : memref<550x1536xbf16, #tpu.memory_space<vmem>>, vector<550x256xbf16>
    %cst_16 = arith.constant dense<0.000000e+00> : vector<8x256xf32>
    %29 = tpu.matmul %0, %28, %cst_16 {dimension_numbers = #tpu.dot_dimension_numbers<[1], [0], [0], [1], [0, 0, 1, 1], [], []>} : vector<8x550xbf16>, vector<550x256xbf16>, vector<8x256xf32> -> vector<8x256xf32>
    %c0_17 = arith.constant 0 : index
    %c256_18 = arith.constant 256 : index
    %30 = vector.load %arg2[%c0_17, %c256_18] : memref<1x1536xf32, #tpu.memory_space<vmem>>, vector<1x256xf32>
    %31 = vector.broadcast %30 : vector<1x256xf32> to vector<8x256xf32>
    %32 = arith.addf %29, %31 : vector<8x256xf32>
    %cst_19 = arith.constant 0.000000e+00 : f32
    %33 = vector.broadcast %cst_19 : f32 to vector<8x256xf32>
    %34 = arith.maximumf %32, %33 : vector<8x256xf32>
    %35 = arith.truncf %34 : vector<8x256xf32> to vector<8x256xbf16>
    %c0_20 = arith.constant 0 : index
    %c0_21 = arith.constant 0 : index
    %36 = vector.load %arg3[%c0_20, %c0_21] : memref<256x128xbf16, #tpu.memory_space<vmem>>, vector<256x128xbf16>
    %cst_22 = arith.constant dense<0.000000e+00> : vector<8x128xf32>
    %37 = tpu.matmul %35, %36, %cst_22 {dimension_numbers = #tpu.dot_dimension_numbers<[1], [0], [0], [1], [0, 0, 1, 1], [], []>} : vector<8x256xbf16>, vector<256x128xbf16>, vector<8x128xf32> -> vector<8x128xf32>
    %38 = vector.broadcast %5 : vector<8x1xf32> to vector<8x128xf32>
    %39 = arith.mulf %37, %38 : vector<8x128xf32>
    %c8 = arith.constant 8 : index
    %c0_23 = arith.constant 0 : index
    %40 = vector.load %arg12[%c8, %c0_23] : memref<48x128xf32, #tpu.memory_space<vmem>>, vector<8x128xf32>
    tpu.vector_store %arg12[%c8, %c0_23], %39 {strides = array<i32>} : memref<48x128xf32, #tpu.memory_space<vmem>>, vector<8x128xf32>,
    %cst_24 = arith.constant dense<0.000000e+00> : vector<128xf32>
    %41 = vector.multi_reduction <add>, %39, %cst_24 [0] : vector<8x128xf32> to vector<128xf32>
    %42 = vector.shape_cast %41 : vector<128xf32> to vector<1x128xf32>
    %43 = arith.addf %23, %42 : vector<1x128xf32>
    %44 = arith.mulf %39, %39 : vector<8x128xf32>
    %cst_25 = arith.constant dense<0.000000e+00> : vector<128xf32>
    %45 = vector.multi_reduction <add>, %44, %cst_25 [0] : vector<8x128xf32> to vector<128xf32>
    %46 = vector.shape_cast %45 : vector<128xf32> to vector<1x128xf32>
    %47 = arith.addf %27, %46 : vector<1x128xf32>
    %c0_26 = arith.constant 0 : index
    %c512 = arith.constant 512 : index
    %48 = vector.load %arg1[%c0_26, %c512] : memref<550x1536xbf16, #tpu.memory_space<vmem>>, vector<550x256xbf16>
    %cst_27 = arith.constant dense<0.000000e+00> : vector<8x256xf32>
    %49 = tpu.matmul %0, %48, %cst_27 {dimension_numbers = #tpu.dot_dimension_numbers<[1], [0], [0], [1], [0, 0, 1, 1], [], []>} : vector<8x550xbf16>, vector<550x256xbf16>, vector<8x256xf32> -> vector<8x256xf32>
    %c0_28 = arith.constant 0 : index
    %c512_29 = arith.constant 512 : index
    %50 = vector.load %arg2[%c0_28, %c512_29] : memref<1x1536xf32, #tpu.memory_space<vmem>>, vector<1x256xf32>
    %51 = vector.broadcast %50 : vector<1x256xf32> to vector<8x256xf32>
    %52 = arith.addf %49, %51 : vector<8x256xf32>
    %cst_30 = arith.constant 0.000000e+00 : f32
    %53 = vector.broadcast %cst_30 : f32 to vector<8x256xf32>
    %54 = arith.maximumf %52, %53 : vector<8x256xf32>
    %55 = arith.truncf %54 : vector<8x256xf32> to vector<8x256xbf16>
    %c0_31 = arith.constant 0 : index
    %c0_32 = arith.constant 0 : index
    %56 = vector.load %arg3[%c0_31, %c0_32] : memref<256x128xbf16, #tpu.memory_space<vmem>>, vector<256x128xbf16>
    %cst_33 = arith.constant dense<0.000000e+00> : vector<8x128xf32>
    %57 = tpu.matmul %55, %56, %cst_33 {dimension_numbers = #tpu.dot_dimension_numbers<[1], [0], [0], [1], [0, 0, 1, 1], [], []>} : vector<8x256xbf16>, vector<256x128xbf16>, vector<8x128xf32> -> vector<8x128xf32>
    %58 = vector.broadcast %5 : vector<8x1xf32> to vector<8x128xf32>
    %59 = arith.mulf %57, %58 : vector<8x128xf32>
    %c16 = arith.constant 16 : index
    %c0_34 = arith.constant 0 : index
    %60 = vector.load %arg12[%c16, %c0_34] : memref<48x128xf32, #tpu.memory_space<vmem>>, vector<8x128xf32>
    tpu.vector_store %arg12[%c16, %c0_34], %59 {strides = array<i32>} : memref<48x128xf32, #tpu.memory_space<vmem>>, vector<8x128xf32>,
    %cst_35 = arith.constant dense<0.000000e+00> : vector<128xf32>
    %61 = vector.multi_reduction <add>, %59, %cst_35 [0] : vector<8x128xf32> to vector<128xf32>
    %62 = vector.shape_cast %61 : vector<128xf32> to vector<1x128xf32>
    %63 = arith.addf %43, %62 : vector<1x128xf32>
    %64 = arith.mulf %59, %59 : vector<8x128xf32>
    %cst_36 = arith.constant dense<0.000000e+00> : vector<128xf32>
    %65 = vector.multi_reduction <add>, %64, %cst_36 [0] : vector<8x128xf32> to vector<128xf32>
    %66 = vector.shape_cast %65 : vector<128xf32> to vector<1x128xf32>
    %67 = arith.addf %47, %66 : vector<1x128xf32>
    %c0_37 = arith.constant 0 : index
    %c768 = arith.constant 768 : index
    %68 = vector.load %arg1[%c0_37, %c768] : memref<550x1536xbf16, #tpu.memory_space<vmem>>, vector<550x256xbf16>
    %cst_38 = arith.constant dense<0.000000e+00> : vector<8x256xf32>
    %69 = tpu.matmul %0, %68, %cst_38 {dimension_numbers = #tpu.dot_dimension_numbers<[1], [0], [0], [1], [0, 0, 1, 1], [], []>} : vector<8x550xbf16>, vector<550x256xbf16>, vector<8x256xf32> -> vector<8x256xf32>
    %c0_39 = arith.constant 0 : index
    %c768_40 = arith.constant 768 : index
    %70 = vector.load %arg2[%c0_39, %c768_40] : memref<1x1536xf32, #tpu.memory_space<vmem>>, vector<1x256xf32>
    %71 = vector.broadcast %70 : vector<1x256xf32> to vector<8x256xf32>
    %72 = arith.addf %69, %71 : vector<8x256xf32>
    %cst_41 = arith.constant 0.000000e+00 : f32
    %73 = vector.broadcast %cst_41 : f32 to vector<8x256xf32>
    %74 = arith.maximumf %72, %73 : vector<8x256xf32>
    %75 = arith.truncf %74 : vector<8x256xf32> to vector<8x256xbf16>
    %c0_42 = arith.constant 0 : index
    %c0_43 = arith.constant 0 : index
    %76 = vector.load %arg3[%c0_42, %c0_43] : memref<256x128xbf16, #tpu.memory_space<vmem>>, vector<256x128xbf16>
    %cst_44 = arith.constant dense<0.000000e+00> : vector<8x128xf32>
    %77 = tpu.matmul %75, %76, %cst_44 {dimension_numbers = #tpu.dot_dimension_numbers<[1], [0], [0], [1], [0, 0, 1, 1], [], []>} : vector<8x256xbf16>, vector<256x128xbf16>, vector<8x128xf32> -> vector<8x128xf32>
    %78 = vector.broadcast %5 : vector<8x1xf32> to vector<8x128xf32>
    %79 = arith.mulf %77, %78 : vector<8x128xf32>
    %c24 = arith.constant 24 : index
    %c0_45 = arith.constant 0 : index
    %80 = vector.load %arg12[%c24, %c0_45] : memref<48x128xf32, #tpu.memory_space<vmem>>, vector<8x128xf32>
    tpu.vector_store %arg12[%c24, %c0_45], %79 {strides = array<i32>} : memref<48x128xf32, #tpu.memory_space<vmem>>, vector<8x128xf32>,
    %cst_46 = arith.constant dense<0.000000e+00> : vector<128xf32>
    %81 = vector.multi_reduction <add>, %79, %cst_46 [0] : vector<8x128xf32> to vector<128xf32>
    %82 = vector.shape_cast %81 : vector<128xf32> to vector<1x128xf32>
    %83 = arith.addf %63, %82 : vector<1x128xf32>
    %84 = arith.mulf %79, %79 : vector<8x128xf32>
    %cst_47 = arith.constant dense<0.000000e+00> : vector<128xf32>
    %85 = vector.multi_reduction <add>, %84, %cst_47 [0] : vector<8x128xf32> to vector<128xf32>
    %86 = vector.shape_cast %85 : vector<128xf32> to vector<1x128xf32>
    %87 = arith.addf %67, %86 : vector<1x128xf32>
    %c0_48 = arith.constant 0 : index
    %c1024 = arith.constant 1024 : index
    %88 = vector.load %arg1[%c0_48, %c1024] : memref<550x1536xbf16, #tpu.memory_space<vmem>>, vector<550x256xbf16>
    %cst_49 = arith.constant dense<0.000000e+00> : vector<8x256xf32>
    %89 = tpu.matmul %0, %88, %cst_49 {dimension_numbers = #tpu.dot_dimension_numbers<[1], [0], [0], [1], [0, 0, 1, 1], [], []>} : vector<8x550xbf16>, vector<550x256xbf16>, vector<8x256xf32> -> vector<8x256xf32>
    %c0_50 = arith.constant 0 : index
    %c1024_51 = arith.constant 1024 : index
    %90 = vector.load %arg2[%c0_50, %c1024_51] : memref<1x1536xf32, #tpu.memory_space<vmem>>, vector<1x256xf32>
    %91 = vector.broadcast %90 : vector<1x256xf32> to vector<8x256xf32>
    %92 = arith.addf %89, %91 : vector<8x256xf32>
    %cst_52 = arith.constant 0.000000e+00 : f32
    %93 = vector.broadcast %cst_52 : f32 to vector<8x256xf32>
    %94 = arith.maximumf %92, %93 : vector<8x256xf32>
    %95 = arith.truncf %94 : vector<8x256xf32> to vector<8x256xbf16>
    %c0_53 = arith.constant 0 : index
    %c0_54 = arith.constant 0 : index
    %96 = vector.load %arg3[%c0_53, %c0_54] : memref<256x128xbf16, #tpu.memory_space<vmem>>, vector<256x128xbf16>
    %cst_55 = arith.constant dense<0.000000e+00> : vector<8x128xf32>
    %97 = tpu.matmul %95, %96, %cst_55 {dimension_numbers = #tpu.dot_dimension_numbers<[1], [0], [0], [1], [0, 0, 1, 1], [], []>} : vector<8x256xbf16>, vector<256x128xbf16>, vector<8x128xf32> -> vector<8x128xf32>
    %98 = vector.broadcast %5 : vector<8x1xf32> to vector<8x128xf32>
    %99 = arith.mulf %97, %98 : vector<8x128xf32>
    %c32 = arith.constant 32 : index
    %c0_56 = arith.constant 0 : index
    %100 = vector.load %arg12[%c32, %c0_56] : memref<48x128xf32, #tpu.memory_space<vmem>>, vector<8x128xf32>
    tpu.vector_store %arg12[%c32, %c0_56], %99 {strides = array<i32>} : memref<48x128xf32, #tpu.memory_space<vmem>>, vector<8x128xf32>,
    %cst_57 = arith.constant dense<0.000000e+00> : vector<128xf32>
    %101 = vector.multi_reduction <add>, %99, %cst_57 [0] : vector<8x128xf32> to vector<128xf32>
    %102 = vector.shape_cast %101 : vector<128xf32> to vector<1x128xf32>
    %103 = arith.addf %83, %102 : vector<1x128xf32>
    %104 = arith.mulf %99, %99 : vector<8x128xf32>
    %cst_58 = arith.constant dense<0.000000e+00> : vector<128xf32>
    %105 = vector.multi_reduction <add>, %104, %cst_58 [0] : vector<8x128xf32> to vector<128xf32>
    %106 = vector.shape_cast %105 : vector<128xf32> to vector<1x128xf32>
    %107 = arith.addf %87, %106 : vector<1x128xf32>
    %c0_59 = arith.constant 0 : index
    %c1280 = arith.constant 1280 : index
    %108 = vector.load %arg1[%c0_59, %c1280] : memref<550x1536xbf16, #tpu.memory_space<vmem>>, vector<550x256xbf16>
    %cst_60 = arith.constant dense<0.000000e+00> : vector<8x256xf32>
    %109 = tpu.matmul %0, %108, %cst_60 {dimension_numbers = #tpu.dot_dimension_numbers<[1], [0], [0], [1], [0, 0, 1, 1], [], []>} : vector<8x550xbf16>, vector<550x256xbf16>, vector<8x256xf32> -> vector<8x256xf32>
    %c0_61 = arith.constant 0 : index
    %c1280_62 = arith.constant 1280 : index
    %110 = vector.load %arg2[%c0_61, %c1280_62] : memref<1x1536xf32, #tpu.memory_space<vmem>>, vector<1x256xf32>
    %111 = vector.broadcast %110 : vector<1x256xf32> to vector<8x256xf32>
    %112 = arith.addf %109, %111 : vector<8x256xf32>
    %cst_63 = arith.constant 0.000000e+00 : f32
    %113 = vector.broadcast %cst_63 : f32 to vector<8x256xf32>
    %114 = arith.maximumf %112, %113 : vector<8x256xf32>
    %115 = arith.truncf %114 : vector<8x256xf32> to vector<8x256xbf16>
    %c0_64 = arith.constant 0 : index
    %c0_65 = arith.constant 0 : index
    %116 = vector.load %arg3[%c0_64, %c0_65] : memref<256x128xbf16, #tpu.memory_space<vmem>>, vector<256x128xbf16>
    %cst_66 = arith.constant dense<0.000000e+00> : vector<8x128xf32>
    %117 = tpu.matmul %115, %116, %cst_66 {dimension_numbers = #tpu.dot_dimension_numbers<[1], [0], [0], [1], [0, 0, 1, 1], [], []>} : vector<8x256xbf16>, vector<256x128xbf16>, vector<8x128xf32> -> vector<8x128xf32>
    %118 = vector.broadcast %5 : vector<8x1xf32> to vector<8x128xf32>
    %119 = arith.mulf %117, %118 : vector<8x128xf32>
    %c40 = arith.constant 40 : index
    %c0_67 = arith.constant 0 : index
    %120 = vector.load %arg12[%c40, %c0_67] : memref<48x128xf32, #tpu.memory_space<vmem>>, vector<8x128xf32>
    tpu.vector_store %arg12[%c40, %c0_67], %119 {strides = array<i32>} : memref<48x128xf32, #tpu.memory_space<vmem>>, vector<8x128xf32>,
    %cst_68 = arith.constant dense<0.000000e+00> : vector<128xf32>
    %121 = vector.multi_reduction <add>, %119, %cst_68 [0] : vector<8x128xf32> to vector<128xf32>
    %122 = vector.shape_cast %121 : vector<128xf32> to vector<1x128xf32>
    %123 = arith.addf %103, %122 : vector<1x128xf32>
    %124 = arith.mulf %119, %119 : vector<8x128xf32>
    %cst_69 = arith.constant dense<0.000000e+00> : vector<128xf32>
    %125 = vector.multi_reduction <add>, %124, %cst_69 [0] : vector<8x128xf32> to vector<128xf32>
    %126 = vector.shape_cast %125 : vector<128xf32> to vector<1x128xf32>
    %127 = arith.addf %107, %126 : vector<1x128xf32>
    %cst_70 = arith.constant 0.0454545468 : f32
    %128 = vector.broadcast %cst_70 : f32 to vector<1x128xf32>
    %129 = arith.mulf %123, %128 : vector<1x128xf32>
    %cst_71 = arith.constant 0.0454545468 : f32
    %130 = vector.broadcast %cst_71 : f32 to vector<1x128xf32>
    %131 = arith.mulf %127, %130 : vector<1x128xf32>
    %132 = arith.mulf %129, %129 : vector<1x128xf32>
    %133 = arith.subf %131, %132 : vector<1x128xf32>
    %cst_72 = arith.constant 0.000000e+00 : f32
    %134 = vector.broadcast %cst_72 : f32 to vector<1x128xf32>
    %135 = arith.maximumf %133, %134 : vector<1x128xf32>
    %c0_73 = arith.constant 0 : index
    %c0_74 = arith.constant 0 : index
    %136 = vector.load %arg4[%c0_73, %c0_74] : memref<1x128xf32, #tpu.memory_space<vmem>>, vector<1x128xf32>
    %cst_75 = arith.constant 9.99999974E-6 : f32
    %137 = vector.broadcast %cst_75 : f32 to vector<1x128xf32>
    %138 = arith.addf %135, %137 : vector<1x128xf32>
    %139 = math.rsqrt %138 : vector<1x128xf32>
    %140 = arith.mulf %136, %139 : vector<1x128xf32>
    %c0_76 = arith.constant 0 : index
    %c0_77 = arith.constant 0 : index
    %141 = vector.load %arg5[%c0_76, %c0_77] : memref<1x128xf32, #tpu.memory_space<vmem>>, vector<1x128xf32>
    %142 = arith.mulf %129, %140 : vector<1x128xf32>
    %143 = arith.subf %141, %142 : vector<1x128xf32>
    %c0_78 = arith.constant 0 : index
    %c0_79 = arith.constant 0 : index
    %144 = vector.load %arg12[%c0_78, %c0_79] : memref<48x128xf32, #tpu.memory_space<vmem>>, vector<48x128xf32>
    %145 = vector.broadcast %140 : vector<1x128xf32> to vector<48x128xf32>
    %146 = arith.mulf %144, %145 : vector<48x128xf32>
    %147 = vector.broadcast %143 : vector<1x128xf32> to vector<48x128xf32>
    %148 = arith.addf %146, %147 : vector<48x128xf32>
    %cst_80 = arith.constant 0.000000e+00 : f32
    %149 = vector.broadcast %cst_80 : f32 to vector<48x128xf32>
    %150 = arith.maximumf %148, %149 : vector<48x128xf32>
    %cst_81 = arith.constant 0.000000e+00 : f32
    %151 = vector.broadcast %cst_81 : f32 to vector<1x128xf32>
    %152 = arith.maximumf %143, %151 : vector<1x128xf32>
    %153 = arith.truncf %150 : vector<48x128xf32> to vector<48x128xbf16>
    %c0_82 = arith.constant 0 : index
    %c0_83 = arith.constant 0 : index
    %154 = vector.load %arg6[%c0_82, %c0_83] : memref<128x64xbf16, #tpu.memory_space<vmem>>, vector<128x64xbf16>
    %cst_84 = arith.constant dense<0.000000e+00> : vector<48x64xf32>
    %155 = tpu.matmul %153, %154, %cst_84 {dimension_numbers = #tpu.dot_dimension_numbers<[1], [0], [0], [1], [0, 0, 1, 1], [], []>} : vector<48x128xbf16>, vector<128x64xbf16>, vector<48x64xf32> -> vector<48x64xf32>
    %156 = arith.truncf %152 : vector<1x128xf32> to vector<1x128xbf16>
    %c0_85 = arith.constant 0 : index
    %c0_86 = arith.constant 0 : index
    %157 = vector.load %arg6[%c0_85, %c0_86] : memref<128x64xbf16, #tpu.memory_space<vmem>>, vector<128x64xbf16>
    %cst_87 = arith.constant dense<0.000000e+00> : vector<1x64xf32>
    %158 = tpu.matmul %156, %157, %cst_87 {dimension_numbers = #tpu.dot_dimension_numbers<[1], [0], [0], [1], [0, 0, 1, 1], [], []>} : vector<1x128xbf16>, vector<128x64xbf16>, vector<1x64xf32> -> vector<1x64xf32>
    %cst_88 = arith.constant dense<0.000000e+00> : vector<64xf32>
    %159 = vector.multi_reduction <add>, %155, %cst_88 [0] : vector<48x64xf32> to vector<64xf32>
    %160 = vector.shape_cast %159 : vector<64xf32> to vector<1x64xf32>
    %cst_89 = arith.constant -2.600000e+01 : f32
    %161 = vector.broadcast %cst_89 : f32 to vector<1x64xf32>
    %162 = arith.mulf %161, %158 : vector<1x64xf32>
    %163 = arith.addf %160, %162 : vector<1x64xf32>
    %164 = arith.mulf %155, %155 : vector<48x64xf32>
    %cst_90 = arith.constant dense<0.000000e+00> : vector<64xf32>
    %165 = vector.multi_reduction <add>, %164, %cst_90 [0] : vector<48x64xf32> to vector<64xf32>
    %166 = vector.shape_cast %165 : vector<64xf32> to vector<1x64xf32>
    %167 = arith.mulf %158, %158 : vector<1x64xf32>
    %cst_91 = arith.constant -2.600000e+01 : f32
    %168 = vector.broadcast %cst_91 : f32 to vector<1x64xf32>
    %169 = arith.mulf %168, %167 : vector<1x64xf32>
    %170 = arith.addf %166, %169 : vector<1x64xf32>
    %cst_92 = arith.constant 0.0238095243 : f32
    %171 = vector.broadcast %cst_92 : f32 to vector<1x64xf32>
    %172 = arith.mulf %163, %171 : vector<1x64xf32>
    %cst_93 = arith.constant 0.0238095243 : f32
    %173 = vector.broadcast %cst_93 : f32 to vector<1x64xf32>
    %174 = arith.mulf %170, %173 : vector<1x64xf32>
    %175 = arith.mulf %172, %172 : vector<1x64xf32>
    %176 = arith.subf %174, %175 : vector<1x64xf32>
    %cst_94 = arith.constant 0.000000e+00 : f32
    %177 = vector.broadcast %cst_94 : f32 to vector<1x64xf32>
    %178 = arith.maximumf %176, %177 : vector<1x64xf32>
    %c0_95 = arith.constant 0 : index
    %c0_96 = arith.constant 0 : index
    %179 = vector.load %arg7[%c0_95, %c0_96] : memref<1x64xf32, #tpu.memory_space<vmem>>, vector<1x64xf32>
    %cst_97 = arith.constant 9.99999974E-6 : f32
    %180 = vector.broadcast %cst_97 : f32 to vector<1x64xf32>
    %181 = arith.addf %178, %180 : vector<1x64xf32>
    %182 = math.rsqrt %181 : vector<1x64xf32>
    %183 = arith.mulf %179, %182 : vector<1x64xf32>
    %c0_98 = arith.constant 0 : index
    %c0_99 = arith.constant 0 : index
    %184 = vector.load %arg8[%c0_98, %c0_99] : memref<1x64xf32, #tpu.memory_space<vmem>>, vector<1x64xf32>
    %185 = arith.mulf %172, %183 : vector<1x64xf32>
    %186 = arith.subf %184, %185 : vector<1x64xf32>
    %187 = vector.broadcast %183 : vector<1x64xf32> to vector<48x64xf32>
    %188 = arith.mulf %155, %187 : vector<48x64xf32>
    %189 = vector.broadcast %186 : vector<1x64xf32> to vector<48x64xf32>
    %190 = arith.addf %188, %189 : vector<48x64xf32>
    %cst_100 = arith.constant 0.000000e+00 : f32
    %191 = vector.broadcast %cst_100 : f32 to vector<48x64xf32>
    %192 = arith.maximumf %190, %191 : vector<48x64xf32>
    %193 = arith.mulf %158, %183 : vector<1x64xf32>
    %194 = arith.addf %193, %186 : vector<1x64xf32>
    %cst_101 = arith.constant 0.000000e+00 : f32
    %195 = vector.broadcast %cst_101 : f32 to vector<1x64xf32>
    %196 = arith.maximumf %194, %195 : vector<1x64xf32>
    %cst_102 = arith.constant 0.000000e+00 : f32
    %197 = vector.broadcast %cst_102 : f32 to vector<1x64xf32>
    %198 = arith.maximumf %186, %197 : vector<1x64xf32>
    %199 = arith.truncf %192 : vector<48x64xf32> to vector<48x64xbf16>
    %c0_103 = arith.constant 0 : index
    %c0_104 = arith.constant 0 : index
    %200 = vector.load %arg9[%c0_103, %c0_104] : memref<64x128xbf16, #tpu.memory_space<vmem>>, vector<64x128xbf16>
    %cst_105 = arith.constant dense<0.000000e+00> : vector<48x128xf32>
    %201 = tpu.matmul %199, %200, %cst_105 {dimension_numbers = #tpu.dot_dimension_numbers<[1], [0], [0], [1], [0, 0, 1, 1], [], []>} : vector<48x64xbf16>, vector<64x128xbf16>, vector<48x128xf32> -> vector<48x128xf32>
    %202 = arith.truncf %196 : vector<1x64xf32> to vector<1x64xbf16>
    %c0_106 = arith.constant 0 : index
    %c0_107 = arith.constant 0 : index
    %203 = vector.load %arg9[%c0_106, %c0_107] : memref<64x128xbf16, #tpu.memory_space<vmem>>, vector<64x128xbf16>
    %cst_108 = arith.constant dense<0.000000e+00> : vector<1x128xf32>
    %204 = tpu.matmul %202, %203, %cst_108 {dimension_numbers = #tpu.dot_dimension_numbers<[1], [0], [0], [1], [0, 0, 1, 1], [], []>} : vector<1x64xbf16>, vector<64x128xbf16>, vector<1x128xf32> -> vector<1x128xf32>
    %205 = arith.truncf %198 : vector<1x64xf32> to vector<1x64xbf16>
    %c0_109 = arith.constant 0 : index
    %c0_110 = arith.constant 0 : index
    %206 = vector.load %arg9[%c0_109, %c0_110] : memref<64x128xbf16, #tpu.memory_space<vmem>>, vector<64x128xbf16>
    %cst_111 = arith.constant dense<0.000000e+00> : vector<1x128xf32>
    %207 = tpu.matmul %205, %206, %cst_111 {dimension_numbers = #tpu.dot_dimension_numbers<[1], [0], [0], [1], [0, 0, 1, 1], [], []>} : vector<1x64xbf16>, vector<64x128xbf16>, vector<1x128xf32> -> vector<1x128xf32>
    %cst_112 = arith.constant 0.000000e+00 : f32
    %208 = vector.broadcast %cst_112 : f32 to vector<48x128xf32>
    %209 = arith.subf %208, %201 : vector<48x128xf32>
    %210 = math.exp %209 : vector<48x128xf32>
    %cst_113 = arith.constant 1.000000e+00 : f32
    %211 = vector.broadcast %cst_113 : f32 to vector<48x128xf32>
    %212 = arith.addf %211, %210 : vector<48x128xf32>
    %213 = tpu.reciprocal %212 {approx = true} : vector<48x128xf32> -> vector<48x128xf32>
    %214 = vector.extract_strided_slice %213 {offsets = [0, 0], sizes = [48, 11], strides = [1, 1]} : vector<48x128xf32> to vector<48x11xf32>
    %c0_114 = arith.constant 0 : index
    %c0_115 = arith.constant 0 : index
    %215 = vector.load %arg10[%c0_114, %c0_115] : memref<48x11xf32, #tpu.memory_space<vmem>>, vector<48x11xf32>
    tpu.vector_store %arg10[%c0_114, %c0_115], %214 {strides = array<i32>} : memref<48x11xf32, #tpu.memory_space<vmem>>, vector<48x11xf32>,
    %cst_116 = arith.constant 0.000000e+00 : f32
    %216 = vector.broadcast %cst_116 : f32 to vector<1x128xf32>
    %217 = arith.subf %216, %204 : vector<1x128xf32>
    %218 = math.exp %217 : vector<1x128xf32>
    %cst_117 = arith.constant 1.000000e+00 : f32
    %219 = vector.broadcast %cst_117 : f32 to vector<1x128xf32>
    %220 = arith.addf %219, %218 : vector<1x128xf32>
    %221 = tpu.reciprocal %220 {approx = true} : vector<1x128xf32> -> vector<1x128xf32>
    %222 = vector.extract_strided_slice %221 {offsets = [0, 0], sizes = [1, 11], strides = [1, 1]} : vector<1x128xf32> to vector<1x11xf32>
    %c0_118 = arith.constant 0 : index
    %c0_119 = arith.constant 0 : index
    %223 = vector.load %arg11[%c0_118, %c0_119] : memref<2x11xf32, #tpu.memory_space<vmem>>, vector<1x11xf32>
    tpu.vector_store %arg11[%c0_118, %c0_119], %222 {strides = array<i32>} : memref<2x11xf32, #tpu.memory_space<vmem>>, vector<1x11xf32>,
    %cst_120 = arith.constant 0.000000e+00 : f32
    %224 = vector.broadcast %cst_120 : f32 to vector<1x128xf32>
    %225 = arith.subf %224, %207 : vector<1x128xf32>
    %226 = math.exp %225 : vector<1x128xf32>
    %cst_121 = arith.constant 1.000000e+00 : f32
    %227 = vector.broadcast %cst_121 : f32 to vector<1x128xf32>
    %228 = arith.addf %227, %226 : vector<1x128xf32>
    %229 = tpu.reciprocal %228 {approx = true} : vector<1x128xf32> -> vector<1x128xf32>
    %230 = vector.extract_strided_slice %229 {offsets = [0, 0], sizes = [1, 11], strides = [1, 1]} : vector<1x128xf32> to vector<1x11xf32>
    %c1 = arith.constant 1 : index
    %c0_122 = arith.constant 0 : index
    %231 = vector.load %arg11[%c1, %c0_122] : memref<2x11xf32, #tpu.memory_space<vmem>>, vector<1x11xf32>
    tpu.vector_store %arg11[%c1, %c0_122], %230 {strides = array<i32>} : memref<2x11xf32, #tpu.memory_space<vmem>>, vector<1x11xf32>,
    return
  }
}

</mosaic_0001>

<bundles_post_ra>
// kernel: generator_forward.1
= control target key start
LH: loop header
LB: loop body
LE: loop exit
PB: predicated region body
PF: predicated region fallthrough
CT: control target
= control target key end

     0   :  { %17 = vsyncpa [#allocation4], 0  ;;  %s7566_s0 = inlined_call_operand.vmem [shape: bf16[8,550], index: 0, kind: input, shape index: {}]   ;;  %s7567_s1 = inlined_call_operand.hbm [shape: bf16[550,1536], index: 1, kind: input, shape index: {}]   ;;  %s7568_s2 = inlined_call_operand.hbm [shape: f32[1,1536], index: 2, kind: input, shape index: {}]   ;;  %s7569_s3 = inlined_call_operand.hbm [shape: bf16[256,128], index: 3, kind: input, shape index: {}]   ;;  %s7570_s4 = inlined_call_operand.hbm [shape: f32[1,128], index: 4, kind: input, shape index: {}]   ;;  %s7571_s5 = inlined_call_operand.hbm [shape: f32[1,128], index: 5, kind: input, shape index: {}]   ;;  %s7572_s6 = inlined_call_operand.vmem [shape: bf16[128,64], index: 6, kind: input, shape index: {}]   ;;  %s7573_s7 = inlined_call_operand.hbm [shape: f32[1,64], index: 7, kind: input, shape index: {}]   ;;  %s7574_s8 = inlined_call_operand.hbm [shape: f32[1,64], index: 8, kind: input, shape index: {}]   ;;  %s7575_s9 = inlined_call_operand.hbm [shape: bf16[64,128], index: 9, kind: input, shape index: {}]   ;;  %s7576_s10 = inlined_call_operand.vmem [shape: f32[48,11], index: 10, kind: output, shape index: {0}]   ;;  %s7577_s11 = inlined_call_operand.vmem [shape: f32[2,11], index: 11, kind: output, shape index: {1}]  }
   0x1   :  { %18 = vsyncpa [#allocation6], 0 }
   0x2   :  { %19 = vsyncpa [#allocation9], 0 }
   0x3   :  { %20 = vsyncpa [#allocation12], 0 }
   0x4   :  { %21 = vsyncpa [#allocation15], 0  ;;  %s7037_s17 = smov [#allocation5]   ;;  %s7038_s19 = smov [#allocation8]  }
   0x5   :  { %s42_s18 = sshll.u32 %s7037_s17, 4  ;;  %s64_s20 = sshll.u32 %s7038_s19, 4  ;;  %s43_s18 = int_to_ptr.vmem [resolvable:$true] %s42_s18  ;;  %s65_s20 = int_to_ptr.vmem [resolvable:$true] %s64_s20 }
   0x6   :  { %s6851_s23 = scalar_lea.hbm %s7568_s2, 192 }
   0x7   :  { %p6852_p0 = scmp.ne.s32.totalorder %s7568_s2, %s6851_s23  ;;  %p6855_p1 = scmp.lt.u32.totalorder %s6851_s23, %s7568_s2 }
   0x9   :  { %p6857_p2 = pnand %p6855_p1, %p6852_p0 }
   0xb   :  { %6860 = shalt.err (!%p6857_p2)
}
   0xc   :  { %s6861_s28 = scalar_lea.vmem %s43_s18, 192  ;;  %p6866_p4 = scmp.lt.s32.totalorder %s43_s18, %s43_s18 }
   0xd   :  { %p6862_p3 = scmp.ne.s32.totalorder %s43_s18, %s6861_s28  ;;  %p6867_p5 = scmp.lt.s32.totalorder %s6861_s28, %s6861_s28 }
   0xf   :  { %p6868_p6 = por %p6867_p5, %p6866_p4 }
  0x11   :  { %p6869_p7 = pnand %p6868_p6, %p6862_p3 }
  0x13   :  { %6872 = shalt.err (!%p6869_p7)
}
  0x14   :  { %45 = dma.hbm_to_vmem [thread:$0]  %s7568_s2, 192, %s43_s18, [#allocation6]  }
  0x15   :  { %s6873_s14 = scalar_lea.hbm %s7570_s4, 16 }
  0x16   :  { %p6874_p8 = scmp.ne.s32.totalorder %s7570_s4, %s6873_s14  ;;  %p6877_p9 = scmp.lt.u32.totalorder %s6873_s14, %s7570_s4 }
  0x18   :  { %p6879_p10 = pnand %p6877_p9, %p6874_p8 }
  0x1a   :  { %6882 = shalt.err (!%p6879_p10)
}
  0x1b   :  { %s6883_s21 = scalar_lea.vmem %s65_s20, 16  ;;  %s6887_s22 = scalar_lea.vmem %s65_s20, 32 }
  0x1c   :  { %p6884_p11 = scmp.ne.s32.totalorder %s65_s20, %s6883_s21  ;;  %p6888_p12 = scmp.lt.s32.totalorder %s65_s20, %s65_s20 }
  0x1d   :  { %p6889_p13 = scmp.lt.s32.totalorder %s6887_s22, %s6883_s21 }
  0x1f   :  { %p6890_p0 = por %p6889_p13, %p6888_p12 }
  0x21   :  { %p6891_p1 = pnand %p6890_p0, %p6884_p11 }
  0x23   :  { %6894 = shalt.err (!%p6891_p1)
}
  0x24   :  { %67 = dma.hbm_to_vmem [thread:$0]  %s7570_s4, 16, %s65_s20, [#allocation9]  }
  0x25   :  { %s7039_s23 = smov [#allocation11]   ;;  %s7040_s25 = smov [#allocation3]  }
  0x26   :  { %s86_s24 = sshll.u32 %s7039_s23, 4  ;;  %s29_s26 = sshll.u32 %s7040_s25, 4  ;;  %s87_s24 = int_to_ptr.vmem [resolvable:$true] %s86_s24  ;;  %s7136_s26 = int_to_ptr.vmem [resolvable:$true] %s29_s26 }
  0x27   :  { %s6895_s29 = scalar_lea.hbm %s7573_s7, 16 }
  0x28   :  { %p6896_p2 = scmp.ne.s32.totalorder %s7573_s7, %s6895_s29  ;;  %p6899_p3 = scmp.lt.u32.totalorder %s6895_s29, %s7573_s7 }
  0x2a   :  { %p6901_p4 = pnand %p6899_p3, %p6896_p2 }
  0x2c   :  { %6904 = shalt.err (!%p6901_p4)
}
  0x2d   :  { %s6905_s4 = scalar_lea.vmem %s87_s24, 16  ;;  %s6909_s20 = scalar_lea.vmem %s87_s24, 32 }
  0x2e   :  { %p6906_p5 = scmp.ne.s32.totalorder %s87_s24, %s6905_s4  ;;  %p6910_p6 = scmp.lt.s32.totalorder %s87_s24, %s87_s24 }
  0x2f   :  { %p6911_p7 = scmp.lt.s32.totalorder %s6909_s20, %s6905_s4 }
  0x31   :  { %p6912_p8 = por %p6911_p7, %p6910_p6 }
  0x33   :  { %p6913_p9 = pnand %p6912_p8, %p6906_p5 }
  0x35   :  { %6916 = shalt.err (!%p6913_p9)
}
  0x36   :  { %89 = dma.hbm_to_vmem [thread:$0]  %s7573_s7, 16, %s87_s24, [#allocation12]  }
  0x37   :  { %s6917_s21 = scalar_lea.hbm %s7567_s1, 52992 }
  0x38   :  { %p6918_p10 = scmp.ne.s32.totalorder %s7567_s1, %s6917_s21  ;;  %p6921_p11 = scmp.lt.u32.totalorder %s6917_s21, %s7567_s1 }
  0x3a   :  { %p6923_p12 = pnand %p6921_p11, %p6918_p10 }
  0x3c   :  { %6926 = shalt.err (!%p6923_p12)
}
  0x3d   :  { %s6927_s25 = scalar_lea.vmem %s7136_s26, 52992  ;;  %p6932_p0 = scmp.lt.s32.totalorder %s7136_s26, %s7136_s26 }
  0x3e   :  { %p6928_p13 = scmp.ne.s32.totalorder %s7136_s26, %s6927_s25  ;;  %p6933_p1 = scmp.lt.s32.totalorder %s6927_s25, %s6927_s25 }
  0x40   :  { %p6934_p2 = por %p6933_p1, %p6932_p0 }
  0x42   :  { %p6935_p3 = pnand %p6934_p2, %p6928_p13 }
  0x44   :  { %6938 = shalt.err (!%p6935_p3)
}
  0x45   :  { %s7041_s7 = smov 768   ;;  %s7042_s24 = smov 48  }
  0x46   :  { %35 = dma.hbm_to_vmem [thread:$0]  %s7567_s1, 52992, %s7136_s26, [#allocation4], %s7041_s7, %s7041_s7, %s7042_s24  }
  0x47   :  { %s7043_s29 = smov [#allocation7]   ;;  %s6939_s14 = scalar_lea.hbm %s7569_s3, 2048 }
  0x48   :  { %s51_s30 = sshll.u32 %s7043_s29, 4  ;;  %p6940_p4 = scmp.ne.s32.totalorder %s7569_s3, %s6939_s14  ;;  %s52_s30 = int_to_ptr.vmem [resolvable:$true] %s51_s30 }
  0x49   :  { %p6943_p5 = scmp.lt.u32.totalorder %s6939_s14, %s7569_s3 }
  0x4b   :  { %p6945_p6 = pnand %p6943_p5, %p6940_p4 }
  0x4d   :  { %6948 = shalt.err (!%p6945_p6)
}
  0x4e   :  { %s6949_s17 = scalar_lea.vmem %s52_s30, 2048  ;;  %p6954_p8 = scmp.lt.s32.totalorder %s52_s30, %s52_s30 }
  0x4f   :  { %p6950_p7 = scmp.ne.s32.totalorder %s52_s30, %s6949_s17  ;;  %p6955_p9 = scmp.lt.s32.totalorder %s6949_s17, %s6949_s17 }
  0x51   :  { %p6956_p10 = por %p6955_p9, %p6954_p8 }
  0x53   :  { %p6957_p11 = pnand %p6956_p10, %p6950_p7 }
  0x55   :  { %6960 = shalt.err (!%p6957_p11)
}
  0x56   :  { %s7044_s1 = smov 64   ;;  %s7045_s26 = smov 4  }
  0x57   :  { %57 = dma.hbm_to_vmem [thread:$0]  %s7569_s3, 2048, %s52_s30, [#allocation6], %s7044_s1, %s7044_s1, %s7045_s26  }
  0x58   :  { %s7046_s22 = smov [#allocation10]   ;;  %s7047_s18 = smov [#allocation13]  }
  0x59   :  { %s74_s2 = sshll.u32 %s7046_s22, 4  ;;  %s96_s23 = sshll.u32 %s7047_s18, 4  ;;  %s75_s2 = int_to_ptr.vmem [resolvable:$true] %s74_s2  ;;  %s97_s23 = int_to_ptr.vmem [resolvable:$true] %s96_s23 }
  0x5a   :  { %s6961_s24 = scalar_lea.hbm %s7571_s5, 16 }
  0x5b   :  { %p6962_p12 = scmp.ne.s32.totalorder %s7571_s5, %s6961_s24  ;;  %p6965_p13 = scmp.lt.u32.totalorder %s6961_s24, %s7571_s5 }
  0x5d   :  { %p6967_p0 = pnand %p6965_p13, %p6962_p12 }
  0x5f   :  { %6970 = shalt.err (!%p6967_p0)
}
  0x60   :  { %s6971_s3 = scalar_lea.vmem %s75_s2, 16  ;;  %s6975_s30 = scalar_lea.vmem %s75_s2, 32 }
  0x61   :  { %p6972_p1 = scmp.ne.s32.totalorder %s75_s2, %s6971_s3  ;;  %p6976_p2 = scmp.lt.s32.totalorder %s75_s2, %s75_s2 }
  0x62   :  { %p6977_p3 = scmp.lt.s32.totalorder %s6975_s30, %s6971_s3 }
  0x64   :  { %p6978_p4 = por %p6977_p3, %p6976_p2 }
  0x66   :  { %p6979_p5 = pnand %p6978_p4, %p6972_p1 }
  0x68   :  { %6982 = shalt.err (!%p6979_p5)
}
  0x69   :  { %77 = dma.hbm_to_vmem [thread:$0]  %s7571_s5, 16, %s75_s2, [#allocation9]  }
  0x6a   :  { %s6983_s15 = scalar_lea.hbm %s7574_s8, 16 }
  0x6b   :  { %p6984_p6 = scmp.ne.s32.totalorder %s7574_s8, %s6983_s15  ;;  %p6987_p7 = scmp.lt.u32.totalorder %s6983_s15, %s7574_s8 }
  0x6d   :  { %p6989_p8 = pnand %p6987_p7, %p6984_p6 }
  0x6f   :  { %6992 = shalt.err (!%p6989_p8)
}
  0x70   :  { %s6993_s22 = scalar_lea.vmem %s97_s23, 16  ;;  %s6997_s18 = scalar_lea.vmem %s97_s23, 32 }
  0x71   :  { %p6994_p9 = scmp.ne.s32.totalorder %s97_s23, %s6993_s22  ;;  %p6998_p10 = scmp.lt.s32.totalorder %s97_s23, %s97_s23 }
  0x72   :  { %p6999_p11 = scmp.lt.s32.totalorder %s6997_s18, %s6993_s22 }
  0x74   :  { %p7000_p12 = por %p6999_p11, %p6998_p10 }
  0x76   :  { %p7001_p13 = pnand %p7000_p12, %p6994_p9 }
  0x78   :  { %7004 = shalt.err (!%p7001_p13)
}
  0x79   :  { %99 = dma.hbm_to_vmem [thread:$0]  %s7574_s8, 16, %s97_s23, [#allocation12]  }
  0x7a   :  { %s7048_s25 = smov [#allocation14]   ;;  %s7005_s28 = scalar_lea.hbm %s7575_s9, 512 }
  0x7b   :  { %s105_s7 = sshll.u32 %s7048_s25, 4  ;;  %p7006_p0 = scmp.ne.s32.totalorder %s7575_s9, %s7005_s28  ;;  %s106_s7 = int_to_ptr.vmem [resolvable:$true] %s105_s7 }
  0x7c   :  { %p7009_p1 = scmp.lt.u32.totalorder %s7005_s28, %s7575_s9 }
  0x7e   :  { %p7011_p2 = pnand %p7009_p1, %p7006_p0 }
  0x80   :  { %7014 = shalt.err (!%p7011_p2)
}
  0x81   :  { %s7015_s13 = scalar_lea.vmem %s106_s7, 512  ;;  %p7020_p4 = scmp.lt.s32.totalorder %s106_s7, %s106_s7 }
  0x82   :  { %p7016_p3 = scmp.ne.s32.totalorder %s106_s7, %s7015_s13  ;;  %p7021_p5 = scmp.lt.s32.totalorder %s7015_s13, %s7015_s13 }
  0x84   :  { %p7022_p6 = por %p7021_p5, %p7020_p4 }
  0x86   :  { %p7023_p7 = pnand %p7022_p6, %p7016_p3 }
  0x88   :  { %7026 = shalt.err (!%p7023_p7)
}
  0x89   :  { %111 = dma.hbm_to_vmem [thread:$0]  %s7575_s9, 512, %s106_s7, [#allocation15], %s7044_s1, %s7044_s1, %s7045_s26  }
  0x8a   :  { %7027 = dma.done.wait [#allocation4], 52992  }
  0x8b   :  { %7028 = vsyncadd [#allocation4], 4294914304 }
  0x8c   :  { %7029 = dma.done.wait [#allocation6], 2240  }
  0x8d   :  { %7030 = vsyncadd [#allocation6], 4294965056 }
  0x8e   :  { %7031 = dma.done.wait [#allocation9], 32  }
  0x8f   :  { %7032 = vsyncadd [#allocation9], 4294967264 }
  0x90   :  { %7033 = dma.done.wait [#allocation12], 32  }
  0x91   :  { %7034 = vsyncadd [#allocation12], 4294967264 }
  0x92   :  { %7035 = dma.done.wait [#allocation15], 512  }
  0x93   :  { %7036 = vsyncadd [#allocation15], 4294966784  ;;  %v6076_v0 = vld [vmem:[#allocation3 + $0x4] ss:$48 sps:$4 sm:$0xff]   ;;  %v6078_v1 = vld [vmem:[#allocation3] ss:$48 sps:$4 sm:$0xff]  }
  0x94   :  { %599 = vmatprep.subr.bf16.mxu0 %v6076_v0  ;;  %v6079_v2 = vld [vmem:[#allocation3 + $0x64] ss:$48 sps:$4 sm:$0xff]   ;;  %v6081_v3 = vld [vmem:[#allocation3 + $0x60] ss:$48 sps:$4 sm:$0xff]   ;;  %v7230_v42 = vld [vmem:[%s7566_s0 + $0x8] sm:$0xff]  ;;  %vm592_vm0 = vcmask 1042432  }
  0x95   :  { %600 = vmatpush1.bf16.msra.mxu0 %v6078_v1  ;;  %v6082_v4 = vld [vmem:[#allocation3 + $0xc4] ss:$48 sps:$4 sm:$0xff]   ;;  %v6084_v5 = vld [vmem:[#allocation3 + $0xc0] ss:$48 sps:$4 sm:$0xff]   ;;  %v7236_v50 = vcombine.high %v7230_v42, %v7230_v42  ;;  %vm588_vm1 = vcmask 310272   ;;  %vm7051_vm3 = vmmov 0  }
  0x96   :  { %601 = vmatprep.subr.bf16.mxu0 %v6079_v2  ;;  %v6085_v6 = vld [vmem:[#allocation3 + $0x124] ss:$48 sps:$4 sm:$0xff]   ;;  %v6087_v7 = vld [vmem:[#allocation3 + $0x120] ss:$48 sps:$4 sm:$0xff]   ;;  %vm4845_vm4 = vcmask 523264   ;;  %vm5168_vm5 = vcmask 81920  }
  0x97   :  { %v6088_v8 = vld [vmem:[#allocation3 + $0x184] ss:$48 sps:$4 sm:$0xff]   ;;  %v6090_v9 = vld [vmem:[#allocation3 + $0x180] ss:$48 sps:$4 sm:$0xff]   ;;  %vm5156_vm6 = vcmask 89088  }
  0x98   :  { %v6091_v10 = vld [vmem:[#allocation3 + $0x1e4] ss:$48 sps:$4 sm:$0xff]   ;;  %v6093_v11 = vld [vmem:[#allocation3 + $0x1e0] ss:$48 sps:$4 sm:$0xff]  }
  0x99   :  { %602 = vmatpush1.bf16.msra.mxu0 %v6081_v3  ;;  %v6094_v12 = vld [vmem:[#allocation3 + $0x244] ss:$48 sps:$4 sm:$0xff]   ;;  %v6096_v15 = vld [vmem:[#allocation3 + $0x240] ss:$48 sps:$4 sm:$0xff]  }
  0x9a   :  { %603 = vmatprep.subr.bf16.mxu0 %v6082_v4  ;;  %v137_v13 = vld [vmem:[%s7566_s0] sm:$0xff]  ;;  %v6189_v34 = vld [vmem:[#allocation7 + $0x50] sm:$0xff]   ;;  %v6191_v38 = vld [vmem:[#allocation7 + $0x58] sm:$0xff]  }
  0x9b   :  { %v7224_v14 = vcombine.high %v137_v13, %v137_v13  ;;  %v6097_v16 = vld [vmem:[#allocation3 + $0x2a4] ss:$48 sps:$4 sm:$0xff]   ;;  %v6099_v17 = vld [vmem:[#allocation3 + $0x2a0] ss:$48 sps:$4 sm:$0xff]   ;;  %v7232_v47 = vcombine.low %v137_v13, %v137_v13 }
  0x9c   :  { %v6100_v18 = vld [vmem:[#allocation3 + $0x304] ss:$48 sps:$4 sm:$0xff]   ;;  %v6102_v19 = vld [vmem:[#allocation3 + $0x300] ss:$48 sps:$4 sm:$0xff]  }
  0x9d   :  { %604 = vmatpush1.bf16.msra.mxu0 %v6084_v5  ;;  %631 = vmatprep.mubr.bf16.mxu0 %v7224_v14  ;;  %v6103_v20 = vld [vmem:[#allocation3 + $0x364] ss:$48 sps:$4 sm:$0xff]   ;;  %v6105_v21 = vld [vmem:[#allocation3 + $0x360] ss:$48 sps:$4 sm:$0xff]  }
  0x9e   :  { %605 = vmatprep.subr.bf16.mxu0 %v6085_v6  ;;  %v6106_v22 = vld [vmem:[#allocation3 + $0x3c4] ss:$48 sps:$4 sm:$0xff]   ;;  %v6108_v23 = vld [vmem:[#allocation3 + $0x3c0] ss:$48 sps:$4 sm:$0xff]  }
  0x9f   :  { %v6109_v24 = vld [vmem:[#allocation3 + $0x424] ss:$48 sps:$4 sm:$0xff]   ;;  %v6111_v25 = vld [vmem:[#allocation3 + $0x420] ss:$48 sps:$4 sm:$0xff]  }
  0xa0   :  { %v6112_v26 = vld [vmem:[#allocation3 + $0x484] ss:$48 sps:$4 sm:$0xff]   ;;  %v6114_v27 = vld [vmem:[#allocation3 + $0x480] ss:$48 sps:$4 sm:$0xff]  }
  0xa1   :  { %606 = vmatpush1.bf16.msra.mxu0 %v6087_v7  ;;  %v6115_v28 = vld [vmem:[#allocation3 + $0x4e4] ss:$48 sps:$4 sm:$0xff]   ;;  %v6185_v29 = vld [vmem:[#allocation7 + $0x40] sm:$0xff]   ;;  %v6190_v37 = vld [vmem:[#allocation7 + $0x10] sm:$0xff]  }
  0xa2   :  { %607 = vmatprep.subr.bf16.mxu0 %v6088_v8  ;;  %v6186_v30 = vld [vmem:[#allocation7] sm:$0xff]   ;;  %5740 = vmatprep.subr.bf16.mxu1 %v6185_v29  ;;  %v6187_v32 = vld [vmem:[#allocation7 + $0x48] sm:$0xff]   ;;  %v6192_v43 = vld [vmem:[#allocation7 + $0x18] sm:$0xff]  }
  0xa3   :  { %v6117_v31 = vld [vmem:[#allocation3 + $0x4e0] ss:$48 sps:$4 sm:$0xff]   ;;  %5741 = vmatpush3.bf16.msra.mxu1 %v6186_v30  ;;  %v6188_v33 = vld [vmem:[#allocation7 + $0x8] sm:$0xff]  }
  0xa4   :  { %5742 = vmatprep.subr.bf16.mxu1 %v6187_v32  ;;  %v6118_v35 = vld [vmem:[#allocation3 + $0x544] ss:$48 sps:$4 sm:$0xff]   ;;  %v6120_v36 = vld [vmem:[#allocation3 + $0x540] ss:$48 sps:$4 sm:$0xff]  }
  0xa5   :  { %608 = vmatpush1.bf16.msra.mxu0 %v6090_v9  ;;  %v6121_v39 = vld [vmem:[#allocation3 + $0x5a4] ss:$48 sps:$4 sm:$0xff]   ;;  %v6123_v40 = vld [vmem:[#allocation3 + $0x5a0] ss:$48 sps:$4 sm:$0xff]  }
  0xa6   :  { %609 = vmatprep.subr.bf16.mxu0 %v6091_v10  ;;  %v6127_v41 = vld [vmem:[#allocation3 + $0x604] ss:$48 sps:$4 sm:$0xff]   ;;  %v6193_v44 = vld [vmem:[#allocation7 + $0x60] sm:$0xff]   ;;  %v6197_v29 = vld [vmem:[#allocation7 + $0x70] sm:$0xff]  }
  0xa7   :  { %5743 = vmatpush3.bf16.msra.mxu1 %v6188_v33  ;;  %v6194_v45 = vld [vmem:[#allocation7 + $0x20] sm:$0xff]   ;;  %v6131_v48 = vld [vmem:[#allocation3 + $0x664] ss:$48 sps:$4 sm:$0xff]   ;;  %v6198_v30 = vld [vmem:[#allocation7 + $0x30] sm:$0xff]  }
  0xa8   :  { %5744 = vmatprep.subr.bf16.mxu1 %v6189_v34  ;;  %v6125_v46 = vld [vmem:[#allocation3 + $0x600] ss:$48 sps:$4 sm:$0xff]   ;;  %v6195_v49 = vld [vmem:[#allocation7 + $0x68] sm:$0xff]   ;;  %v6200_v32 = vld [vmem:[#allocation7 + $0x38] sm:$0xff]   ;;  %v140_v34 = vlaneseq }
  0xa9   :  { %610 = vmatpush1.bf16.msra.mxu0 %v6093_v11  ;;  %v6196_v51 = vld [vmem:[#allocation7 + $0x28] sm:$0xff]   ;;  %v6129_v52 = vld [vmem:[#allocation3 + $0x660] ss:$48 sps:$4 sm:$0xff]   ;;  %v6203_v33 = vld [vmem:[#allocation3 + $0xc] ss:$48 sps:$4 sm:$0xff]  }
  0xaa   :  { %611 = vmatprep.subr.bf16.mxu0 %v6094_v12  ;;  %v6134_v53 = vld [vmem:[#allocation3 + $0x6c4] ss:$48 sps:$4 sm:$0xff]   ;;  %v6132_v54 = vld [vmem:[#allocation3 + $0x6c0] ss:$48 sps:$4 sm:$0xff]  }
  0xab   :  { %5745 = vmatpush3.bf16.msra.mxu1 %v6190_v37  ;;  %v6137_v55 = vld [vmem:[#allocation3 + $0x724] ss:$48 sps:$4 sm:$0xff]   ;;  %v6135_v56 = vld [vmem:[#allocation3 + $0x720] ss:$48 sps:$4 sm:$0xff]  }
  0xac   :  { %5746 = vmatprep.subr.bf16.mxu1 %v6191_v38  ;;  %v6140_v57 = vld [vmem:[#allocation3 + $0x784] ss:$48 sps:$4 sm:$0xff]   ;;  %v6138_v58 = vld [vmem:[#allocation3 + $0x780] ss:$48 sps:$4 sm:$0xff]  }
  0xad   :  { %612 = vmatpush1.bf16.msra.mxu0 %v6096_v15  ;;  %v6143_v59 = vld [vmem:[#allocation3 + $0x7e4] ss:$48 sps:$4 sm:$0xff]   ;;  %v6141_v60 = vld [vmem:[#allocation3 + $0x7e0] ss:$48 sps:$4 sm:$0xff]  }
  0xae   :  { %613 = vmatprep.subr.bf16.mxu0 %v6097_v16  ;;  %v6146_v61 = vld [vmem:[#allocation3 + $0x844] ss:$48 sps:$4 sm:$0xff]   ;;  %v6144_v62 = vld [vmem:[#allocation3 + $0x840] ss:$48 sps:$4 sm:$0xff]  }
  0xaf   :  { %5747 = vmatpush3.bf16.msra.mxu1 %v6192_v43  ;;  %v6149_v63 = vld [vmem:[#allocation3 + $0x8a4] ss:$48 sps:$4 sm:$0xff]   ;;  %v6147_v0 = vld [vmem:[#allocation3 + $0x8a0] ss:$48 sps:$4 sm:$0xff]  }
  0xb0   :  { %5748 = vmatprep.subr.bf16.mxu1 %v6193_v44  ;;  %v6152_v1 = vld [vmem:[#allocation3 + $0x904] ss:$48 sps:$4 sm:$0xff]   ;;  %v6150_v2 = vld [vmem:[#allocation3 + $0x900] ss:$48 sps:$4 sm:$0xff]  }
  0xb1   :  { %614 = vmatpush1.bf16.msra.mxu0 %v6099_v17  ;;  %v6155_v3 = vld [vmem:[#allocation3 + $0x964] ss:$48 sps:$4 sm:$0xff]   ;;  %v6153_v4 = vld [vmem:[#allocation3 + $0x960] ss:$48 sps:$4 sm:$0xff]  }
  0xb2   :  { %615 = vmatprep.subr.bf16.mxu0 %v6100_v18  ;;  %v6158_v5 = vld [vmem:[#allocation3 + $0x9c4] ss:$48 sps:$4 sm:$0xff]   ;;  %v6156_v6 = vld [vmem:[#allocation3 + $0x9c0] ss:$48 sps:$4 sm:$0xff]  }
  0xb3   :  { %5749 = vmatpush3.bf16.msra.mxu1 %v6194_v45  ;;  %v6161_v7 = vld [vmem:[#allocation3 + $0xa24] ss:$48 sps:$4 sm:$0xff]   ;;  %v6159_v8 = vld [vmem:[#allocation3 + $0xa20] ss:$48 sps:$4 sm:$0xff]  }
  0xb4   :  { %5750 = vmatprep.subr.bf16.mxu1 %v6195_v49  ;;  %v6164_v9 = vld [vmem:[#allocation3 + $0xa84] ss:$48 sps:$4 sm:$0xff]   ;;  %v6162_v10 = vld [vmem:[#allocation3 + $0xa80] ss:$48 sps:$4 sm:$0xff]  }
  0xb5   :  { %616 = vmatpush1.bf16.msra.mxu0 %v6102_v19  ;;  %v6167_v11 = vld [vmem:[#allocation3 + $0xae4] ss:$48 sps:$4 sm:$0xff]   ;;  %v6165_v12 = vld [vmem:[#allocation3 + $0xae0] ss:$48 sps:$4 sm:$0xff]  }
  0xb6   :  { %617 = vmatprep.subr.bf16.mxu0 %v6103_v20  ;;  %v6170_v13 = vld [vmem:[#allocation3 + $0xb44] ss:$48 sps:$4 sm:$0xff]   ;;  %v6168_v15 = vld [vmem:[#allocation3 + $0xb40] ss:$48 sps:$4 sm:$0xff]   ;;  %v7242_v20 = vcombine.low %v7230_v42, %v7230_v42 }
  0xb7   :  { %5751 = vmatpush3.bf16.msra.mxu1 %v6196_v51  ;;  %v6173_v16 = vld [vmem:[#allocation3 + $0xba4] ss:$48 sps:$4 sm:$0xff]   ;;  %v6171_v17 = vld [vmem:[#allocation3 + $0xba0] ss:$48 sps:$4 sm:$0xff]  }
  0xb8   :  { %v6178_v18 = vld [vmem:[#allocation3 + $0xc04] ss:$48 sps:$4 sm:$0xff]   ;;  %v6176_v19 = vld [vmem:[#allocation3 + $0xc00] ss:$48 sps:$4 sm:$0xff]   ;;  %5752 = vmatprep.subr.bf16.mxu1 %v6197_v29  ;;  %v6255_v29 = vld [vmem:[#allocation3 + $0x6c8] ss:$48 sps:$4 sm:$0xff]  }
  0xb9   :  { %618 = vmatpush1.bf16.msra.mxu0 %v6105_v21  ;;  %v6181_v21 = vld [vmem:[#allocation3 + $0xc64] ss:$48 sps:$4 sm:$0xff]   ;;  %v214_v37 = vld [vmem:[#allocation5] sm:$0x3] }
  0xba   :  { %619 = vmatprep.subr.bf16.mxu0 %v6106_v22  ;;  %v213_v22 = vld [vmem:[#allocation3 + $0xcc0] sm:$0x77] }
  0xbb   :  { %5753 = vmatpush3.bf16.msra.mxu1 %v6198_v30  ;;  %v6260_v30 = vld [vmem:[#allocation3 + $0x72c] ss:$48 sps:$4 sm:$0xff]  }
  0xbd   :  { %620 = vmatpush1.bf16.msra.mxu0 %v6108_v23  ;;  %v6179_v23 = vld [vmem:[#allocation3 + $0xc60] ss:$48 sps:$4 sm:$0xff]  }
  0xbe   :  { %621 = vmatprep.subr.bf16.mxu0 %v6109_v24  ;;  %v7049_v24 = vmov 0  }
  0xc1   :  { %622 = vmatpush1.bf16.msra.mxu0 %v6111_v25  ;;  %v5264_v25 = vcombine.high %v213_v22, %v213_v22 }
  0xc2   :  { %623 = vmatprep.subr.bf16.mxu0 %v6112_v26  ;;  %v5263_v26 = vcombine.low %v213_v22, %v213_v22  ;;  %v6251_v22 = vld [vmem:[#allocation3 + $0x60c] ss:$48 sps:$4 sm:$0xff]  }
  0xc5   :  { %624 = vmatpush1.bf16.msra.mxu0 %v6114_v27  ;;  %v594_v27 = vsel %vm592_vm0, %v5263_v26, 0  ;;  %v6252_v26 = vld [vmem:[#allocation3 + $0x668] ss:$48 sps:$4 sm:$0xff]  }
  0xc6   :  { %625 = vmatprep.subr.bf16.mxu0 %v6115_v28  ;;  %v7251_v28 = vld [vmem:[%s7566_s0 + $0x10] ss:$0 sps:$4 sm:$0xff]  }
  0xc9   :  { %626 = vmatpush1.bf16.msra.mxu0 %v6117_v31  ;;  %v6199_v31 = vld [vmem:[#allocation7 + $0x78] sm:$0xff]  }
  0xca   :  { %627 = vmatprep.subr.bf16.mxu0 %v6118_v35  ;;  %5754 = vmatprep.subr.bf16.mxu1 %v6199_v31  ;;  %v7255_v35 = vshrl.u32 %v140_v34, 7  ;;  %v6258_v31 = vld [vmem:[#allocation3 + $0x728] ss:$48 sps:$4 sm:$0xff]   ;;  %v6266_v34 = vld [vmem:[#allocation3 + $0x7ec] ss:$48 sps:$4 sm:$0xff]  }
  0xcb   :  { %5755 = vmatpush3.bf16.msra.mxu1 %v6200_v32  ;;  %v6263_v32 = vld [vmem:[#allocation3 + $0x78c] ss:$48 sps:$4 sm:$0xff]  }
  0xcc   :  { %1343 = vmatprep.subr.bf16.mxu1 %v6203_v33  ;;  %v7261_v38 = vsub.s32 1, %v7255_v35  ;;  %v6261_v33 = vld [vmem:[#allocation3 + $0x788] ss:$48 sps:$4 sm:$0xff]   ;;  %vm142_vm2 = vcmp.lt.s32.totalorder %v7255_v35, 2 }
  0xcd   :  { %628 = vmatpush1.bf16.msra.mxu0 %v6120_v36  ;;  %v7258_v36 = vsub.s32 0, %v7255_v35 }
  0xce   :  { %629 = vmatprep.subr.bf16.mxu0 %v6121_v39 }
  0xcf   :  { %v219_v39 = vrot.slane %v214_v37, %v7258_v36 }
  0xd1   :  { %630 = vmatpush1.bf16.msra.mxu0 %v6123_v40  ;;  %v223_v40 = vrot.slane %v214_v37, %v7261_v38  ;;  %v6264_v37 = vld [vmem:[#allocation3 + $0x7e8] ss:$48 sps:$4 sm:$0xff]  }
  0xd2   :  { %640 = vmatprep.subr.bf16.mxu0 %v6127_v41 }
  0xd4   :  { %632 = vmatmul.mubr.bf16.vlgmr.msra.gmra.mrb[0].mxu0 %v7232_v47 }
  0xd5   :  { %641 = vmatpush1.bf16.msra.mxu0 %v6125_v46  ;;  %672 = vmatprep.mubr.bf16.mxu0 %v7236_v50 }
  0xd6   :  { %642 = vmatprep.subr.bf16.mxu0 %v6131_v48 }
  0xd9   :  { %643 = vmatpush1.bf16.msra.mxu0 %v6129_v52  ;;  %v6201_v52 = vld [vmem:[#allocation3 + $0x8] ss:$48 sps:$4 sm:$0xff]  }
  0xda   :  { %644 = vmatprep.subr.bf16.mxu0 %v6134_v53 }
  0xdd   :  { %645 = vmatpush1.bf16.msra.mxu0 %v6132_v54  ;;  %v6206_v54 = vld [vmem:[#allocation3 + $0x6c] ss:$48 sps:$4 sm:$0xff]  }
  0xde   :  { %646 = vmatprep.subr.bf16.mxu0 %v6137_v55  ;;  %v6204_v55 = vld [vmem:[#allocation3 + $0x68] ss:$48 sps:$4 sm:$0xff]  }
  0xe1   :  { %647 = vmatpush1.bf16.msra.mxu0 %v6135_v56  ;;  %v6209_v56 = vld [vmem:[#allocation3 + $0xcc] ss:$48 sps:$4 sm:$0xff]  }
  0xe2   :  { %648 = vmatprep.subr.bf16.mxu0 %v6140_v57  ;;  %v6207_v57 = vld [vmem:[#allocation3 + $0xc8] ss:$48 sps:$4 sm:$0xff]  }
  0xe5   :  { %649 = vmatpush1.bf16.msra.mxu0 %v6138_v58  ;;  %v6212_v58 = vld [vmem:[#allocation3 + $0x12c] ss:$48 sps:$4 sm:$0xff]  }
  0xe6   :  { %650 = vmatprep.subr.bf16.mxu0 %v6143_v59  ;;  %v6210_v59 = vld [vmem:[#allocation3 + $0x128] ss:$48 sps:$4 sm:$0xff]  }
  0xe9   :  { %651 = vmatpush1.bf16.msra.mxu0 %v6141_v60  ;;  %v6215_v60 = vld [vmem:[#allocation3 + $0x18c] ss:$48 sps:$4 sm:$0xff]  }
  0xea   :  { %652 = vmatprep.subr.bf16.mxu0 %v6146_v61  ;;  %v6213_v61 = vld [vmem:[#allocation3 + $0x188] ss:$48 sps:$4 sm:$0xff]  }
  0xed   :  { %653 = vmatpush1.bf16.msra.mxu0 %v6144_v62  ;;  %v6218_v62 = vld [vmem:[#allocation3 + $0x1ec] ss:$48 sps:$4 sm:$0xff]  }
  0xee   :  { %654 = vmatprep.subr.bf16.mxu0 %v6149_v63  ;;  %v6216_v63 = vld [vmem:[#allocation3 + $0x1e8] ss:$48 sps:$4 sm:$0xff]  }
  0xf1   :  { %655 = vmatpush1.bf16.msra.mxu0 %v6147_v0  ;;  %v6221_v0 = vld [vmem:[#allocation3 + $0x24c] ss:$48 sps:$4 sm:$0xff]  }
  0xf2   :  { %656 = vmatprep.subr.bf16.mxu0 %v6152_v1  ;;  %v6219_v1 = vld [vmem:[#allocation3 + $0x248] ss:$48 sps:$4 sm:$0xff]  }
  0xf5   :  { %657 = vmatpush1.bf16.msra.mxu0 %v6150_v2  ;;  %v6224_v2 = vld [vmem:[#allocation3 + $0x2ac] ss:$48 sps:$4 sm:$0xff]  }
  0xf6   :  { %658 = vmatprep.subr.bf16.mxu0 %v6155_v3  ;;  %v6222_v3 = vld [vmem:[#allocation3 + $0x2a8] ss:$48 sps:$4 sm:$0xff]  }
  0xf9   :  { %659 = vmatpush1.bf16.msra.mxu0 %v6153_v4  ;;  %v6227_v4 = vld [vmem:[#allocation3 + $0x30c] ss:$48 sps:$4 sm:$0xff]  }
  0xfa   :  { %660 = vmatprep.subr.bf16.mxu0 %v6158_v5  ;;  %v6225_v5 = vld [vmem:[#allocation3 + $0x308] ss:$48 sps:$4 sm:$0xff]  }
  0xfd   :  { %661 = vmatpush1.bf16.msra.mxu0 %v6156_v6  ;;  %v6230_v6 = vld [vmem:[#allocation3 + $0x36c] ss:$48 sps:$4 sm:$0xff]  }
  0xfe   :  { %662 = vmatprep.subr.bf16.mxu0 %v6161_v7  ;;  %v6228_v7 = vld [vmem:[#allocation3 + $0x368] ss:$48 sps:$4 sm:$0xff]  }
 0x101   :  { %663 = vmatpush1.bf16.msra.mxu0 %v6159_v8  ;;  %v6233_v8 = vld [vmem:[#allocation3 + $0x3cc] ss:$48 sps:$4 sm:$0xff]  }
 0x102   :  { %664 = vmatprep.subr.bf16.mxu0 %v6164_v9  ;;  %v6231_v9 = vld [vmem:[#allocation3 + $0x3c8] ss:$48 sps:$4 sm:$0xff]  }
 0x105   :  { %665 = vmatpush1.bf16.msra.mxu0 %v6162_v10  ;;  %v6236_v10 = vld [vmem:[#allocation3 + $0x42c] ss:$48 sps:$4 sm:$0xff]  }
 0x106   :  { %666 = vmatprep.subr.bf16.mxu0 %v6167_v11  ;;  %v6234_v11 = vld [vmem:[#allocation3 + $0x428] ss:$48 sps:$4 sm:$0xff]  }
 0x109   :  { %667 = vmatpush1.bf16.msra.mxu0 %v6165_v12  ;;  %v6239_v12 = vld [vmem:[#allocation3 + $0x48c] ss:$48 sps:$4 sm:$0xff]  }
 0x10a   :  { %668 = vmatprep.subr.bf16.mxu0 %v6170_v13  ;;  %v6237_v13 = vld [vmem:[#allocation3 + $0x488] ss:$48 sps:$4 sm:$0xff]  }
 0x10d   :  { %669 = vmatpush1.bf16.msra.mxu0 %v6168_v15  ;;  %v6242_v15 = vld [vmem:[#allocation3 + $0x4ec] ss:$48 sps:$4 sm:$0xff]  }
 0x10e   :  { %670 = vmatprep.subr.bf16.mxu0 %v6173_v16  ;;  %v6240_v16 = vld [vmem:[#allocation3 + $0x4e8] ss:$48 sps:$4 sm:$0xff]  }
 0x111   :  { %671 = vmatpush1.bf16.msra.mxu0 %v6171_v17  ;;  %v6245_v17 = vld [vmem:[#allocation3 + $0x54c] ss:$48 sps:$4 sm:$0xff]  }
 0x112   :  { %681 = vmatprep.subr.bf16.mxu0 %v6178_v18  ;;  %v6243_v18 = vld [vmem:[#allocation3 + $0x548] ss:$48 sps:$4 sm:$0xff]  }
 0x114   :  { %673 = vmatmul.mubr.bf16.vlgmr.msra.gmra.mrb[0].mxu0 %v7242_v20 }
 0x115   :  { %682 = vmatpush1.bf16.msra.mxu0 %v6176_v19  ;;  %713 = vmatprep.mubr.bf16.mxu0 %v7049_v24  ;;  %v6248_v19 = vld [vmem:[#allocation3 + $0x5ac] ss:$48 sps:$4 sm:$0xff]  }
 0x116   :  { %683 = vmatprep.subr.bf16.mxu0 %v6181_v21  ;;  %v6246_v21 = vld [vmem:[#allocation3 + $0x5a8] ss:$48 sps:$4 sm:$0xff]  }
 0x119   :  { %684 = vmatpush1.bf16.msra.mxu0 %v6179_v23  ;;  %v6249_v23 = vld [vmem:[#allocation3 + $0x608] ss:$48 sps:$4 sm:$0xff]  }
 0x11a   :  { %5265 = vmatprep.subr.msk.bf16.mxu0 %vm592_vm0, %v5264_v25  ;;  %v6254_v25 = vld [vmem:[#allocation3 + $0x66c] ss:$48 sps:$4 sm:$0xff]  }
 0x11d   :  { %686 = vmatpush1.bf16.msra.mxu0 %v594_v27  ;;  %v6257_v27 = vld [vmem:[#allocation3 + $0x6cc] ss:$48 sps:$4 sm:$0xff]  }
 0x120   :  { %5266 = vmatmul.mubr.msk.bf16.vlgmr.msra.gmra.mrb[0].mxu0 %vm588_vm1, %v7251_v28 }
 0x1f3   :  { %v715_v41 = vpop.f32.mrb[0].mxu0 }
 0x1f4   :  { %v6001_v42 = vadd.f32 %v715_v41, %v219_v39  ;;  %v717_v43 = vpop.f32.mrb[1].mxu0  ;;  %v6269_v39 = vld [vmem:[#allocation3 + $0x84c] ss:$48 sps:$4 sm:$0xff]  }
 0x1f5   :  { %v6002_v44 = vadd.f32 %v717_v43, %v223_v40  ;;  %v719_v45 = vpop.f32.mrb[2].mxu0  ;;  %v6267_v40 = vld [vmem:[#allocation3 + $0x848] ss:$48 sps:$4 sm:$0xff]   ;;  %v6272_v41 = vld [vmem:[#allocation3 + $0x8ac] ss:$48 sps:$4 sm:$0xff]  }
 0x1f6   :  { %v722_v46 = vmax.f32 %v6001_v42, 0.0  ;;  %v720_v48 = vpop.f32.mrb[3].mxu0  ;;  %v6270_v42 = vld [vmem:[#allocation3 + $0x8a8] ss:$48 sps:$4 sm:$0xff]   ;;  %v6275_v43 = vld [vmem:[#allocation3 + $0x90c] ss:$48 sps:$4 sm:$0xff]  }
 0x1f7   :  { %v723_v49 = vmax.f32 %v6002_v44, 0.0  ;;  %v6273_v44 = vld [vmem:[#allocation3 + $0x908] ss:$48 sps:$4 sm:$0xff]   ;;  %v6278_v45 = vld [vmem:[#allocation3 + $0x96c] ss:$48 sps:$4 sm:$0xff]  }
 0x1f8   :  { %v724_v53 = vpack.c.bf16 %v722_v46, %v722_v46  ;;  %v6276_v46 = vld [vmem:[#allocation3 + $0x968] ss:$48 sps:$4 sm:$0xff]   ;;  %v6281_v48 = vld [vmem:[#allocation3 + $0x9cc] ss:$48 sps:$4 sm:$0xff]  }
 0x1f9   :  { %v725_v51 = vpack.c.bf16 %v723_v49, %v723_v49  ;;  %v6279_v49 = vld [vmem:[#allocation3 + $0x9c8] ss:$48 sps:$4 sm:$0xff]  }
 0x1fb   :  { %886 = vmatprep.mubr.bf16.mxu1 %v725_v51  ;;  %v6305_v51 = vld [vmem:[#allocation7 + $0x40] sm:$0xff]  }
 0x1fc   :  { %887 = vmatmul.mubr.bf16.vlgmr.msra.gmra.mrb[0].mxu1 %v724_v53  ;;  %v6307_v53 = vld [vmem:[#allocation7 + $0x48] sm:$0xff]   ;;  %5762 = vmatprep.subr.bf16.mxu0 %v6305_v51 }
 0x1fd   :  { %1344 = vmatpush1.bf16.msra.mxu1 %v6201_v52  ;;  %1375 = vmatprep.mubr.bf16.mxu1 %v7224_v14  ;;  %v6306_v52 = vld [vmem:[#allocation7] sm:$0xff]   ;;  %v6329_v51 = vld [vmem:[#allocation3 + $0xd4] ss:$48 sps:$4 sm:$0xff]  }
 0x1fe   :  { %1345 = vmatprep.subr.bf16.mxu1 %v6206_v54  ;;  %v6284_v54 = vld [vmem:[#allocation3 + $0xa2c] ss:$48 sps:$4 sm:$0xff]   ;;  %5763 = vmatpush3.bf16.msra.mxu0 %v6306_v52  ;;  %v6327_v52 = vld [vmem:[#allocation3 + $0xd0] ss:$48 sps:$4 sm:$0xff]  }
 0x1ff   :  { %5764 = vmatprep.subr.bf16.mxu0 %v6307_v53  ;;  %v6332_v53 = vld [vmem:[#allocation3 + $0x134] ss:$48 sps:$4 sm:$0xff]  }
 0x201   :  { %1346 = vmatpush1.bf16.msra.mxu1 %v6204_v55  ;;  %v6308_v55 = vld [vmem:[#allocation7 + $0x8] sm:$0xff]  }
 0x202   :  { %1347 = vmatprep.subr.bf16.mxu1 %v6209_v56  ;;  %v6282_v56 = vld [vmem:[#allocation3 + $0xa28] ss:$48 sps:$4 sm:$0xff]   ;;  %5765 = vmatpush3.bf16.msra.mxu0 %v6308_v55  ;;  %v6335_v55 = vld [vmem:[#allocation3 + $0x194] ss:$48 sps:$4 sm:$0xff]  }
 0x205   :  { %1348 = vmatpush1.bf16.msra.mxu1 %v6207_v57  ;;  %v6309_v57 = vld [vmem:[#allocation7 + $0x50] sm:$0xff]  }
 0x206   :  { %1349 = vmatprep.subr.bf16.mxu1 %v6212_v58  ;;  %v6287_v58 = vld [vmem:[#allocation3 + $0xa8c] ss:$48 sps:$4 sm:$0xff]   ;;  %5766 = vmatprep.subr.bf16.mxu0 %v6309_v57  ;;  %v6338_v57 = vld [vmem:[#allocation3 + $0x1f4] ss:$48 sps:$4 sm:$0xff]  }
 0x209   :  { %1350 = vmatpush1.bf16.msra.mxu1 %v6210_v59  ;;  %v6310_v59 = vld [vmem:[#allocation7 + $0x10] sm:$0xff]  }
 0x20a   :  { %1351 = vmatprep.subr.bf16.mxu1 %v6215_v60  ;;  %v6285_v60 = vld [vmem:[#allocation3 + $0xa88] ss:$48 sps:$4 sm:$0xff]   ;;  %5767 = vmatpush3.bf16.msra.mxu0 %v6310_v59  ;;  %v6341_v59 = vld [vmem:[#allocation3 + $0x254] ss:$48 sps:$4 sm:$0xff]  }
 0x20d   :  { %1352 = vmatpush1.bf16.msra.mxu1 %v6213_v61  ;;  %v6311_v61 = vld [vmem:[#allocation7 + $0x58] sm:$0xff]  }
 0x20e   :  { %1353 = vmatprep.subr.bf16.mxu1 %v6218_v62  ;;  %v6290_v62 = vld [vmem:[#allocation3 + $0xaec] ss:$48 sps:$4 sm:$0xff]   ;;  %5768 = vmatprep.subr.bf16.mxu0 %v6311_v61  ;;  %v6344_v61 = vld [vmem:[#allocation3 + $0x2b4] ss:$48 sps:$4 sm:$0xff]  }
 0x211   :  { %1354 = vmatpush1.bf16.msra.mxu1 %v6216_v63  ;;  %v6312_v63 = vld [vmem:[#allocation7 + $0x18] sm:$0xff]  }
 0x212   :  { %1355 = vmatprep.subr.bf16.mxu1 %v6221_v0  ;;  %v6288_v0 = vld [vmem:[#allocation3 + $0xae8] ss:$48 sps:$4 sm:$0xff]   ;;  %5769 = vmatpush3.bf16.msra.mxu0 %v6312_v63  ;;  %v6347_v63 = vld [vmem:[#allocation3 + $0x314] ss:$48 sps:$4 sm:$0xff]  }
 0x215   :  { %1356 = vmatpush1.bf16.msra.mxu1 %v6219_v1  ;;  %v6313_v1 = vld [vmem:[#allocation7 + $0x60] sm:$0xff]  }
 0x216   :  { %1357 = vmatprep.subr.bf16.mxu1 %v6224_v2  ;;  %v6293_v2 = vld [vmem:[#allocation3 + $0xb4c] ss:$48 sps:$4 sm:$0xff]   ;;  %5770 = vmatprep.subr.bf16.mxu0 %v6313_v1  ;;  %v6350_v1 = vld [vmem:[#allocation3 + $0x374] ss:$48 sps:$4 sm:$0xff]  }
 0x219   :  { %1358 = vmatpush1.bf16.msra.mxu1 %v6222_v3  ;;  %v6314_v3 = vld [vmem:[#allocation7 + $0x20] sm:$0xff]  }
 0x21a   :  { %1359 = vmatprep.subr.bf16.mxu1 %v6227_v4  ;;  %v6291_v4 = vld [vmem:[#allocation3 + $0xb48] ss:$48 sps:$4 sm:$0xff]   ;;  %5771 = vmatpush3.bf16.msra.mxu0 %v6314_v3  ;;  %v6353_v3 = vld [vmem:[#allocation3 + $0x3d4] ss:$48 sps:$4 sm:$0xff]  }
 0x21d   :  { %1360 = vmatpush1.bf16.msra.mxu1 %v6225_v5  ;;  %v6315_v5 = vld [vmem:[#allocation7 + $0x68] sm:$0xff]  }
 0x21e   :  { %1361 = vmatprep.subr.bf16.mxu1 %v6230_v6  ;;  %v6296_v6 = vld [vmem:[#allocation3 + $0xbac] ss:$48 sps:$4 sm:$0xff]   ;;  %5772 = vmatprep.subr.bf16.mxu0 %v6315_v5  ;;  %v6356_v5 = vld [vmem:[#allocation3 + $0x434] ss:$48 sps:$4 sm:$0xff]  }
 0x221   :  { %1362 = vmatpush1.bf16.msra.mxu1 %v6228_v7  ;;  %v6316_v7 = vld [vmem:[#allocation7 + $0x28] sm:$0xff]  }
 0x222   :  { %1363 = vmatprep.subr.bf16.mxu1 %v6233_v8  ;;  %v6294_v8 = vld [vmem:[#allocation3 + $0xba8] ss:$48 sps:$4 sm:$0xff]   ;;  %5773 = vmatpush3.bf16.msra.mxu0 %v6316_v7  ;;  %v6359_v7 = vld [vmem:[#allocation3 + $0x494] ss:$48 sps:$4 sm:$0xff]  }
 0x225   :  { %1364 = vmatpush1.bf16.msra.mxu1 %v6231_v9  ;;  %v6299_v9 = vld [vmem:[#allocation3 + $0xc0c] ss:$48 sps:$4 sm:$0xff]  }
 0x226   :  { %1365 = vmatprep.subr.bf16.mxu1 %v6236_v10  ;;  %v6297_v10 = vld [vmem:[#allocation3 + $0xc08] ss:$48 sps:$4 sm:$0xff]  }
 0x229   :  { %1366 = vmatpush1.bf16.msra.mxu1 %v6234_v11  ;;  %v6302_v11 = vld [vmem:[#allocation3 + $0xc6c] ss:$48 sps:$4 sm:$0xff]  }
 0x22a   :  { %1367 = vmatprep.subr.bf16.mxu1 %v6239_v12  ;;  %v979_v12 = vld [vmem:[#allocation3 + $0xcc8] sm:$0x77] }
 0x22d   :  { %1368 = vmatpush1.bf16.msra.mxu1 %v6237_v13  ;;  %v6300_v13 = vld [vmem:[#allocation3 + $0xc68] ss:$48 sps:$4 sm:$0xff]  }
 0x22e   :  { %1369 = vmatprep.subr.bf16.mxu1 %v6242_v15  ;;  %v5352_v15 = vcombine.high %v979_v12, %v979_v12 }
 0x231   :  { %1370 = vmatpush1.bf16.msra.mxu1 %v6240_v16  ;;  %v5351_v16 = vcombine.low %v979_v12, %v979_v12  ;;  %v6363_v12 = vld [vmem:[#allocation3 + $0x550] ss:$48 sps:$4 sm:$0xff]  }
 0x232   :  { %1371 = vmatprep.subr.bf16.mxu1 %v6245_v17 }
 0x233   :  { %v1338_v17 = vsel %vm592_vm0, %v5351_v16, 0  ;;  %v6371_v16 = vld [vmem:[#allocation3 + $0x614] ss:$48 sps:$4 sm:$0xff]  }
 0x235   :  { %1372 = vmatpush1.bf16.msra.mxu1 %v6243_v18 }
 0x236   :  { %1373 = vmatprep.subr.bf16.mxu1 %v6248_v19 }
 0x239   :  { %1374 = vmatpush1.bf16.msra.mxu1 %v6246_v21 }
 0x23a   :  { %1384 = vmatprep.subr.bf16.mxu1 %v6251_v22 }
 0x23c   :  { %1376 = vmatmul.mubr.bf16.vlgmr.msra.gmra.mrb[4].mxu1 %v7232_v47 }
 0x23d   :  { %1385 = vmatpush1.bf16.msra.mxu1 %v6249_v23  ;;  %1416 = vmatprep.mubr.bf16.mxu1 %v7236_v50 }
 0x23e   :  { %1386 = vmatprep.subr.bf16.mxu1 %v6254_v25  ;;  %v6317_v25 = vld [vmem:[#allocation7 + $0x70] sm:$0xff]  }
 0x23f   :  { %5774 = vmatprep.subr.bf16.mxu0 %v6317_v25  ;;  %v6380_v25 = vld [vmem:[#allocation3 + $0x734] ss:$48 sps:$4 sm:$0xff]  }
 0x241   :  { %1387 = vmatpush1.bf16.msra.mxu1 %v6252_v26  ;;  %v6318_v26 = vld [vmem:[#allocation7 + $0x30] sm:$0xff]  }
 0x242   :  { %1388 = vmatprep.subr.bf16.mxu1 %v6257_v27  ;;  %5775 = vmatpush3.bf16.msra.mxu0 %v6318_v26  ;;  %v6319_v27 = vld [vmem:[#allocation7 + $0x78] sm:$0xff]   ;;  %v6378_v26 = vld [vmem:[#allocation3 + $0x730] ss:$48 sps:$4 sm:$0xff]  }
 0x243   :  { %5776 = vmatprep.subr.bf16.mxu0 %v6319_v27  ;;  %v6383_v27 = vld [vmem:[#allocation3 + $0x794] ss:$48 sps:$4 sm:$0xff]  }
 0x245   :  { %1389 = vmatpush1.bf16.msra.mxu1 %v6255_v29  ;;  %v6320_v29 = vld [vmem:[#allocation7 + $0x38] sm:$0xff]  }
 0x246   :  { %1390 = vmatprep.subr.bf16.mxu1 %v6260_v30  ;;  %5777 = vmatpush3.bf16.msra.mxu0 %v6320_v29  ;;  %v6323_v30 = vld [vmem:[#allocation3 + $0x14] ss:$48 sps:$4 sm:$0xff]   ;;  %v6381_v29 = vld [vmem:[#allocation3 + $0x790] ss:$48 sps:$4 sm:$0xff]  }
 0x247   :  { %2087 = vmatprep.subr.bf16.mxu0 %v6323_v30  ;;  %v6386_v30 = vld [vmem:[#allocation3 + $0x7f4] ss:$48 sps:$4 sm:$0xff]  }
 0x249   :  { %1391 = vmatpush1.bf16.msra.mxu1 %v6258_v31  ;;  %v980_v31 = vld [vmem:[#allocation5 + $0x2] sm:$0x3] }
 0x24a   :  { %1392 = vmatprep.subr.bf16.mxu1 %v6263_v32  ;;  %v985_v32 = vrot.slane %v980_v31, %v7258_v36 }
 0x24d   :  { %1393 = vmatpush1.bf16.msra.mxu1 %v6261_v33 }
 0x24e   :  { %1394 = vmatprep.subr.bf16.mxu1 %v6266_v34 }
 0x251   :  { %1395 = vmatpush1.bf16.msra.mxu1 %v6264_v37 }
 0x252   :  { %1396 = vmatprep.subr.bf16.mxu1 %v6269_v39 }
 0x255   :  { %1397 = vmatpush1.bf16.msra.mxu1 %v6267_v40 }
 0x256   :  { %1398 = vmatprep.subr.bf16.mxu1 %v6272_v41 }
 0x259   :  { %1399 = vmatpush1.bf16.msra.mxu1 %v6270_v42 }
 0x25a   :  { %1400 = vmatprep.subr.bf16.mxu1 %v6275_v43 }
 0x25d   :  { %1401 = vmatpush1.bf16.msra.mxu1 %v6273_v44 }
 0x25e   :  { %1402 = vmatprep.subr.bf16.mxu1 %v6278_v45  ;;  %v6321_v45 = vld [vmem:[#allocation3 + $0x10] ss:$48 sps:$4 sm:$0xff]  }
 0x261   :  { %1403 = vmatpush1.bf16.msra.mxu1 %v6276_v46 }
 0x262   :  { %1404 = vmatprep.subr.bf16.mxu1 %v6281_v48  ;;  %v6326_v48 = vld [vmem:[#allocation3 + $0x74] ss:$48 sps:$4 sm:$0xff]  }
 0x265   :  { %1405 = vmatpush1.bf16.msra.mxu1 %v6279_v49  ;;  %v6324_v49 = vld [vmem:[#allocation3 + $0x70] ss:$48 sps:$4 sm:$0xff]  }
 0x266   :  { %1406 = vmatprep.subr.bf16.mxu1 %v6284_v54  ;;  %v6330_v54 = vld [vmem:[#allocation3 + $0x130] ss:$48 sps:$4 sm:$0xff]  }
 0x269   :  { %1407 = vmatpush1.bf16.msra.mxu1 %v6282_v56  ;;  %v6333_v56 = vld [vmem:[#allocation3 + $0x190] ss:$48 sps:$4 sm:$0xff]  }
 0x26a   :  { %1408 = vmatprep.subr.bf16.mxu1 %v6287_v58  ;;  %v6336_v58 = vld [vmem:[#allocation3 + $0x1f0] ss:$48 sps:$4 sm:$0xff]  }
 0x26d   :  { %1409 = vmatpush1.bf16.msra.mxu1 %v6285_v60  ;;  %v6339_v60 = vld [vmem:[#allocation3 + $0x250] ss:$48 sps:$4 sm:$0xff]  }
 0x26e   :  { %1410 = vmatprep.subr.bf16.mxu1 %v6290_v62  ;;  %v6342_v62 = vld [vmem:[#allocation3 + $0x2b0] ss:$48 sps:$4 sm:$0xff]  }
 0x271   :  { %1411 = vmatpush1.bf16.msra.mxu1 %v6288_v0  ;;  %v6345_v0 = vld [vmem:[#allocation3 + $0x310] ss:$48 sps:$4 sm:$0xff]  }
 0x272   :  { %1412 = vmatprep.subr.bf16.mxu1 %v6293_v2  ;;  %v6348_v2 = vld [vmem:[#allocation3 + $0x370] ss:$48 sps:$4 sm:$0xff]  }
 0x275   :  { %1413 = vmatpush1.bf16.msra.mxu1 %v6291_v4  ;;  %v6351_v4 = vld [vmem:[#allocation3 + $0x3d0] ss:$48 sps:$4 sm:$0xff]  }
 0x276   :  { %1414 = vmatprep.subr.bf16.mxu1 %v6296_v6  ;;  %v6354_v6 = vld [vmem:[#allocation3 + $0x430] ss:$48 sps:$4 sm:$0xff]  }
 0x279   :  { %1415 = vmatpush1.bf16.msra.mxu1 %v6294_v8  ;;  %v6357_v8 = vld [vmem:[#allocation3 + $0x490] ss:$48 sps:$4 sm:$0xff]  }
 0x27a   :  { %1425 = vmatprep.subr.bf16.mxu1 %v6299_v9  ;;  %v6362_v9 = vld [vmem:[#allocation3 + $0x4f4] ss:$48 sps:$4 sm:$0xff]  }
 0x27c   :  { %1417 = vmatmul.mubr.bf16.vlgmr.msra.gmra.mrb[4].mxu1 %v7242_v20 }
 0x27d   :  { %1426 = vmatpush1.bf16.msra.mxu1 %v6297_v10  ;;  %1457 = vmatprep.mubr.bf16.mxu1 %v7049_v24  ;;  %v6360_v10 = vld [vmem:[#allocation3 + $0x4f0] ss:$48 sps:$4 sm:$0xff]  }
 0x27e   :  { %1427 = vmatprep.subr.bf16.mxu1 %v6302_v11  ;;  %v6365_v11 = vld [vmem:[#allocation3 + $0x554] ss:$48 sps:$4 sm:$0xff]  }
 0x281   :  { %1428 = vmatpush1.bf16.msra.mxu1 %v6300_v13  ;;  %v6368_v13 = vld [vmem:[#allocation3 + $0x5b4] ss:$48 sps:$4 sm:$0xff]  }
 0x282   :  { %5353 = vmatprep.subr.msk.bf16.mxu1 %vm592_vm0, %v5352_v15  ;;  %v6366_v15 = vld [vmem:[#allocation3 + $0x5b0] ss:$48 sps:$4 sm:$0xff]  }
 0x285   :  { %1430 = vmatpush1.bf16.msra.mxu1 %v1338_v17  ;;  %v6369_v17 = vld [vmem:[#allocation3 + $0x610] ss:$48 sps:$4 sm:$0xff]  }
 0x288   :  { %5354 = vmatmul.mubr.msk.bf16.vlgmr.msra.gmra.mrb[4].mxu1 %vm588_vm1, %v7251_v28  ;;  %v989_v28 = vrot.slane %v980_v31, %v7261_v38  ;;  %v6384_v31 = vld [vmem:[#allocation3 + $0x7f0] ss:$48 sps:$4 sm:$0xff]  }
 0x2cf   :  { %v5756_v18 = vpop.f32.mrb[0].mxu1 }
 0x2d0   :  { %v5757_v19 = vpop.f32.mrb[1].mxu1 }
 0x2d1   :  { %v7274_v21 = vadd.f32 %v5757_v19, %v5756_v18  ;;  %v5759_v22 = vpop.f32.mrb[2].mxu1  ;;  %v6374_v18 = vld [vmem:[#allocation3 + $0x674] ss:$48 sps:$4 sm:$0xff]   ;;  %v6372_v19 = vld [vmem:[#allocation3 + $0x670] ss:$48 sps:$4 sm:$0xff]  }
 0x2d2   :  { %v5760_v23 = vpop.f32.mrb[3].mxu1  ;;  %v6377_v22 = vld [vmem:[#allocation3 + $0x6d4] ss:$48 sps:$4 sm:$0xff]  }
 0x2d3   :  { %v6375_v23 = vld [vmem:[#allocation3 + $0x6d0] ss:$48 sps:$4 sm:$0xff]  }
 0x35b   :  { %v1459_v33 = vpop.f32.mrb[4].mxu1 }
 0x35c   :  { %v6003_v34 = vadd.f32 %v1459_v33, %v985_v32  ;;  %v1461_v37 = vpop.f32.mrb[5].mxu1  ;;  %v6389_v32 = vld [vmem:[#allocation3 + $0x854] ss:$48 sps:$4 sm:$0xff]  }
 0x35d   :  { %v6004_v39 = vadd.f32 %v1461_v37, %v989_v28  ;;  %v1463_v40 = vpop.f32.mrb[6].mxu1  ;;  %v6387_v28 = vld [vmem:[#allocation3 + $0x850] ss:$48 sps:$4 sm:$0xff]   ;;  %v6392_v33 = vld [vmem:[#allocation3 + $0x8b4] ss:$48 sps:$4 sm:$0xff]  }
 0x35e   :  { %v1466_v41 = vmax.f32 %v6003_v34, 0.0  ;;  %v1464_v42 = vpop.f32.mrb[7].mxu1  ;;  %v6390_v34 = vld [vmem:[#allocation3 + $0x8b0] ss:$48 sps:$4 sm:$0xff]   ;;  %v6395_v37 = vld [vmem:[#allocation3 + $0x914] ss:$48 sps:$4 sm:$0xff]  }
 0x35f   :  { %v1467_v43 = vmax.f32 %v6004_v39, 0.0  ;;  %v6393_v39 = vld [vmem:[#allocation3 + $0x910] ss:$48 sps:$4 sm:$0xff]   ;;  %v6398_v40 = vld [vmem:[#allocation3 + $0x974] ss:$48 sps:$4 sm:$0xff]  }
 0x360   :  { %v1468_v46 = vpack.c.bf16 %v1466_v41, %v1466_v41  ;;  %v6396_v41 = vld [vmem:[#allocation3 + $0x970] ss:$48 sps:$4 sm:$0xff]   ;;  %v6401_v42 = vld [vmem:[#allocation3 + $0x9d4] ss:$48 sps:$4 sm:$0xff]  }
 0x361   :  { %v1469_v44 = vpack.c.bf16 %v1467_v43, %v1467_v43  ;;  %v6399_v43 = vld [vmem:[#allocation3 + $0x9d0] ss:$48 sps:$4 sm:$0xff]  }
 0x363   :  { %1630 = vmatprep.mubr.bf16.mxu0 %v1469_v44  ;;  %v6404_v44 = vld [vmem:[#allocation3 + $0xa34] ss:$48 sps:$4 sm:$0xff]  }
 0x364   :  { %1631 = vmatmul.mubr.bf16.vlgmr.msra.gmra.mrb[4].mxu0 %v1468_v46  ;;  %v6426_v46 = vld [vmem:[#allocation7] sm:$0xff]  }
 0x365   :  { %2088 = vmatpush1.bf16.msra.mxu0 %v6321_v45  ;;  %2119 = vmatprep.mubr.bf16.mxu0 %v7224_v14  ;;  %v6425_v45 = vld [vmem:[#allocation7 + $0x40] sm:$0xff]  }
 0x366   :  { %2089 = vmatprep.subr.bf16.mxu0 %v6326_v48  ;;  %v6427_v48 = vld [vmem:[#allocation7 + $0x48] sm:$0xff]   ;;  %5784 = vmatprep.subr.bf16.mxu1 %v6425_v45 }
 0x367   :  { %5785 = vmatpush3.bf16.msra.mxu1 %v6426_v46 }
 0x368   :  { %5786 = vmatprep.subr.bf16.mxu1 %v6427_v48 }
 0x369   :  { %2090 = vmatpush1.bf16.msra.mxu0 %v6324_v49  ;;  %v6402_v49 = vld [vmem:[#allocation3 + $0xa30] ss:$48 sps:$4 sm:$0xff]  }
 0x36a   :  { %2091 = vmatprep.subr.bf16.mxu0 %v6329_v51  ;;  %v6407_v51 = vld [vmem:[#allocation3 + $0xa94] ss:$48 sps:$4 sm:$0xff]  }
 0x36d   :  { %2092 = vmatpush1.bf16.msra.mxu0 %v6327_v52  ;;  %v6428_v52 = vld [vmem:[#allocation7 + $0x8] sm:$0xff]  }
 0x36e   :  { %2093 = vmatprep.subr.bf16.mxu0 %v6332_v53  ;;  %v6429_v53 = vld [vmem:[#allocation7 + $0x50] sm:$0xff]   ;;  %5787 = vmatpush3.bf16.msra.mxu1 %v6428_v52  ;;  %v6439_v52 = vld [vmem:[#allocation7 + $0x78] sm:$0xff]  }
 0x36f   :  { %5788 = vmatprep.subr.bf16.mxu1 %v6429_v53  ;;  %v6440_v53 = vld [vmem:[#allocation7 + $0x38] sm:$0xff]  }
 0x371   :  { %2094 = vmatpush1.bf16.msra.mxu0 %v6330_v54  ;;  %v6405_v54 = vld [vmem:[#allocation3 + $0xa90] ss:$48 sps:$4 sm:$0xff]  }
 0x372   :  { %2095 = vmatprep.subr.bf16.mxu0 %v6335_v55  ;;  %v6410_v55 = vld [vmem:[#allocation3 + $0xaf4] ss:$48 sps:$4 sm:$0xff]  }
 0x375   :  { %2096 = vmatpush1.bf16.msra.mxu0 %v6333_v56  ;;  %v6430_v56 = vld [vmem:[#allocation7 + $0x10] sm:$0xff]  }
 0x376   :  { %2097 = vmatprep.subr.bf16.mxu0 %v6338_v57  ;;  %v6431_v57 = vld [vmem:[#allocation7 + $0x58] sm:$0xff]   ;;  %5789 = vmatpush3.bf16.msra.mxu1 %v6430_v56 }
 0x377   :  { %5790 = vmatprep.subr.bf16.mxu1 %v6431_v57 }
 0x379   :  { %2098 = vmatpush1.bf16.msra.mxu0 %v6336_v58  ;;  %v6408_v58 = vld [vmem:[#allocation3 + $0xaf0] ss:$48 sps:$4 sm:$0xff]  }
 0x37a   :  { %2099 = vmatprep.subr.bf16.mxu0 %v6341_v59  ;;  %v6413_v59 = vld [vmem:[#allocation3 + $0xb54] ss:$48 sps:$4 sm:$0xff]  }
 0x37d   :  { %2100 = vmatpush1.bf16.msra.mxu0 %v6339_v60  ;;  %v6432_v60 = vld [vmem:[#allocation7 + $0x18] sm:$0xff]  }
 0x37e   :  { %2101 = vmatprep.subr.bf16.mxu0 %v6344_v61  ;;  %v6433_v61 = vld [vmem:[#allocation7 + $0x60] sm:$0xff]   ;;  %5791 = vmatpush3.bf16.msra.mxu1 %v6432_v60 }
 0x37f   :  { %5792 = vmatprep.subr.bf16.mxu1 %v6433_v61  ;;  %v6443_v60 = vld [vmem:[#allocation3 + $0x1c] ss:$48 sps:$4 sm:$0xff]  }
 0x381   :  { %2102 = vmatpush1.bf16.msra.mxu0 %v6342_v62  ;;  %v6411_v62 = vld [vmem:[#allocation3 + $0xb50] ss:$48 sps:$4 sm:$0xff]  }
 0x382   :  { %2103 = vmatprep.subr.bf16.mxu0 %v6347_v63  ;;  %v6416_v63 = vld [vmem:[#allocation3 + $0xbb4] ss:$48 sps:$4 sm:$0xff]  }
 0x385   :  { %2104 = vmatpush1.bf16.msra.mxu0 %v6345_v0  ;;  %v6434_v0 = vld [vmem:[#allocation7 + $0x20] sm:$0xff]  }
 0x386   :  { %2105 = vmatprep.subr.bf16.mxu0 %v6350_v1  ;;  %v6435_v1 = vld [vmem:[#allocation7 + $0x68] sm:$0xff]   ;;  %5793 = vmatpush3.bf16.msra.mxu1 %v6434_v0 }
 0x387   :  { %5794 = vmatprep.subr.bf16.mxu1 %v6435_v1 }
 0x389   :  { %2106 = vmatpush1.bf16.msra.mxu0 %v6348_v2  ;;  %v6414_v2 = vld [vmem:[#allocation3 + $0xbb0] ss:$48 sps:$4 sm:$0xff]  }
 0x38a   :  { %2107 = vmatprep.subr.bf16.mxu0 %v6353_v3  ;;  %v6419_v3 = vld [vmem:[#allocation3 + $0xc14] ss:$48 sps:$4 sm:$0xff]  }
 0x38d   :  { %2108 = vmatpush1.bf16.msra.mxu0 %v6351_v4  ;;  %v6436_v4 = vld [vmem:[#allocation7 + $0x28] sm:$0xff]  }
 0x38e   :  { %2109 = vmatprep.subr.bf16.mxu0 %v6356_v5  ;;  %v6417_v5 = vld [vmem:[#allocation3 + $0xc10] ss:$48 sps:$4 sm:$0xff]   ;;  %5795 = vmatpush3.bf16.msra.mxu1 %v6436_v4 }
 0x391   :  { %2110 = vmatpush1.bf16.msra.mxu0 %v6354_v6  ;;  %v6422_v6 = vld [vmem:[#allocation3 + $0xc74] ss:$48 sps:$4 sm:$0xff]  }
 0x392   :  { %2111 = vmatprep.subr.bf16.mxu0 %v6359_v7  ;;  %v1723_v7 = vld [vmem:[#allocation3 + $0xcd0] sm:$0x77] }
 0x395   :  { %2112 = vmatpush1.bf16.msra.mxu0 %v6357_v8  ;;  %v6420_v8 = vld [vmem:[#allocation3 + $0xc70] ss:$48 sps:$4 sm:$0xff]  }
 0x396   :  { %2113 = vmatprep.subr.bf16.mxu0 %v6362_v9  ;;  %v5440_v9 = vcombine.high %v1723_v7, %v1723_v7 }
 0x399   :  { %2114 = vmatpush1.bf16.msra.mxu0 %v6360_v10  ;;  %v5439_v10 = vcombine.low %v1723_v7, %v1723_v7 }
 0x39a   :  { %2115 = vmatprep.subr.bf16.mxu0 %v6365_v11 }
 0x39b   :  { %v2082_v11 = vsel %vm592_vm0, %v5439_v10, 0  ;;  %v6441_v10 = vld [vmem:[#allocation3 + $0x18] ss:$48 sps:$4 sm:$0xff]  }
 0x39d   :  { %2116 = vmatpush1.bf16.msra.mxu0 %v6363_v12  ;;  %v7288_v12 = vld [vmem:[%s7566_s0 + $0x10] ss:$0 sps:$4 sm:$0xff]  }
 0x39e   :  { %2117 = vmatprep.subr.bf16.mxu0 %v6368_v13  ;;  %v7050_v13 = vmov 0.0  }
 0x3a1   :  { %2118 = vmatpush1.bf16.msra.mxu0 %v6366_v15  ;;  %v7294_v15 = vsel %vm142_vm2, 1.0, %v7050_v13 }
 0x3a2   :  { %2128 = vmatprep.subr.bf16.mxu0 %v6371_v16  ;;  %v7298_v16 = vmul.f32 %v7274_v21, %v7294_v15 }
 0x3a4   :  { %2120 = vmatmul.mubr.bf16.vlgmr.msra.gmra.mrb[8].mxu0 %v7232_v47 }
 0x3a5   :  { %2129 = vmatpush1.bf16.msra.mxu0 %v6369_v17  ;;  %2160 = vmatprep.mubr.bf16.mxu0 %v7236_v50  ;;  %v903_v17 = vmul.f32 %v7298_v16, %v7298_v16 }
 0x3a6   :  { %2130 = vmatprep.subr.bf16.mxu0 %v6374_v18  ;;  %v896_v18 = vrot.slane %v7298_v16, 4 }
 0x3a9   :  { %2131 = vmatpush1.bf16.msra.mxu0 %v6372_v19  ;;  %v904_v19 = vrot.slane %v903_v17, 4 }
 0x3aa   :  { %2132 = vmatprep.subr.bf16.mxu0 %v6377_v22  ;;  %v897_v22 = vadd.f32 %v896_v18, %v7298_v16  ;;  %v6444_v18 = vld [vmem:[#allocation3 + $0x78] ss:$48 sps:$4 sm:$0xff]  }
 0x3ad   :  { %2133 = vmatpush1.bf16.msra.mxu0 %v6375_v23 }
 0x3ae   :  { %2134 = vmatprep.subr.bf16.mxu0 %v6380_v25 }
 0x3b1   :  { %2135 = vmatpush1.bf16.msra.mxu0 %v6378_v26  ;;  %v905_v26 = vadd.f32 %v904_v19, %v903_v17  ;;  %v6446_v17 = vld [vmem:[#allocation3 + $0x7c] ss:$48 sps:$4 sm:$0xff]  }
 0x3b2   :  { %2136 = vmatprep.subr.bf16.mxu0 %v6383_v27  ;;  %v6449_v19 = vld [vmem:[#allocation3 + $0xdc] ss:$48 sps:$4 sm:$0xff]  }
 0x3b3   :  { %v906_v21 = vrot.slane %v905_v26, 2 }
 0x3b5   :  { %2137 = vmatpush1.bf16.msra.mxu0 %v6381_v29 }
 0x3b6   :  { %2138 = vmatprep.subr.bf16.mxu0 %v6386_v30  ;;  %v898_v30 = vrot.slane %v897_v22, 2 }
 0x3b9   :  { %2139 = vmatpush1.bf16.msra.mxu0 %v6384_v31 }
 0x3ba   :  { %2140 = vmatprep.subr.bf16.mxu0 %v6389_v32 }
 0x3bd   :  { %2141 = vmatpush1.bf16.msra.mxu0 %v6387_v28 }
 0x3be   :  { %2142 = vmatprep.subr.bf16.mxu0 %v6392_v33  ;;  %v899_v33 = vadd.f32 %v898_v30, %v897_v22  ;;  %v6447_v22 = vld [vmem:[#allocation3 + $0xd8] ss:$48 sps:$4 sm:$0xff]   ;;  %v6461_v30 = vld [vmem:[#allocation3 + $0x25c] ss:$48 sps:$4 sm:$0xff]  }
 0x3c1   :  { %2143 = vmatpush1.bf16.msra.mxu0 %v6390_v34 }
 0x3c2   :  { %2144 = vmatprep.subr.bf16.mxu0 %v6395_v37 }
 0x3c5   :  { %2145 = vmatpush1.bf16.msra.mxu0 %v6393_v39  ;;  %v907_v39 = vadd.f32 %v906_v21, %v905_v26  ;;  %v6455_v26 = vld [vmem:[#allocation3 + $0x19c] ss:$48 sps:$4 sm:$0xff]   ;;  %v6459_v21 = vld [vmem:[#allocation3 + $0x258] ss:$48 sps:$4 sm:$0xff]  }
 0x3c6   :  { %2146 = vmatprep.subr.bf16.mxu0 %v6398_v40 }
 0x3c7   :  { %v908_v48 = vrot.slane %v907_v39, 1 }
 0x3c9   :  { %2147 = vmatpush1.bf16.msra.mxu0 %v6396_v41  ;;  %v909_v57 = vadd.f32 %v908_v48, %v907_v39  ;;  %v6468_v39 = vld [vmem:[#allocation3 + $0x378] ss:$48 sps:$4 sm:$0xff]  }
 0x3ca   :  { %2148 = vmatprep.subr.bf16.mxu0 %v6401_v42  ;;  %v6437_v42 = vld [vmem:[#allocation7 + $0x70] sm:$0xff]   ;;  %v6480_v48 = vld [vmem:[#allocation3 + $0x4f8] ss:$48 sps:$4 sm:$0xff]  }
 0x3cb   :  { %5796 = vmatprep.subr.bf16.mxu1 %v6437_v42  ;;  %v6476_v42 = vld [vmem:[#allocation3 + $0x43c] ss:$48 sps:$4 sm:$0xff]  }
 0x3cd   :  { %2149 = vmatpush1.bf16.msra.mxu0 %v6399_v43  ;;  %v6438_v43 = vld [vmem:[#allocation7 + $0x30] sm:$0xff]  }
 0x3ce   :  { %2150 = vmatprep.subr.bf16.mxu0 %v6404_v44  ;;  %v900_v44 = vrot.slane %v899_v33, 1  ;;  %5797 = vmatpush3.bf16.msra.mxu1 %v6438_v43  ;;  %v6474_v43 = vld [vmem:[#allocation3 + $0x438] ss:$48 sps:$4 sm:$0xff]  }
 0x3cf   :  { %5798 = vmatprep.subr.bf16.mxu1 %v6439_v52  ;;  %v6488_v52 = vld [vmem:[#allocation3 + $0x5bc] ss:$48 sps:$4 sm:$0xff]  }
 0x3d1   :  { %2151 = vmatpush1.bf16.msra.mxu0 %v6402_v49 }
 0x3d2   :  { %2152 = vmatprep.subr.bf16.mxu0 %v6407_v51  ;;  %5799 = vmatpush3.bf16.msra.mxu1 %v6440_v53  ;;  %v6486_v53 = vld [vmem:[#allocation3 + $0x5b8] ss:$48 sps:$4 sm:$0xff]  }
 0x3d3   :  { %2831 = vmatprep.subr.bf16.mxu1 %v6443_v60  ;;  %v6495_v60 = vld [vmem:[#allocation3 + $0x6d8] ss:$48 sps:$4 sm:$0xff]  }
 0x3d5   :  { %2153 = vmatpush1.bf16.msra.mxu0 %v6405_v54  ;;  %v901_v54 = vadd.f32 %v900_v44, %v899_v33  ;;  %v6467_v33 = vld [vmem:[#allocation3 + $0x31c] ss:$48 sps:$4 sm:$0xff]  }
 0x3d6   :  { %2154 = vmatprep.subr.bf16.mxu0 %v6410_v55  ;;  %v6479_v44 = vld [vmem:[#allocation3 + $0x49c] ss:$48 sps:$4 sm:$0xff]  }
 0x3d9   :  { %2155 = vmatpush1.bf16.msra.mxu0 %v6408_v58 }
 0x3da   :  { %2156 = vmatprep.subr.bf16.mxu0 %v6413_v59 }
 0x3dd   :  { %2157 = vmatpush1.bf16.msra.mxu0 %v6411_v62  ;;  %v1724_v62 = vld [vmem:[#allocation5 + $0x4] sm:$0x3] }
 0x3de   :  { %2158 = vmatprep.subr.bf16.mxu0 %v6416_v63  ;;  %v1729_v63 = vrot.slane %v1724_v62, %v7258_v36  ;;  %v1733_v0 = vrot.slane %v1724_v62, %v7261_v38  ;;  %v6500_v62 = vld [vmem:[#allocation3 + $0x73c] ss:$48 sps:$4 sm:$0xff]  }
 0x3e1   :  { %2159 = vmatpush1.bf16.msra.mxu0 %v6414_v2 }
 0x3e2   :  { %2169 = vmatprep.subr.bf16.mxu0 %v6419_v3 }
 0x3e4   :  { %2161 = vmatmul.mubr.bf16.vlgmr.msra.gmra.mrb[8].mxu0 %v7242_v20 }
 0x3e5   :  { %2170 = vmatpush1.bf16.msra.mxu0 %v6417_v5  ;;  %2201 = vmatprep.mubr.bf16.mxu0 %v7049_v24 }
 0x3e6   :  { %2171 = vmatprep.subr.bf16.mxu0 %v6422_v6 }
 0x3e9   :  { %2172 = vmatpush1.bf16.msra.mxu0 %v6420_v8 }
 0x3ea   :  { %5441 = vmatprep.subr.msk.bf16.mxu0 %vm592_vm0, %v5440_v9 }
 0x3ed   :  { %2174 = vmatpush1.bf16.msra.mxu0 %v2082_v11 }
 0x3f0   :  { %5442 = vmatmul.mubr.msk.bf16.vlgmr.msra.gmra.mrb[8].mxu0 %vm588_vm1, %v7288_v12 }
 0x437   :  { %v5778_v23 = vpop.f32.mrb[4].mxu0 }
 0x438   :  { %v5779_v25 = vpop.f32.mrb[5].mxu0 }
 0x439   :  { %v5780_v35 = vadd.f32 %v5779_v25, %v5778_v23  ;;  %v5781_v27 = vpop.f32.mrb[6].mxu0  ;;  %v6452_v23 = vld [vmem:[#allocation3 + $0x13c] ss:$48 sps:$4 sm:$0xff]   ;;  %v6450_v25 = vld [vmem:[#allocation3 + $0x138] ss:$48 sps:$4 sm:$0xff]  }
 0x43a   :  { %v5782_v29 = vpop.f32.mrb[7].mxu0  ;;  %v6458_v27 = vld [vmem:[#allocation3 + $0x1fc] ss:$48 sps:$4 sm:$0xff]  }
 0x43b   :  { %v7305_v31 = vmul.f32 %v5780_v35, %v7294_v15  ;;  %v6453_v35 = vld [vmem:[#allocation3 + $0x198] ss:$48 sps:$4 sm:$0xff]  }
 0x43c   :  { %v6456_v29 = vld [vmem:[#allocation3 + $0x1f8] ss:$48 sps:$4 sm:$0xff]  }
 0x43d   :  { %v1640_v32 = vrot.slane %v7305_v31, 4  ;;  %v1647_v28 = vmul.f32 %v7305_v31, %v7305_v31 }
 0x43f   :  { %v1641_v34 = vadd.f32 %v1640_v32, %v7305_v31  ;;  %v1648_v37 = vrot.slane %v1647_v28, 4  ;;  %v6464_v32 = vld [vmem:[#allocation3 + $0x2bc] ss:$48 sps:$4 sm:$0xff]  }
 0x441   :  { %v1642_v40 = vrot.slane %v1641_v34, 2  ;;  %v1649_v41 = vadd.f32 %v1648_v37, %v1647_v28  ;;  %v6462_v28 = vld [vmem:[#allocation3 + $0x2b8] ss:$48 sps:$4 sm:$0xff]   ;;  %v6470_v37 = vld [vmem:[#allocation3 + $0x37c] ss:$48 sps:$4 sm:$0xff]  }
 0x443   :  { %v1643_v45 = vadd.f32 %v1642_v40, %v1641_v34  ;;  %v1650_v46 = vrot.slane %v1649_v41, 2  ;;  %v6465_v34 = vld [vmem:[#allocation3 + $0x318] ss:$48 sps:$4 sm:$0xff]   ;;  %v6473_v40 = vld [vmem:[#allocation3 + $0x3dc] ss:$48 sps:$4 sm:$0xff]  }
 0x445   :  { %v1644_v49 = vrot.slane %v1643_v45, 1  ;;  %v1651_v51 = vadd.f32 %v1650_v46, %v1649_v41  ;;  %v6471_v41 = vld [vmem:[#allocation3 + $0x3d8] ss:$48 sps:$4 sm:$0xff]   ;;  %v6482_v46 = vld [vmem:[#allocation3 + $0x4fc] ss:$48 sps:$4 sm:$0xff]  }
 0x447   :  { %v1645_v55 = vadd.f32 %v1644_v49, %v1643_v45  ;;  %v1652_v56 = vrot.slane %v1651_v51, 1  ;;  %v6477_v45 = vld [vmem:[#allocation3 + $0x498] ss:$48 sps:$4 sm:$0xff]   ;;  %v6485_v49 = vld [vmem:[#allocation3 + $0x55c] ss:$48 sps:$4 sm:$0xff]  }
 0x449   :  { %v7311_v58 = vadd.f32 %v1645_v55, %v901_v54  ;;  %v1653_v59 = vadd.f32 %v1652_v56, %v1651_v51  ;;  %v6483_v51 = vld [vmem:[#allocation3 + $0x558] ss:$48 sps:$4 sm:$0xff]   ;;  %v6491_v54 = vld [vmem:[#allocation3 + $0x61c] ss:$48 sps:$4 sm:$0xff]  }
 0x44a   :  { %v6489_v55 = vld [vmem:[#allocation3 + $0x618] ss:$48 sps:$4 sm:$0xff]   ;;  %v6494_v56 = vld [vmem:[#allocation3 + $0x67c] ss:$48 sps:$4 sm:$0xff]  }
 0x44b   :  { %v7313_v61 = vadd.f32 %v1653_v59, %v909_v57  ;;  %v6492_v57 = vld [vmem:[#allocation3 + $0x678] ss:$48 sps:$4 sm:$0xff]   ;;  %v6497_v59 = vld [vmem:[#allocation3 + $0x6dc] ss:$48 sps:$4 sm:$0xff]  }
 0x4c3   :  { %v2203_v1 = vpop.f32.mrb[8].mxu0 }
 0x4c4   :  { %v6005_v2 = vadd.f32 %v2203_v1, %v1729_v63  ;;  %v2205_v3 = vpop.f32.mrb[9].mxu0  ;;  %v6498_v63 = vld [vmem:[#allocation3 + $0x738] ss:$48 sps:$4 sm:$0xff]  }
 0x4c5   :  { %v6006_v4 = vadd.f32 %v2205_v3, %v1733_v0  ;;  %v2207_v5 = vpop.f32.mrb[10].mxu0  ;;  %v6503_v0 = vld [vmem:[#allocation3 + $0x79c] ss:$48 sps:$4 sm:$0xff]   ;;  %v6501_v1 = vld [vmem:[#allocation3 + $0x798] ss:$48 sps:$4 sm:$0xff]  }
 0x4c6   :  { %v2210_v6 = vmax.f32 %v6005_v2, 0.0  ;;  %v2208_v7 = vpop.f32.mrb[11].mxu0  ;;  %v6506_v2 = vld [vmem:[#allocation3 + $0x7fc] ss:$48 sps:$4 sm:$0xff]   ;;  %v6504_v3 = vld [vmem:[#allocation3 + $0x7f8] ss:$48 sps:$4 sm:$0xff]  }
 0x4c7   :  { %v2211_v8 = vmax.f32 %v6006_v4, 0.0  ;;  %v6509_v4 = vld [vmem:[#allocation3 + $0x85c] ss:$48 sps:$4 sm:$0xff]   ;;  %v6507_v5 = vld [vmem:[#allocation3 + $0x858] ss:$48 sps:$4 sm:$0xff]  }
 0x4c8   :  { %v2212_v11 = vpack.c.bf16 %v2210_v6, %v2210_v6  ;;  %v6512_v6 = vld [vmem:[#allocation3 + $0x8bc] ss:$48 sps:$4 sm:$0xff]   ;;  %v6510_v7 = vld [vmem:[#allocation3 + $0x8b8] ss:$48 sps:$4 sm:$0xff]  }
 0x4c9   :  { %v2213_v9 = vpack.c.bf16 %v2211_v8, %v2211_v8  ;;  %v6515_v8 = vld [vmem:[#allocation3 + $0x91c] ss:$48 sps:$4 sm:$0xff]  }
 0x4cb   :  { %2374 = vmatprep.mubr.bf16.mxu1 %v2213_v9  ;;  %v6513_v9 = vld [vmem:[#allocation3 + $0x918] ss:$48 sps:$4 sm:$0xff]  }
 0x4cc   :  { %2375 = vmatmul.mubr.bf16.vlgmr.msra.gmra.mrb[8].mxu1 %v2212_v11  ;;  %v6516_v11 = vld [vmem:[#allocation3 + $0x978] ss:$48 sps:$4 sm:$0xff]  }
 0x4cd   :  { %2832 = vmatpush1.bf16.msra.mxu1 %v6441_v10  ;;  %2863 = vmatprep.mubr.bf16.mxu1 %v7224_v14  ;;  %v6518_v10 = vld [vmem:[#allocation3 + $0x97c] ss:$48 sps:$4 sm:$0xff]  }
 0x4ce   :  { %2833 = vmatprep.subr.bf16.mxu1 %v6446_v17  ;;  %v6521_v17 = vld [vmem:[#allocation3 + $0x9dc] ss:$48 sps:$4 sm:$0xff]  }
 0x4d1   :  { %2834 = vmatpush1.bf16.msra.mxu1 %v6444_v18  ;;  %v6519_v18 = vld [vmem:[#allocation3 + $0x9d8] ss:$48 sps:$4 sm:$0xff]  }
 0x4d2   :  { %2835 = vmatprep.subr.bf16.mxu1 %v6449_v19  ;;  %v6524_v19 = vld [vmem:[#allocation3 + $0xa3c] ss:$48 sps:$4 sm:$0xff]  }
 0x4d5   :  { %2836 = vmatpush1.bf16.msra.mxu1 %v6447_v22  ;;  %v6545_v22 = vld [vmem:[#allocation7 + $0x40] sm:$0xff]  }
 0x4d6   :  { %2837 = vmatprep.subr.bf16.mxu1 %v6452_v23  ;;  %v6546_v23 = vld [vmem:[#allocation7] sm:$0xff]   ;;  %5806 = vmatprep.subr.bf16.mxu0 %v6545_v22 }
 0x4d7   :  { %5807 = vmatpush3.bf16.msra.mxu0 %v6546_v23 }
 0x4d9   :  { %2838 = vmatpush1.bf16.msra.mxu1 %v6450_v25  ;;  %v6547_v25 = vld [vmem:[#allocation7 + $0x48] sm:$0xff]  }
 0x4da   :  { %2839 = vmatprep.subr.bf16.mxu1 %v6455_v26  ;;  %v6522_v26 = vld [vmem:[#allocation3 + $0xa38] ss:$48 sps:$4 sm:$0xff]   ;;  %5808 = vmatprep.subr.bf16.mxu0 %v6547_v25 }
 0x4dd   :  { %2840 = vmatpush1.bf16.msra.mxu1 %v6453_v35  ;;  %v6527_v35 = vld [vmem:[#allocation3 + $0xa9c] ss:$48 sps:$4 sm:$0xff]  }
 0x4de   :  { %2841 = vmatprep.subr.bf16.mxu1 %v6458_v27  ;;  %v6548_v27 = vld [vmem:[#allocation7 + $0x8] sm:$0xff]  }
 0x4df   :  { %5809 = vmatpush3.bf16.msra.mxu0 %v6548_v27  ;;  %v2468_v27 = vld [vmem:[#allocation5 + $0x6] sm:$0x3] }
 0x4e1   :  { %2842 = vmatpush1.bf16.msra.mxu1 %v6456_v29  ;;  %v6549_v29 = vld [vmem:[#allocation7 + $0x50] sm:$0xff]  }
 0x4e2   :  { %2843 = vmatprep.subr.bf16.mxu1 %v6461_v30  ;;  %v6525_v30 = vld [vmem:[#allocation3 + $0xa98] ss:$48 sps:$4 sm:$0xff]   ;;  %5810 = vmatprep.subr.bf16.mxu0 %v6549_v29  ;;  %v2473_v29 = vrot.slane %v2468_v27, %v7258_v36 }
 0x4e5   :  { %2844 = vmatpush1.bf16.msra.mxu1 %v6459_v21  ;;  %v6530_v21 = vld [vmem:[#allocation3 + $0xafc] ss:$48 sps:$4 sm:$0xff]  }
 0x4e6   :  { %2845 = vmatprep.subr.bf16.mxu1 %v6464_v32  ;;  %v6550_v32 = vld [vmem:[#allocation7 + $0x10] sm:$0xff]  }
 0x4e7   :  { %5811 = vmatpush3.bf16.msra.mxu0 %v6550_v32 }
 0x4e9   :  { %2846 = vmatpush1.bf16.msra.mxu1 %v6462_v28  ;;  %v6551_v28 = vld [vmem:[#allocation7 + $0x58] sm:$0xff]  }
 0x4ea   :  { %2847 = vmatprep.subr.bf16.mxu1 %v6467_v33  ;;  %v6528_v33 = vld [vmem:[#allocation3 + $0xaf8] ss:$48 sps:$4 sm:$0xff]   ;;  %5812 = vmatprep.subr.bf16.mxu0 %v6551_v28 }
 0x4ed   :  { %2848 = vmatpush1.bf16.msra.mxu1 %v6465_v34  ;;  %v6533_v34 = vld [vmem:[#allocation3 + $0xb5c] ss:$48 sps:$4 sm:$0xff]  }
 0x4ee   :  { %2849 = vmatprep.subr.bf16.mxu1 %v6470_v37  ;;  %v6552_v37 = vld [vmem:[#allocation7 + $0x18] sm:$0xff]  }
 0x4ef   :  { %5813 = vmatpush3.bf16.msra.mxu0 %v6552_v37 }
 0x4f1   :  { %2850 = vmatpush1.bf16.msra.mxu1 %v6468_v39  ;;  %v6553_v39 = vld [vmem:[#allocation7 + $0x60] sm:$0xff]  }
 0x4f2   :  { %2851 = vmatprep.subr.bf16.mxu1 %v6473_v40  ;;  %v6531_v40 = vld [vmem:[#allocation3 + $0xb58] ss:$48 sps:$4 sm:$0xff]   ;;  %5814 = vmatprep.subr.bf16.mxu0 %v6553_v39 }
 0x4f5   :  { %2852 = vmatpush1.bf16.msra.mxu1 %v6471_v41  ;;  %v6536_v41 = vld [vmem:[#allocation3 + $0xbbc] ss:$48 sps:$4 sm:$0xff]  }
 0x4f6   :  { %2853 = vmatprep.subr.bf16.mxu1 %v6476_v42  ;;  %v6554_v42 = vld [vmem:[#allocation7 + $0x20] sm:$0xff]  }
 0x4f7   :  { %5815 = vmatpush3.bf16.msra.mxu0 %v6554_v42 }
 0x4f9   :  { %2854 = vmatpush1.bf16.msra.mxu1 %v6474_v43  ;;  %v6555_v43 = vld [vmem:[#allocation7 + $0x68] sm:$0xff]  }
 0x4fa   :  { %2855 = vmatprep.subr.bf16.mxu1 %v6479_v44  ;;  %v6534_v44 = vld [vmem:[#allocation3 + $0xbb8] ss:$48 sps:$4 sm:$0xff]   ;;  %5816 = vmatprep.subr.bf16.mxu0 %v6555_v43  ;;  %v6566_v43 = vld [vmem:[#allocation3 + $0x84] ss:$48 sps:$4 sm:$0xff]  }
 0x4fd   :  { %2856 = vmatpush1.bf16.msra.mxu1 %v6477_v45  ;;  %v6539_v45 = vld [vmem:[#allocation3 + $0xc1c] ss:$48 sps:$4 sm:$0xff]  }
 0x4fe   :  { %2857 = vmatprep.subr.bf16.mxu1 %v6482_v46  ;;  %v6556_v46 = vld [vmem:[#allocation7 + $0x28] sm:$0xff]  }
 0x4ff   :  { %5817 = vmatpush3.bf16.msra.mxu0 %v6556_v46  ;;  %v6572_v46 = vld [vmem:[#allocation3 + $0x144] ss:$48 sps:$4 sm:$0xff]  }
 0x501   :  { %2858 = vmatpush1.bf16.msra.mxu1 %v6480_v48  ;;  %v6537_v48 = vld [vmem:[#allocation3 + $0xc18] ss:$48 sps:$4 sm:$0xff]  }
 0x502   :  { %2859 = vmatprep.subr.bf16.mxu1 %v6485_v49  ;;  %v6542_v49 = vld [vmem:[#allocation3 + $0xc7c] ss:$48 sps:$4 sm:$0xff]  }
 0x505   :  { %2860 = vmatpush1.bf16.msra.mxu1 %v6483_v51  ;;  %v2467_v51 = vld [vmem:[#allocation3 + $0xcd8] sm:$0x77] }
 0x506   :  { %2861 = vmatprep.subr.bf16.mxu1 %v6488_v52  ;;  %v6540_v52 = vld [vmem:[#allocation3 + $0xc78] ss:$48 sps:$4 sm:$0xff]  }
 0x509   :  { %2862 = vmatpush1.bf16.msra.mxu1 %v6486_v53  ;;  %v5528_v53 = vcombine.high %v2467_v51, %v2467_v51 }
 0x50a   :  { %2872 = vmatprep.subr.bf16.mxu1 %v6491_v54  ;;  %v5527_v54 = vcombine.low %v2467_v51, %v2467_v51  ;;  %v6573_v51 = vld [vmem:[#allocation3 + $0x1a0] ss:$48 sps:$4 sm:$0xff]  }
 0x50c   :  { %2864 = vmatmul.mubr.bf16.vlgmr.msra.gmra.mrb[12].mxu1 %v7232_v47 }
 0x50d   :  { %2873 = vmatpush1.bf16.msra.mxu1 %v6489_v55  ;;  %2904 = vmatprep.mubr.bf16.mxu1 %v7236_v50  ;;  %v2826_v55 = vsel %vm592_vm0, %v5527_v54, 0  ;;  %v6581_v54 = vld [vmem:[#allocation3 + $0x264] ss:$48 sps:$4 sm:$0xff]  }
 0x50e   :  { %2874 = vmatprep.subr.bf16.mxu1 %v6494_v56 }
 0x511   :  { %2875 = vmatpush1.bf16.msra.mxu1 %v6492_v57 }
 0x512   :  { %2876 = vmatprep.subr.bf16.mxu1 %v6497_v59 }
 0x515   :  { %2877 = vmatpush1.bf16.msra.mxu1 %v6495_v60 }
 0x516   :  { %2878 = vmatprep.subr.bf16.mxu1 %v6500_v62 }
 0x519   :  { %2879 = vmatpush1.bf16.msra.mxu1 %v6498_v63 }
 0x51a   :  { %2880 = vmatprep.subr.bf16.mxu1 %v6503_v0 }
 0x51d   :  { %2881 = vmatpush1.bf16.msra.mxu1 %v6501_v1 }
 0x51e   :  { %2882 = vmatprep.subr.bf16.mxu1 %v6506_v2 }
 0x521   :  { %2883 = vmatpush1.bf16.msra.mxu1 %v6504_v3 }
 0x522   :  { %2884 = vmatprep.subr.bf16.mxu1 %v6509_v4 }
 0x525   :  { %2885 = vmatpush1.bf16.msra.mxu1 %v6507_v5 }
 0x526   :  { %2886 = vmatprep.subr.bf16.mxu1 %v6512_v6  ;;  %v6557_v6 = vld [vmem:[#allocation7 + $0x70] sm:$0xff]  }
 0x527   :  { %5818 = vmatprep.subr.bf16.mxu0 %v6557_v6  ;;  %v6597_v6 = vld [vmem:[#allocation3 + $0x4a0] ss:$48 sps:$4 sm:$0xff]  }
 0x529   :  { %2887 = vmatpush1.bf16.msra.mxu1 %v6510_v7  ;;  %v6558_v7 = vld [vmem:[#allocation7 + $0x30] sm:$0xff]  }
 0x52a   :  { %2888 = vmatprep.subr.bf16.mxu1 %v6515_v8  ;;  %5819 = vmatpush3.bf16.msra.mxu0 %v6558_v7  ;;  %v6602_v7 = vld [vmem:[#allocation3 + $0x504] ss:$48 sps:$4 sm:$0xff]  }
 0x52d   :  { %2889 = vmatpush1.bf16.msra.mxu1 %v6513_v9 }
 0x52e   :  { %2890 = vmatprep.subr.bf16.mxu1 %v6518_v10 }
 0x531   :  { %2891 = vmatpush1.bf16.msra.mxu1 %v6516_v11 }
 0x532   :  { %2892 = vmatprep.subr.bf16.mxu1 %v6521_v17  ;;  %v6559_v17 = vld [vmem:[#allocation7 + $0x78] sm:$0xff]  }
 0x533   :  { %5820 = vmatprep.subr.bf16.mxu0 %v6559_v17  ;;  %v6606_v17 = vld [vmem:[#allocation3 + $0x5c0] ss:$48 sps:$4 sm:$0xff]  }
 0x535   :  { %2893 = vmatpush1.bf16.msra.mxu1 %v6519_v18  ;;  %v6560_v18 = vld [vmem:[#allocation7 + $0x38] sm:$0xff]  }
 0x536   :  { %2894 = vmatprep.subr.bf16.mxu1 %v6524_v19  ;;  %5821 = vmatpush3.bf16.msra.mxu0 %v6560_v18  ;;  %v6611_v18 = vld [vmem:[#allocation3 + $0x624] ss:$48 sps:$4 sm:$0xff]  }
 0x539   :  { %2895 = vmatpush1.bf16.msra.mxu1 %v6522_v26  ;;  %v6563_v26 = vld [vmem:[#allocation3 + $0x24] ss:$48 sps:$4 sm:$0xff]  }
 0x53a   :  { %2896 = vmatprep.subr.bf16.mxu1 %v6527_v35  ;;  %3575 = vmatprep.subr.bf16.mxu0 %v6563_v26  ;;  %v6617_v26 = vld [vmem:[#allocation3 + $0x6e4] ss:$48 sps:$4 sm:$0xff]  }
 0x53d   :  { %2897 = vmatpush1.bf16.msra.mxu1 %v6525_v30  ;;  %v2477_v30 = vrot.slane %v2468_v27, %v7261_v38  ;;  %v6615_v27 = vld [vmem:[#allocation3 + $0x6e0] ss:$48 sps:$4 sm:$0xff]  }
 0x53e   :  { %2898 = vmatprep.subr.bf16.mxu1 %v6530_v21 }
 0x541   :  { %2899 = vmatpush1.bf16.msra.mxu1 %v6528_v33 }
 0x542   :  { %2900 = vmatprep.subr.bf16.mxu1 %v6533_v34 }
 0x545   :  { %2901 = vmatpush1.bf16.msra.mxu1 %v6531_v40 }
 0x546   :  { %2902 = vmatprep.subr.bf16.mxu1 %v6536_v41  ;;  %v6561_v41 = vld [vmem:[#allocation3 + $0x20] ss:$48 sps:$4 sm:$0xff]  }
 0x549   :  { %2903 = vmatpush1.bf16.msra.mxu1 %v6534_v44  ;;  %v6569_v44 = vld [vmem:[#allocation3 + $0xe4] ss:$48 sps:$4 sm:$0xff]  }
 0x54a   :  { %2913 = vmatprep.subr.bf16.mxu1 %v6539_v45  ;;  %v6567_v45 = vld [vmem:[#allocation3 + $0xe0] ss:$48 sps:$4 sm:$0xff]  }
 0x54c   :  { %2905 = vmatmul.mubr.bf16.vlgmr.msra.gmra.mrb[12].mxu1 %v7242_v20 }
 0x54d   :  { %2914 = vmatpush1.bf16.msra.mxu1 %v6537_v48  ;;  %2945 = vmatprep.mubr.bf16.mxu1 %v7049_v24  ;;  %v6570_v48 = vld [vmem:[#allocation3 + $0x140] ss:$48 sps:$4 sm:$0xff]  }
 0x54e   :  { %2915 = vmatprep.subr.bf16.mxu1 %v6542_v49  ;;  %v6575_v49 = vld [vmem:[#allocation3 + $0x1a4] ss:$48 sps:$4 sm:$0xff]  }
 0x551   :  { %2916 = vmatpush1.bf16.msra.mxu1 %v6540_v52  ;;  %v6578_v52 = vld [vmem:[#allocation3 + $0x204] ss:$48 sps:$4 sm:$0xff]  }
 0x552   :  { %5529 = vmatprep.subr.msk.bf16.mxu1 %vm592_vm0, %v5528_v53  ;;  %v6576_v53 = vld [vmem:[#allocation3 + $0x200] ss:$48 sps:$4 sm:$0xff]  }
 0x555   :  { %2918 = vmatpush1.bf16.msra.mxu1 %v2826_v55  ;;  %v6579_v55 = vld [vmem:[#allocation3 + $0x260] ss:$48 sps:$4 sm:$0xff]  }
 0x558   :  { %5530 = vmatmul.mubr.msk.bf16.vlgmr.msra.gmra.mrb[12].mxu1 %vm588_vm1, %v7288_v12 }
 0x59f   :  { %v5800_v56 = vpop.f32.mrb[8].mxu1 }
 0x5a0   :  { %v5801_v57 = vpop.f32.mrb[9].mxu1 }
 0x5a1   :  { %v5802_v59 = vadd.f32 %v5801_v57, %v5800_v56  ;;  %v5803_v60 = vpop.f32.mrb[10].mxu1  ;;  %v6584_v56 = vld [vmem:[#allocation3 + $0x2c4] ss:$48 sps:$4 sm:$0xff]   ;;  %v6582_v57 = vld [vmem:[#allocation3 + $0x2c0] ss:$48 sps:$4 sm:$0xff]  }
 0x5a2   :  { %v5804_v62 = vpop.f32.mrb[11].mxu1  ;;  %v6585_v60 = vld [vmem:[#allocation3 + $0x320] ss:$48 sps:$4 sm:$0xff]  }
 0x5a3   :  { %v7327_v63 = vmul.f32 %v5802_v59, %v7294_v15  ;;  %v6587_v59 = vld [vmem:[#allocation3 + $0x324] ss:$48 sps:$4 sm:$0xff]  }
 0x5a4   :  { %v6590_v62 = vld [vmem:[#allocation3 + $0x384] ss:$48 sps:$4 sm:$0xff]  }
 0x5a5   :  { %v2384_v0 = vrot.slane %v7327_v63, 4  ;;  %v2391_v1 = vmul.f32 %v7327_v63, %v7327_v63 }
 0x5a7   :  { %v2385_v2 = vadd.f32 %v2384_v0, %v7327_v63  ;;  %v2392_v3 = vrot.slane %v2391_v1, 4  ;;  %v6588_v0 = vld [vmem:[#allocation3 + $0x380] ss:$48 sps:$4 sm:$0xff]  }
 0x5a9   :  { %v2386_v4 = vrot.slane %v2385_v2, 2  ;;  %v2393_v5 = vadd.f32 %v2392_v3, %v2391_v1  ;;  %v6593_v1 = vld [vmem:[#allocation3 + $0x3e4] ss:$48 sps:$4 sm:$0xff]  }
 0x5aa   :  { %v6596_v3 = vld [vmem:[#allocation3 + $0x444] ss:$48 sps:$4 sm:$0xff]  }
 0x5ab   :  { %v2387_v8 = vadd.f32 %v2386_v4, %v2385_v2  ;;  %v2394_v9 = vrot.slane %v2393_v5, 2  ;;  %v6591_v2 = vld [vmem:[#allocation3 + $0x3e0] ss:$48 sps:$4 sm:$0xff]  }
 0x5ac   :  { %v6594_v4 = vld [vmem:[#allocation3 + $0x440] ss:$48 sps:$4 sm:$0xff]  }
 0x5ad   :  { %v2388_v10 = vrot.slane %v2387_v8, 1  ;;  %v2395_v11 = vadd.f32 %v2394_v9, %v2393_v5  ;;  %v6599_v5 = vld [vmem:[#allocation3 + $0x4a4] ss:$48 sps:$4 sm:$0xff]  }
 0x5ae   :  { %v6605_v9 = vld [vmem:[#allocation3 + $0x564] ss:$48 sps:$4 sm:$0xff]  }
 0x5af   :  { %v2389_v19 = vadd.f32 %v2388_v10, %v2387_v8  ;;  %v2396_v22 = vrot.slane %v2395_v11, 1  ;;  %v6600_v8 = vld [vmem:[#allocation3 + $0x500] ss:$48 sps:$4 sm:$0xff]  }
 0x5b0   :  { %v6603_v10 = vld [vmem:[#allocation3 + $0x560] ss:$48 sps:$4 sm:$0xff]  }
 0x5b1   :  { %v7334_v23 = vadd.f32 %v2389_v19, %v7311_v58  ;;  %v2397_v25 = vadd.f32 %v2396_v22, %v2395_v11  ;;  %v6608_v11 = vld [vmem:[#allocation3 + $0x5c4] ss:$48 sps:$4 sm:$0xff]   ;;  %v6609_v19 = vld [vmem:[#allocation3 + $0x620] ss:$48 sps:$4 sm:$0xff]  }
 0x5b2   :  { %v6614_v22 = vld [vmem:[#allocation3 + $0x684] ss:$48 sps:$4 sm:$0xff]  }
 0x5b3   :  { %v7337_v35 = vadd.f32 %v2397_v25, %v7313_v61  ;;  %v6564_v61 = vld [vmem:[#allocation3 + $0x80] ss:$48 sps:$4 sm:$0xff]  }
 0x5b4   :  { %v6612_v25 = vld [vmem:[#allocation3 + $0x680] ss:$48 sps:$4 sm:$0xff]  }
 0x62b   :  { %v2947_v21 = vpop.f32.mrb[12].mxu1 }
 0x62c   :  { %v6007_v32 = vadd.f32 %v2947_v21, %v2473_v29  ;;  %v2949_v28 = vpop.f32.mrb[13].mxu1  ;;  %v6620_v29 = vld [vmem:[#allocation3 + $0x744] ss:$48 sps:$4 sm:$0xff]  }
 0x62d   :  { %v6008_v33 = vadd.f32 %v2949_v28, %v2477_v30  ;;  %v2951_v34 = vpop.f32.mrb[14].mxu1  ;;  %v6618_v30 = vld [vmem:[#allocation3 + $0x740] ss:$48 sps:$4 sm:$0xff]   ;;  %v6623_v21 = vld [vmem:[#allocation3 + $0x7a4] ss:$48 sps:$4 sm:$0xff]  }
 0x62e   :  { %v2954_v37 = vmax.f32 %v6007_v32, 0.0  ;;  %v2952_v39 = vpop.f32.mrb[15].mxu1  ;;  %v6621_v32 = vld [vmem:[#allocation3 + $0x7a0] ss:$48 sps:$4 sm:$0xff]   ;;  %v6626_v28 = vld [vmem:[#allocation3 + $0x804] ss:$48 sps:$4 sm:$0xff]  }
 0x62f   :  { %v2955_v58 = vmax.f32 %v6008_v33, 0.0  ;;  %v6624_v33 = vld [vmem:[#allocation3 + $0x800] ss:$48 sps:$4 sm:$0xff]   ;;  %v6629_v34 = vld [vmem:[#allocation3 + $0x864] ss:$48 sps:$4 sm:$0xff]  }
 0x630   :  { %v2956_v42 = vpack.c.bf16 %v2954_v37, %v2954_v37  ;;  %v6627_v37 = vld [vmem:[#allocation3 + $0x860] ss:$48 sps:$4 sm:$0xff]   ;;  %v6632_v39 = vld [vmem:[#allocation3 + $0x8c4] ss:$48 sps:$4 sm:$0xff]  }
 0x631   :  { %v2957_v40 = vpack.c.bf16 %v2955_v58, %v2955_v58  ;;  %v6630_v58 = vld [vmem:[#allocation3 + $0x8c0] ss:$48 sps:$4 sm:$0xff]  }
 0x633   :  { %3118 = vmatprep.mubr.bf16.mxu0 %v2957_v40  ;;  %v6635_v40 = vld [vmem:[#allocation3 + $0x924] ss:$48 sps:$4 sm:$0xff]  }
 0x634   :  { %3119 = vmatmul.mubr.bf16.vlgmr.msra.gmra.mrb[12].mxu0 %v2956_v42  ;;  %v6638_v42 = vld [vmem:[#allocation3 + $0x984] ss:$48 sps:$4 sm:$0xff]  }
 0x635   :  { %3576 = vmatpush1.bf16.msra.mxu0 %v6561_v41  ;;  %3607 = vmatprep.mubr.bf16.mxu0 %v7224_v14  ;;  %v6633_v41 = vld [vmem:[#allocation3 + $0x920] ss:$48 sps:$4 sm:$0xff]  }
 0x636   :  { %3577 = vmatprep.subr.bf16.mxu0 %v6566_v43  ;;  %v6636_v43 = vld [vmem:[#allocation3 + $0x980] ss:$48 sps:$4 sm:$0xff]  }
 0x639   :  { %3578 = vmatpush1.bf16.msra.mxu0 %v6564_v61  ;;  %v6641_v61 = vld [vmem:[#allocation3 + $0x9e4] ss:$48 sps:$4 sm:$0xff]  }
 0x63a   :  { %3579 = vmatprep.subr.bf16.mxu0 %v6569_v44  ;;  %v6639_v44 = vld [vmem:[#allocation3 + $0x9e0] ss:$48 sps:$4 sm:$0xff]  }
 0x63d   :  { %3580 = vmatpush1.bf16.msra.mxu0 %v6567_v45  ;;  %v6644_v45 = vld [vmem:[#allocation3 + $0xa44] ss:$48 sps:$4 sm:$0xff]  }
 0x63e   :  { %3581 = vmatprep.subr.bf16.mxu0 %v6572_v46  ;;  %v6665_v46 = vld [vmem:[#allocation7 + $0x40] sm:$0xff]  }
 0x63f   :  { %5828 = vmatprep.subr.bf16.mxu1 %v6665_v46 }
 0x641   :  { %3582 = vmatpush1.bf16.msra.mxu0 %v6570_v48  ;;  %v6666_v48 = vld [vmem:[#allocation7] sm:$0xff]  }
 0x642   :  { %3583 = vmatprep.subr.bf16.mxu0 %v6575_v49  ;;  %v6667_v49 = vld [vmem:[#allocation7 + $0x48] sm:$0xff]   ;;  %5829 = vmatpush3.bf16.msra.mxu1 %v6666_v48 }
 0x643   :  { %5830 = vmatprep.subr.bf16.mxu1 %v6667_v49 }
 0x645   :  { %3584 = vmatpush1.bf16.msra.mxu0 %v6573_v51  ;;  %v6642_v51 = vld [vmem:[#allocation3 + $0xa40] ss:$48 sps:$4 sm:$0xff]  }
 0x646   :  { %3585 = vmatprep.subr.bf16.mxu0 %v6578_v52  ;;  %v6647_v52 = vld [vmem:[#allocation3 + $0xaa4] ss:$48 sps:$4 sm:$0xff]  }
 0x649   :  { %3586 = vmatpush1.bf16.msra.mxu0 %v6576_v53  ;;  %v6668_v53 = vld [vmem:[#allocation7 + $0x8] sm:$0xff]  }
 0x64a   :  { %3587 = vmatprep.subr.bf16.mxu0 %v6581_v54  ;;  %v6669_v54 = vld [vmem:[#allocation7 + $0x50] sm:$0xff]   ;;  %5831 = vmatpush3.bf16.msra.mxu1 %v6668_v53  ;;  %v3212_v53 = vld [vmem:[#allocation5 + $0x8] sm:$0x3] }
 0x64b   :  { %5832 = vmatprep.subr.bf16.mxu1 %v6669_v54  ;;  %v3217_v54 = vrot.slane %v3212_v53, %v7258_v36 }
 0x64d   :  { %3588 = vmatpush1.bf16.msra.mxu0 %v6579_v55  ;;  %v6645_v55 = vld [vmem:[#allocation3 + $0xaa0] ss:$48 sps:$4 sm:$0xff]  }
 0x64e   :  { %3589 = vmatprep.subr.bf16.mxu0 %v6584_v56  ;;  %v6650_v56 = vld [vmem:[#allocation3 + $0xb04] ss:$48 sps:$4 sm:$0xff]  }
 0x651   :  { %3590 = vmatpush1.bf16.msra.mxu0 %v6582_v57  ;;  %v6670_v57 = vld [vmem:[#allocation7 + $0x10] sm:$0xff]  }
 0x652   :  { %3591 = vmatprep.subr.bf16.mxu0 %v6587_v59  ;;  %v6671_v59 = vld [vmem:[#allocation7 + $0x58] sm:$0xff]   ;;  %5833 = vmatpush3.bf16.msra.mxu1 %v6670_v57 }
 0x653   :  { %5834 = vmatprep.subr.bf16.mxu1 %v6671_v59 }
 0x655   :  { %3592 = vmatpush1.bf16.msra.mxu0 %v6585_v60  ;;  %v6648_v60 = vld [vmem:[#allocation3 + $0xb00] ss:$48 sps:$4 sm:$0xff]  }
 0x656   :  { %3593 = vmatprep.subr.bf16.mxu0 %v6590_v62  ;;  %v6653_v62 = vld [vmem:[#allocation3 + $0xb64] ss:$48 sps:$4 sm:$0xff]  }
 0x659   :  { %3594 = vmatpush1.bf16.msra.mxu0 %v6588_v0  ;;  %v6672_v0 = vld [vmem:[#allocation7 + $0x18] sm:$0xff]  }
 0x65a   :  { %3595 = vmatprep.subr.bf16.mxu0 %v6593_v1  ;;  %v6673_v1 = vld [vmem:[#allocation7 + $0x60] sm:$0xff]   ;;  %5835 = vmatpush3.bf16.msra.mxu1 %v6672_v0 }
 0x65b   :  { %5836 = vmatprep.subr.bf16.mxu1 %v6673_v1 }
 0x65d   :  { %3596 = vmatpush1.bf16.msra.mxu0 %v6591_v2  ;;  %v6651_v2 = vld [vmem:[#allocation3 + $0xb60] ss:$48 sps:$4 sm:$0xff]  }
 0x65e   :  { %3597 = vmatprep.subr.bf16.mxu0 %v6596_v3  ;;  %v6656_v3 = vld [vmem:[#allocation3 + $0xbc4] ss:$48 sps:$4 sm:$0xff]  }
 0x661   :  { %3598 = vmatpush1.bf16.msra.mxu0 %v6594_v4  ;;  %v6674_v4 = vld [vmem:[#allocation7 + $0x20] sm:$0xff]  }
 0x662   :  { %3599 = vmatprep.subr.bf16.mxu0 %v6599_v5  ;;  %v6675_v5 = vld [vmem:[#allocation7 + $0x68] sm:$0xff]   ;;  %5837 = vmatpush3.bf16.msra.mxu1 %v6674_v4 }
 0x663   :  { %5838 = vmatprep.subr.bf16.mxu1 %v6675_v5  ;;  %v6686_v5 = vld [vmem:[#allocation3 + $0x8c] ss:$48 sps:$4 sm:$0xff]  }
 0x665   :  { %3600 = vmatpush1.bf16.msra.mxu0 %v6597_v6  ;;  %v6654_v6 = vld [vmem:[#allocation3 + $0xbc0] ss:$48 sps:$4 sm:$0xff]  }
 0x666   :  { %3601 = vmatprep.subr.bf16.mxu0 %v6602_v7  ;;  %v6659_v7 = vld [vmem:[#allocation3 + $0xc24] ss:$48 sps:$4 sm:$0xff]  }
 0x669   :  { %3602 = vmatpush1.bf16.msra.mxu0 %v6600_v8  ;;  %v6676_v8 = vld [vmem:[#allocation7 + $0x28] sm:$0xff]  }
 0x66a   :  { %3603 = vmatprep.subr.bf16.mxu0 %v6605_v9  ;;  %v6657_v9 = vld [vmem:[#allocation3 + $0xc20] ss:$48 sps:$4 sm:$0xff]   ;;  %5839 = vmatpush3.bf16.msra.mxu1 %v6676_v8  ;;  %v6692_v8 = vld [vmem:[#allocation3 + $0x14c] ss:$48 sps:$4 sm:$0xff]  }
 0x66d   :  { %3604 = vmatpush1.bf16.msra.mxu0 %v6603_v10  ;;  %v6662_v10 = vld [vmem:[#allocation3 + $0xc84] ss:$48 sps:$4 sm:$0xff]  }
 0x66e   :  { %3605 = vmatprep.subr.bf16.mxu0 %v6608_v11  ;;  %v3211_v11 = vld [vmem:[#allocation3 + $0xce0] sm:$0x77] }
 0x671   :  { %3606 = vmatpush1.bf16.msra.mxu0 %v6606_v17  ;;  %v6660_v17 = vld [vmem:[#allocation3 + $0xc80] ss:$48 sps:$4 sm:$0xff]  }
 0x672   :  { %3616 = vmatprep.subr.bf16.mxu0 %v6611_v18  ;;  %v5616_v18 = vcombine.high %v3211_v11, %v3211_v11 }
 0x674   :  { %3608 = vmatmul.mubr.bf16.vlgmr.msra.gmra.mrb[16].mxu0 %v7232_v47 }
 0x675   :  { %3617 = vmatpush1.bf16.msra.mxu0 %v6609_v19  ;;  %3648 = vmatprep.mubr.bf16.mxu0 %v7236_v50  ;;  %v5615_v19 = vcombine.low %v3211_v11, %v3211_v11  ;;  %v6693_v11 = vld [vmem:[#allocation3 + $0x1a8] ss:$48 sps:$4 sm:$0xff]  }
 0x676   :  { %3618 = vmatprep.subr.bf16.mxu0 %v6614_v22 }
 0x677   :  { %v3570_v22 = vsel %vm592_vm0, %v5615_v19, 0  ;;  %v6701_v19 = vld [vmem:[#allocation3 + $0x26c] ss:$48 sps:$4 sm:$0xff]  }
 0x679   :  { %3619 = vmatpush1.bf16.msra.mxu0 %v6612_v25 }
 0x67a   :  { %3620 = vmatprep.subr.bf16.mxu0 %v6617_v26 }
 0x67d   :  { %3621 = vmatpush1.bf16.msra.mxu0 %v6615_v27 }
 0x67e   :  { %3622 = vmatprep.subr.bf16.mxu0 %v6620_v29 }
 0x681   :  { %3623 = vmatpush1.bf16.msra.mxu0 %v6618_v30 }
 0x682   :  { %3624 = vmatprep.subr.bf16.mxu0 %v6623_v21 }
 0x685   :  { %3625 = vmatpush1.bf16.msra.mxu0 %v6621_v32 }
 0x686   :  { %3626 = vmatprep.subr.bf16.mxu0 %v6626_v28 }
 0x689   :  { %3627 = vmatpush1.bf16.msra.mxu0 %v6624_v33 }
 0x68a   :  { %3628 = vmatprep.subr.bf16.mxu0 %v6629_v34 }
 0x68d   :  { %3629 = vmatpush1.bf16.msra.mxu0 %v6627_v37 }
 0x68e   :  { %3630 = vmatprep.subr.bf16.mxu0 %v6632_v39 }
 0x691   :  { %3631 = vmatpush1.bf16.msra.mxu0 %v6630_v58  ;;  %v6677_v58 = vld [vmem:[#allocation7 + $0x70] sm:$0xff]  }
 0x692   :  { %3632 = vmatprep.subr.bf16.mxu0 %v6635_v40  ;;  %5840 = vmatprep.subr.bf16.mxu1 %v6677_v58  ;;  %v6722_v58 = vld [vmem:[#allocation3 + $0x50c] ss:$48 sps:$4 sm:$0xff]  }
 0x695   :  { %3633 = vmatpush1.bf16.msra.mxu0 %v6633_v41 }
 0x696   :  { %3634 = vmatprep.subr.bf16.mxu0 %v6638_v42 }
 0x699   :  { %3635 = vmatpush1.bf16.msra.mxu0 %v6636_v43 }
 0x69a   :  { %3636 = vmatprep.subr.bf16.mxu0 %v6641_v61  ;;  %v6679_v61 = vld [vmem:[#allocation7 + $0x78] sm:$0xff]  }
 0x69d   :  { %3637 = vmatpush1.bf16.msra.mxu0 %v6639_v44  ;;  %v6680_v44 = vld [vmem:[#allocation7 + $0x38] sm:$0xff]  }
 0x69e   :  { %3638 = vmatprep.subr.bf16.mxu0 %v6644_v45 }
 0x6a1   :  { %3639 = vmatpush1.bf16.msra.mxu0 %v6642_v51  ;;  %v6683_v51 = vld [vmem:[#allocation3 + $0x2c] ss:$48 sps:$4 sm:$0xff]  }
 0x6a2   :  { %3640 = vmatprep.subr.bf16.mxu0 %v6647_v52 }
 0x6a5   :  { %3641 = vmatpush1.bf16.msra.mxu0 %v6645_v55  ;;  %v3221_v55 = vrot.slane %v3212_v53, %v7261_v38  ;;  %v6740_v53 = vld [vmem:[#allocation3 + $0x74c] ss:$48 sps:$4 sm:$0xff]  }
 0x6a6   :  { %3642 = vmatprep.subr.bf16.mxu0 %v6650_v56 }
 0x6a9   :  { %3643 = vmatpush1.bf16.msra.mxu0 %v6648_v60 }
 0x6aa   :  { %3644 = vmatprep.subr.bf16.mxu0 %v6653_v62 }
 0x6ad   :  { %3645 = vmatpush1.bf16.msra.mxu0 %v6651_v2 }
 0x6ae   :  { %3646 = vmatprep.subr.bf16.mxu0 %v6656_v3  ;;  %v6681_v3 = vld [vmem:[#allocation3 + $0x28] ss:$48 sps:$4 sm:$0xff]  }
 0x6b1   :  { %3647 = vmatpush1.bf16.msra.mxu0 %v6654_v6  ;;  %v6689_v6 = vld [vmem:[#allocation3 + $0xec] ss:$48 sps:$4 sm:$0xff]  }
 0x6b2   :  { %3657 = vmatprep.subr.bf16.mxu0 %v6659_v7  ;;  %v6687_v7 = vld [vmem:[#allocation3 + $0xe8] ss:$48 sps:$4 sm:$0xff]  }
 0x6b4   :  { %3649 = vmatmul.mubr.bf16.vlgmr.msra.gmra.mrb[16].mxu0 %v7242_v20 }
 0x6b5   :  { %3658 = vmatpush1.bf16.msra.mxu0 %v6657_v9  ;;  %3689 = vmatprep.mubr.bf16.mxu0 %v7049_v24  ;;  %v6690_v9 = vld [vmem:[#allocation3 + $0x148] ss:$48 sps:$4 sm:$0xff]  }
 0x6b6   :  { %3659 = vmatprep.subr.bf16.mxu0 %v6662_v10  ;;  %v6695_v10 = vld [vmem:[#allocation3 + $0x1ac] ss:$48 sps:$4 sm:$0xff]  }
 0x6b9   :  { %3660 = vmatpush1.bf16.msra.mxu0 %v6660_v17  ;;  %v6698_v17 = vld [vmem:[#allocation3 + $0x20c] ss:$48 sps:$4 sm:$0xff]  }
 0x6ba   :  { %5617 = vmatprep.subr.msk.bf16.mxu0 %vm592_vm0, %v5616_v18  ;;  %v6696_v18 = vld [vmem:[#allocation3 + $0x208] ss:$48 sps:$4 sm:$0xff]  }
 0x6bd   :  { %3662 = vmatpush1.bf16.msra.mxu0 %v3570_v22  ;;  %v6704_v22 = vld [vmem:[#allocation3 + $0x2cc] ss:$48 sps:$4 sm:$0xff]  }
 0x6c0   :  { %5618 = vmatmul.mubr.msk.bf16.vlgmr.msra.gmra.mrb[16].mxu0 %vm588_vm1, %v7288_v12  ;;  %v6678_v12 = vld [vmem:[#allocation7 + $0x30] sm:$0xff]  }
 0x6c1   :  { %5841 = vmatpush3.bf16.msra.mxu1 %v6678_v12  ;;  %v6720_v12 = vld [vmem:[#allocation3 + $0x508] ss:$48 sps:$4 sm:$0xff]  }
 0x6c2   :  { %5842 = vmatprep.subr.bf16.mxu1 %v6679_v61  ;;  %v6731_v61 = vld [vmem:[#allocation3 + $0x62c] ss:$48 sps:$4 sm:$0xff]  }
 0x6c5   :  { %5843 = vmatpush3.bf16.msra.mxu1 %v6680_v44  ;;  %v6729_v44 = vld [vmem:[#allocation3 + $0x628] ss:$48 sps:$4 sm:$0xff]  }
 0x6c6   :  { %4319 = vmatprep.subr.bf16.mxu1 %v6683_v51  ;;  %v6735_v51 = vld [vmem:[#allocation3 + $0x6e8] ss:$48 sps:$4 sm:$0xff]  }
 0x707   :  { %v5822_v25 = vpop.f32.mrb[12].mxu0 }
 0x708   :  { %v5823_v26 = vpop.f32.mrb[13].mxu0 }
 0x709   :  { %v5824_v27 = vadd.f32 %v5823_v26, %v5822_v25  ;;  %v5825_v29 = vpop.f32.mrb[14].mxu0  ;;  %v6702_v25 = vld [vmem:[#allocation3 + $0x2c8] ss:$48 sps:$4 sm:$0xff]   ;;  %v6707_v26 = vld [vmem:[#allocation3 + $0x32c] ss:$48 sps:$4 sm:$0xff]  }
 0x70a   :  { %v5826_v30 = vpop.f32.mrb[15].mxu0  ;;  %v6710_v29 = vld [vmem:[#allocation3 + $0x38c] ss:$48 sps:$4 sm:$0xff]  }
 0x70b   :  { %v7351_v21 = vmul.f32 %v5824_v27, %v7294_v15  ;;  %v6705_v27 = vld [vmem:[#allocation3 + $0x328] ss:$48 sps:$4 sm:$0xff]  }
 0x70c   :  { %v6708_v30 = vld [vmem:[#allocation3 + $0x388] ss:$48 sps:$4 sm:$0xff]  }
 0x70d   :  { %v3128_v32 = vrot.slane %v7351_v21, 4  ;;  %v3135_v28 = vmul.f32 %v7351_v21, %v7351_v21 }
 0x70f   :  { %v3129_v33 = vadd.f32 %v3128_v32, %v7351_v21  ;;  %v3136_v34 = vrot.slane %v3135_v28, 4  ;;  %v6713_v32 = vld [vmem:[#allocation3 + $0x3ec] ss:$48 sps:$4 sm:$0xff]  }
 0x711   :  { %v3130_v37 = vrot.slane %v3129_v33, 2  ;;  %v3137_v39 = vadd.f32 %v3136_v34, %v3135_v28  ;;  %v6711_v28 = vld [vmem:[#allocation3 + $0x3e8] ss:$48 sps:$4 sm:$0xff]  }
 0x712   :  { %v6714_v34 = vld [vmem:[#allocation3 + $0x448] ss:$48 sps:$4 sm:$0xff]  }
 0x713   :  { %v3131_v40 = vadd.f32 %v3130_v37, %v3129_v33  ;;  %v3138_v41 = vrot.slane %v3137_v39, 2  ;;  %v6716_v33 = vld [vmem:[#allocation3 + $0x44c] ss:$48 sps:$4 sm:$0xff]  }
 0x714   :  { %v6719_v37 = vld [vmem:[#allocation3 + $0x4ac] ss:$48 sps:$4 sm:$0xff]  }
 0x715   :  { %v3132_v42 = vrot.slane %v3131_v40, 1  ;;  %v3139_v43 = vadd.f32 %v3138_v41, %v3137_v39  ;;  %v6717_v39 = vld [vmem:[#allocation3 + $0x4a8] ss:$48 sps:$4 sm:$0xff]  }
 0x716   :  { %v6723_v41 = vld [vmem:[#allocation3 + $0x568] ss:$48 sps:$4 sm:$0xff]  }
 0x717   :  { %v3133_v45 = vadd.f32 %v3132_v42, %v3131_v40  ;;  %v3140_v46 = vrot.slane %v3139_v43, 1  ;;  %v6725_v40 = vld [vmem:[#allocation3 + $0x56c] ss:$48 sps:$4 sm:$0xff]  }
 0x718   :  { %v6728_v42 = vld [vmem:[#allocation3 + $0x5cc] ss:$48 sps:$4 sm:$0xff]  }
 0x719   :  { %v7358_v48 = vadd.f32 %v3133_v45, %v7334_v23  ;;  %v3141_v49 = vadd.f32 %v3140_v46, %v3139_v43  ;;  %v6726_v43 = vld [vmem:[#allocation3 + $0x5c8] ss:$48 sps:$4 sm:$0xff]   ;;  %v6734_v45 = vld [vmem:[#allocation3 + $0x68c] ss:$48 sps:$4 sm:$0xff]  }
 0x71a   :  { %v6732_v46 = vld [vmem:[#allocation3 + $0x688] ss:$48 sps:$4 sm:$0xff]  }
 0x71b   :  { %v7361_v52 = vadd.f32 %v3141_v49, %v7337_v35  ;;  %v6684_v35 = vld [vmem:[#allocation3 + $0x88] ss:$48 sps:$4 sm:$0xff]   ;;  %v6737_v49 = vld [vmem:[#allocation3 + $0x6ec] ss:$48 sps:$4 sm:$0xff]  }
 0x793   :  { %v3691_v56 = vpop.f32.mrb[16].mxu0 }
 0x794   :  { %v6009_v57 = vadd.f32 %v3691_v56, %v3217_v54  ;;  %v3693_v59 = vpop.f32.mrb[17].mxu0  ;;  %v6738_v54 = vld [vmem:[#allocation3 + $0x748] ss:$48 sps:$4 sm:$0xff]  }
 0x795   :  { %v6010_v60 = vadd.f32 %v3693_v59, %v3221_v55  ;;  %v3695_v62 = vpop.f32.mrb[18].mxu0  ;;  %v6743_v55 = vld [vmem:[#allocation3 + $0x7ac] ss:$48 sps:$4 sm:$0xff]   ;;  %v6741_v56 = vld [vmem:[#allocation3 + $0x7a8] ss:$48 sps:$4 sm:$0xff]  }
 0x796   :  { %v3698_v0 = vmax.f32 %v6009_v57, 0.0  ;;  %v3696_v1 = vpop.f32.mrb[19].mxu0  ;;  %v6746_v57 = vld [vmem:[#allocation3 + $0x80c] ss:$48 sps:$4 sm:$0xff]   ;;  %v6750_v62 = vld [vmem:[#allocation3 + $0x8c8] ss:$48 sps:$4 sm:$0xff]  }
 0x797   :  { %v3699_v23 = vmax.f32 %v6010_v60, 0.0  ;;  %v6749_v59 = vld [vmem:[#allocation3 + $0x86c] ss:$48 sps:$4 sm:$0xff]   ;;  %v6753_v1 = vld [vmem:[#allocation3 + $0x928] ss:$48 sps:$4 sm:$0xff]  }
 0x798   :  { %v3700_v4 = vpack.c.bf16 %v3698_v0, %v3698_v0  ;;  %v6752_v60 = vld [vmem:[#allocation3 + $0x8cc] ss:$48 sps:$4 sm:$0xff]  }
 0x799   :  { %v3701_v2 = vpack.c.bf16 %v3699_v23, %v3699_v23  ;;  %v6755_v0 = vld [vmem:[#allocation3 + $0x92c] ss:$48 sps:$4 sm:$0xff]  }
 0x79a   :  { %v6758_v23 = vld [vmem:[#allocation3 + $0x98c] ss:$48 sps:$4 sm:$0xff]  }
 0x79b   :  { %3862 = vmatprep.mubr.bf16.mxu1 %v3701_v2  ;;  %v6756_v2 = vld [vmem:[#allocation3 + $0x988] ss:$48 sps:$4 sm:$0xff]  }
 0x79c   :  { %3863 = vmatmul.mubr.bf16.vlgmr.msra.gmra.mrb[16].mxu1 %v3700_v4  ;;  %v6759_v4 = vld [vmem:[#allocation3 + $0x9e8] ss:$48 sps:$4 sm:$0xff]  }
 0x79d   :  { %4320 = vmatpush1.bf16.msra.mxu1 %v6681_v3  ;;  %4351 = vmatprep.mubr.bf16.mxu1 %v7224_v14  ;;  %v6699_v14 = vld [vmem:[#allocation3 + $0x268] ss:$48 sps:$4 sm:$0xff]   ;;  %v6761_v3 = vld [vmem:[#allocation3 + $0x9ec] ss:$48 sps:$4 sm:$0xff]  }
 0x79e   :  { %4321 = vmatprep.subr.bf16.mxu1 %v6686_v5  ;;  %v6764_v5 = vld [vmem:[#allocation3 + $0xa4c] ss:$48 sps:$4 sm:$0xff]  }
 0x7a1   :  { %4322 = vmatpush1.bf16.msra.mxu1 %v6684_v35  ;;  %v6785_v35 = vld [vmem:[#allocation7 + $0x40] sm:$0xff]  }
 0x7a2   :  { %4323 = vmatprep.subr.bf16.mxu1 %v6689_v6  ;;  %v6786_v6 = vld [vmem:[#allocation7] sm:$0xff]   ;;  %5850 = vmatprep.subr.bf16.mxu0 %v6785_v35 }
 0x7a3   :  { %5851 = vmatpush3.bf16.msra.mxu0 %v6786_v6  ;;  %v3956_v6 = vld [vmem:[#allocation5 + $0xa] sm:$0x3] }
 0x7a5   :  { %4324 = vmatpush1.bf16.msra.mxu1 %v6687_v7  ;;  %v6787_v7 = vld [vmem:[#allocation7 + $0x48] sm:$0xff]  }
 0x7a6   :  { %4325 = vmatprep.subr.bf16.mxu1 %v6692_v8  ;;  %v6762_v8 = vld [vmem:[#allocation3 + $0xa48] ss:$48 sps:$4 sm:$0xff]   ;;  %5852 = vmatprep.subr.bf16.mxu0 %v6787_v7  ;;  %v3961_v7 = vrot.slane %v3956_v6, %v7258_v36 }
 0x7a9   :  { %4326 = vmatpush1.bf16.msra.mxu1 %v6690_v9  ;;  %v6767_v9 = vld [vmem:[#allocation3 + $0xaac] ss:$48 sps:$4 sm:$0xff]  }
 0x7aa   :  { %4327 = vmatprep.subr.bf16.mxu1 %v6695_v10  ;;  %v6788_v10 = vld [vmem:[#allocation7 + $0x8] sm:$0xff]  }
 0x7ab   :  { %5853 = vmatpush3.bf16.msra.mxu0 %v6788_v10 }
 0x7ad   :  { %4328 = vmatpush1.bf16.msra.mxu1 %v6693_v11  ;;  %v6789_v11 = vld [vmem:[#allocation7 + $0x50] sm:$0xff]  }
 0x7ae   :  { %4329 = vmatprep.subr.bf16.mxu1 %v6698_v17  ;;  %v6765_v17 = vld [vmem:[#allocation3 + $0xaa8] ss:$48 sps:$4 sm:$0xff]   ;;  %5854 = vmatprep.subr.bf16.mxu0 %v6789_v11 }
 0x7b1   :  { %4330 = vmatpush1.bf16.msra.mxu1 %v6696_v18  ;;  %v6770_v18 = vld [vmem:[#allocation3 + $0xb0c] ss:$48 sps:$4 sm:$0xff]  }
 0x7b2   :  { %4331 = vmatprep.subr.bf16.mxu1 %v6701_v19  ;;  %v6790_v19 = vld [vmem:[#allocation7 + $0x10] sm:$0xff]  }
 0x7b3   :  { %5855 = vmatpush3.bf16.msra.mxu0 %v6790_v19 }
 0x7b5   :  { %4332 = vmatpush1.bf16.msra.mxu1 %v6699_v14  ;;  %v6791_v14 = vld [vmem:[#allocation7 + $0x58] sm:$0xff]  }
 0x7b6   :  { %4333 = vmatprep.subr.bf16.mxu1 %v6704_v22  ;;  %v6768_v22 = vld [vmem:[#allocation3 + $0xb08] ss:$48 sps:$4 sm:$0xff]   ;;  %5856 = vmatprep.subr.bf16.mxu0 %v6791_v14 }
 0x7b9   :  { %4334 = vmatpush1.bf16.msra.mxu1 %v6702_v25  ;;  %v6773_v25 = vld [vmem:[#allocation3 + $0xb6c] ss:$48 sps:$4 sm:$0xff]  }
 0x7ba   :  { %4335 = vmatprep.subr.bf16.mxu1 %v6707_v26  ;;  %v6792_v26 = vld [vmem:[#allocation7 + $0x18] sm:$0xff]  }
 0x7bb   :  { %5857 = vmatpush3.bf16.msra.mxu0 %v6792_v26  ;;  %v6803_v26 = vld [vmem:[%s7572_s6 + $0x10] sm:$0xff]  }
 0x7bd   :  { %4336 = vmatpush1.bf16.msra.mxu1 %v6705_v27  ;;  %v6793_v27 = vld [vmem:[#allocation7 + $0x60] sm:$0xff]  }
 0x7be   :  { %4337 = vmatprep.subr.bf16.mxu1 %v6710_v29  ;;  %v6771_v29 = vld [vmem:[#allocation3 + $0xb68] ss:$48 sps:$4 sm:$0xff]   ;;  %5858 = vmatprep.subr.bf16.mxu0 %v6793_v27 }
 0x7bf   :  { %v6804_v27 = vld [vmem:[%s7572_s6 + $0x18] sm:$0xff]  }
 0x7c1   :  { %4338 = vmatpush1.bf16.msra.mxu1 %v6708_v30  ;;  %v6776_v30 = vld [vmem:[#allocation3 + $0xbcc] ss:$48 sps:$4 sm:$0xff]  }
 0x7c2   :  { %4339 = vmatprep.subr.bf16.mxu1 %v6713_v32  ;;  %v6794_v32 = vld [vmem:[#allocation7 + $0x20] sm:$0xff]  }
 0x7c3   :  { %5859 = vmatpush3.bf16.msra.mxu0 %v6794_v32  ;;  %v6807_v32 = vld [vmem:[%s7572_s6 + $0x30] sm:$0xff]  }
 0x7c5   :  { %4340 = vmatpush1.bf16.msra.mxu1 %v6711_v28  ;;  %v6795_v28 = vld [vmem:[#allocation7 + $0x68] sm:$0xff]  }
 0x7c6   :  { %4341 = vmatprep.subr.bf16.mxu1 %v6716_v33  ;;  %v6774_v33 = vld [vmem:[#allocation3 + $0xbc8] ss:$48 sps:$4 sm:$0xff]   ;;  %5860 = vmatprep.subr.bf16.mxu0 %v6795_v28 }
 0x7c7   :  { %v6808_v28 = vld [vmem:[%s7572_s6 + $0x38] sm:$0xff]  }
 0x7c9   :  { %4342 = vmatpush1.bf16.msra.mxu1 %v6714_v34  ;;  %v6779_v34 = vld [vmem:[#allocation3 + $0xc2c] ss:$48 sps:$4 sm:$0xff]  }
 0x7ca   :  { %4343 = vmatprep.subr.bf16.mxu1 %v6719_v37  ;;  %v6796_v37 = vld [vmem:[#allocation7 + $0x28] sm:$0xff]  }
 0x7cb   :  { %5861 = vmatpush3.bf16.msra.mxu0 %v6796_v37 }
 0x7cd   :  { %4344 = vmatpush1.bf16.msra.mxu1 %v6717_v39  ;;  %v6777_v39 = vld [vmem:[#allocation3 + $0xc28] ss:$48 sps:$4 sm:$0xff]  }
 0x7ce   :  { %4345 = vmatprep.subr.bf16.mxu1 %v6722_v58  ;;  %v6782_v58 = vld [vmem:[#allocation3 + $0xc8c] ss:$48 sps:$4 sm:$0xff]  }
 0x7d1   :  { %4346 = vmatpush1.bf16.msra.mxu1 %v6720_v12  ;;  %v3955_v12 = vld [vmem:[#allocation3 + $0xce8] sm:$0x77] }
 0x7d2   :  { %4347 = vmatprep.subr.bf16.mxu1 %v6725_v40  ;;  %v6780_v40 = vld [vmem:[#allocation3 + $0xc88] ss:$48 sps:$4 sm:$0xff]  }
 0x7d5   :  { %4348 = vmatpush1.bf16.msra.mxu1 %v6723_v41  ;;  %v5704_v41 = vcombine.high %v3955_v12, %v3955_v12 }
 0x7d6   :  { %4349 = vmatprep.subr.bf16.mxu1 %v6728_v42  ;;  %v5703_v42 = vcombine.low %v3955_v12, %v3955_v12 }
 0x7d9   :  { %4350 = vmatpush1.bf16.msra.mxu1 %v6726_v43  ;;  %v4314_v43 = vsel %vm592_vm0, %v5703_v42, 0 }
 0x7da   :  { %4360 = vmatprep.subr.bf16.mxu1 %v6731_v61  ;;  %v6850_v61 = vld [vmem:[%s7566_s0 + $0x10] ss:$0 sps:$4 sm:$0xff]  }
 0x7dc   :  { %4352 = vmatmul.mubr.bf16.vlgmr.msra.gmra.mrb[20].mxu1 %v7232_v47  ;;  %v6744_v47 = vld [vmem:[#allocation3 + $0x808] ss:$48 sps:$4 sm:$0xff]  }
 0x7dd   :  { %4361 = vmatpush1.bf16.msra.mxu1 %v6729_v44  ;;  %4392 = vmatprep.mubr.bf16.mxu1 %v7236_v50  ;;  %v6747_v50 = vld [vmem:[#allocation3 + $0x868] ss:$48 sps:$4 sm:$0xff]  }
 0x7de   :  { %4362 = vmatprep.subr.bf16.mxu1 %v6734_v45 }
 0x7e1   :  { %4363 = vmatpush1.bf16.msra.mxu1 %v6732_v46 }
 0x7e2   :  { %4364 = vmatprep.subr.bf16.mxu1 %v6737_v49 }
 0x7e5   :  { %4365 = vmatpush1.bf16.msra.mxu1 %v6735_v51 }
 0x7e6   :  { %4366 = vmatprep.subr.bf16.mxu1 %v6740_v53 }
 0x7e9   :  { %4367 = vmatpush1.bf16.msra.mxu1 %v6738_v54 }
 0x7ea   :  { %4368 = vmatprep.subr.bf16.mxu1 %v6743_v55 }
 0x7ed   :  { %4369 = vmatpush1.bf16.msra.mxu1 %v6741_v56 }
 0x7ee   :  { %4370 = vmatprep.subr.bf16.mxu1 %v6746_v57 }
 0x7f1   :  { %4371 = vmatpush1.bf16.msra.mxu1 %v6744_v47  ;;  %v6797_v47 = vld [vmem:[#allocation7 + $0x70] sm:$0xff]  }
 0x7f2   :  { %4372 = vmatprep.subr.bf16.mxu1 %v6749_v59  ;;  %5862 = vmatprep.subr.bf16.mxu0 %v6797_v47 }
 0x7f5   :  { %4373 = vmatpush1.bf16.msra.mxu1 %v6747_v50 }
 0x7f6   :  { %4374 = vmatprep.subr.bf16.mxu1 %v6752_v60  ;;  %v6798_v60 = vld [vmem:[#allocation7 + $0x30] sm:$0xff]  }
 0x7f7   :  { %5863 = vmatpush3.bf16.msra.mxu0 %v6798_v60 }
 0x7f9   :  { %4375 = vmatpush1.bf16.msra.mxu1 %v6750_v62 }
 0x7fa   :  { %4376 = vmatprep.subr.bf16.mxu1 %v6755_v0 }
 0x7fd   :  { %4377 = vmatpush1.bf16.msra.mxu1 %v6753_v1  ;;  %v6799_v1 = vld [vmem:[#allocation7 + $0x78] sm:$0xff]  }
 0x7fe   :  { %4378 = vmatprep.subr.bf16.mxu1 %v6758_v23  ;;  %5864 = vmatprep.subr.bf16.mxu0 %v6799_v1 }
 0x801   :  { %4379 = vmatpush1.bf16.msra.mxu1 %v6756_v2 }
 0x802   :  { %4380 = vmatprep.subr.bf16.mxu1 %v6761_v3  ;;  %v6800_v3 = vld [vmem:[#allocation7 + $0x38] sm:$0xff]  }
 0x803   :  { %5865 = vmatpush3.bf16.msra.mxu0 %v6800_v3 }
 0x804   :  { %5909 = vmatprep.subr.bf16.mxu0 %v7050_v13 }
 0x805   :  { %4381 = vmatpush1.bf16.msra.mxu1 %v6759_v4 }
 0x806   :  { %4382 = vmatprep.subr.bf16.mxu1 %v6764_v5 }
 0x809   :  { %4383 = vmatpush1.bf16.msra.mxu1 %v6762_v8  ;;  %v3965_v8 = vrot.slane %v3956_v6, %v7261_v38  ;;  %v6802_v38 = vld [vmem:[%s7572_s6 + $0x8] sm:$0xff]  }
 0x80a   :  { %4384 = vmatprep.subr.bf16.mxu1 %v6767_v9 }
 0x80d   :  { %4385 = vmatpush1.bf16.msra.mxu1 %v6765_v17 }
 0x80e   :  { %4386 = vmatprep.subr.bf16.mxu1 %v6770_v18 }
 0x811   :  { %4387 = vmatpush1.bf16.msra.mxu1 %v6768_v22 }
 0x812   :  { %4388 = vmatprep.subr.bf16.mxu1 %v6773_v25 }
 0x815   :  { %4389 = vmatpush1.bf16.msra.mxu1 %v6771_v29  ;;  %v6805_v29 = vld [vmem:[%s7572_s6 + $0x20] sm:$0xff]  }
 0x816   :  { %4390 = vmatprep.subr.bf16.mxu1 %v6776_v30  ;;  %v6806_v30 = vld [vmem:[%s7572_s6 + $0x28] sm:$0xff]  }
 0x819   :  { %4391 = vmatpush1.bf16.msra.mxu1 %v6774_v33 }
 0x81a   :  { %4401 = vmatprep.subr.bf16.mxu1 %v6779_v34 }
 0x81c   :  { %4393 = vmatmul.mubr.bf16.vlgmr.msra.gmra.mrb[20].mxu1 %v7242_v20 }
 0x81d   :  { %4402 = vmatpush1.bf16.msra.mxu1 %v6777_v39  ;;  %4433 = vmatprep.mubr.bf16.mxu1 %v7049_v24 }
 0x81e   :  { %4403 = vmatprep.subr.bf16.mxu1 %v6782_v58 }
 0x821   :  { %4404 = vmatpush1.bf16.msra.mxu1 %v6780_v40 }
 0x822   :  { %5705 = vmatprep.subr.msk.bf16.mxu1 %vm592_vm0, %v5704_v41 }
 0x825   :  { %4406 = vmatpush1.bf16.msra.mxu1 %v4314_v43 }
 0x826   :  { %5937 = vmatprep.subr.bf16.mxu1 %v7050_v13 }
 0x828   :  { %5706 = vmatmul.mubr.msk.bf16.vlgmr.msra.gmra.mrb[20].mxu1 %vm588_vm1, %v6850_v61 }
 0x829   :  { %5953 = vmatprep.mubr.msk.bf16.mxu1 %vm7051_vm3, %v7050_v13 }
 0x86f   :  { %v5844_v20 = vpop.f32.mrb[16].mxu1 }
 0x870   :  { %v5845_v44 = vpop.f32.mrb[17].mxu1 }
 0x871   :  { %v5846_v24 = vadd.f32 %v5845_v44, %v5844_v20  ;;  %v5847_v45 = vpop.f32.mrb[18].mxu1 }
 0x872   :  { %v5848_v46 = vpop.f32.mrb[19].mxu1 }
 0x873   :  { %v7378_v49 = vmul.f32 %v5846_v24, %v7294_v15 }
 0x875   :  { %v3872_v51 = vrot.slane %v7378_v49, 4  ;;  %v3879_v53 = vmul.f32 %v7378_v49, %v7378_v49 }
 0x877   :  { %v3873_v54 = vadd.f32 %v3872_v51, %v7378_v49  ;;  %v3880_v55 = vrot.slane %v3879_v53, 4 }
 0x879   :  { %v3874_v56 = vrot.slane %v3873_v54, 2  ;;  %v3881_v57 = vadd.f32 %v3880_v55, %v3879_v53 }
 0x87b   :  { %v3875_v59 = vadd.f32 %v3874_v56, %v3873_v54  ;;  %v3882_v50 = vrot.slane %v3881_v57, 2 }
 0x87d   :  { %v3876_v62 = vrot.slane %v3875_v59, 1  ;;  %v3883_v0 = vadd.f32 %v3882_v50, %v3881_v57 }
 0x87f   :  { %v3877_v23 = vadd.f32 %v3876_v62, %v3875_v59  ;;  %v3884_v2 = vrot.slane %v3883_v0, 1  ;;  %v4636_v62 = vld [vmem:[#allocation8] sm:$0x1] }
 0x881   :  { %v3885_v4 = vadd.f32 %v3884_v2, %v3883_v0  ;;  %v7385_v5 = vadd.f32 %v3877_v23, %v7358_v48  ;;  %v4640_v23 = vld [vmem:[#allocation10] sm:$0x1] }
 0x883   :  { %v7389_v35 = vadd.f32 %v3885_v4, %v7361_v52  ;;  %v6801_v52 = vld [vmem:[%s7572_s6] sm:$0xff]  }
 0x884   :  { %5938 = vmatpush3.bf16.msra.mxu1 %v6801_v52 }
 0x885   :  { %5939 = vmatprep.subr.bf16.mxu1 %v7050_v13 }
 0x888   :  { %5940 = vmatpush3.bf16.msra.mxu1 %v6802_v38 }
 0x889   :  { %5941 = vmatprep.subr.bf16.mxu1 %v7050_v13 }
 0x88c   :  { %5942 = vmatpush3.bf16.msra.mxu1 %v6803_v26 }
 0x88d   :  { %5943 = vmatprep.subr.bf16.mxu1 %v7050_v13 }
 0x890   :  { %5944 = vmatpush3.bf16.msra.mxu1 %v6804_v27 }
 0x891   :  { %5945 = vmatprep.subr.bf16.mxu1 %v7050_v13 }
 0x894   :  { %5946 = vmatpush3.bf16.msra.mxu1 %v6805_v29 }
 0x895   :  { %5947 = vmatprep.subr.bf16.mxu1 %v7050_v13 }
 0x898   :  { %5948 = vmatpush3.bf16.msra.mxu1 %v6806_v30 }
 0x899   :  { %5949 = vmatprep.subr.bf16.mxu1 %v7050_v13 }
 0x89c   :  { %5950 = vmatpush3.bf16.msra.mxu1 %v6807_v32 }
 0x89d   :  { %5951 = vmatprep.subr.bf16.mxu1 %v7050_v13 }
 0x8a0   :  { %5952 = vmatpush3.bf16.msra.mxu1 %v6808_v28 }
 0x8a1   :  { %5957 = vmatprep.subr.bf16.mxu1 %v7050_v13 }
 0x8fb   :  { %v4435_v9 = vpop.f32.mrb[20].mxu1 }
 0x8fc   :  { %v6011_v10 = vadd.f32 %v4435_v9, %v3961_v7  ;;  %v4437_v11 = vpop.f32.mrb[21].mxu1 }
 0x8fd   :  { %v6012_v17 = vadd.f32 %v4437_v11, %v3965_v8  ;;  %v4439_v18 = vpop.f32.mrb[22].mxu1 }
 0x8fe   :  { %v4442_v19 = vmax.f32 %v6011_v10, 0.0  ;;  %v4440_v14 = vpop.f32.mrb[23].mxu1 }
 0x8ff   :  { %v4443_v22 = vmax.f32 %v6012_v17, 0.0 }
 0x900   :  { %v4444_v25 = vpack.c.bf16 %v4442_v19, %v4442_v19 }
 0x901   :  { %v4445_v48 = vpack.c.bf16 %v4443_v22, %v4443_v22 }
 0x903   :  { %4606 = vmatprep.mubr.bf16.mxu0 %v4445_v48 }
 0x904   :  { %4607 = vmatmul.mubr.bf16.vlgmr.msra.gmra.mrb[20].mxu0 %v4444_v25 }
 0x905   :  { %5910 = vmatpush3.bf16.msra.mxu0 %v6801_v52  ;;  %5925 = vmatprep.mubr.msk.bf16.mxu0 %vm7051_vm3, %v7050_v13 }
 0x906   :  { %5911 = vmatprep.subr.bf16.mxu0 %v7050_v13 }
 0x909   :  { %5912 = vmatpush3.bf16.msra.mxu0 %v6802_v38 }
 0x90a   :  { %5913 = vmatprep.subr.bf16.mxu0 %v7050_v13 }
 0x90d   :  { %5914 = vmatpush3.bf16.msra.mxu0 %v6803_v26 }
 0x90e   :  { %5915 = vmatprep.subr.bf16.mxu0 %v7050_v13 }
 0x911   :  { %5916 = vmatpush3.bf16.msra.mxu0 %v6804_v27 }
 0x912   :  { %5917 = vmatprep.subr.bf16.mxu0 %v7050_v13 }
 0x915   :  { %5918 = vmatpush3.bf16.msra.mxu0 %v6805_v29  ;;  %v7455_v29 = vld [vmem:[#allocation14] sm:$0xff]  }
 0x916   :  { %5919 = vmatprep.subr.bf16.mxu0 %v7050_v13 }
 0x919   :  { %5920 = vmatpush3.bf16.msra.mxu0 %v6806_v30  ;;  %v7461_v30 = vld [vmem:[#allocation14 + $0x8] sm:$0xff]  }
 0x91a   :  { %5921 = vmatprep.subr.bf16.mxu0 %v7050_v13 }
 0x91d   :  { %5922 = vmatpush3.bf16.msra.mxu0 %v6807_v32  ;;  %v7467_v32 = vld [vmem:[#allocation14 + $0x10] sm:$0xff]  }
 0x91e   :  { %5923 = vmatprep.subr.bf16.mxu0 %v7050_v13 }
 0x921   :  { %5924 = vmatpush3.bf16.msra.mxu0 %v6808_v28  ;;  %v7473_v28 = vld [vmem:[#allocation14 + $0x18] sm:$0xff]  }
 0x922   :  { %5977 = vmatprep.subr.bf16.mxu0 %v7050_v13 }
 0x9d7   :  { %v5866_v33 = vpop.f32.mrb[20].mxu0 }
 0x9d8   :  { %v5867_v34 = vpop.f32.mrb[21].mxu0 }
 0x9d9   :  { %v5868_v37 = vadd.f32 %v5867_v34, %v5866_v33  ;;  %v5869_v39 = vpop.f32.mrb[22].mxu0 }
 0x9da   :  { %v5870_v58 = vpop.f32.mrb[23].mxu0 }
 0x9db   :  { %v4614_v12 = vmul.f32 %v5868_v37, %v7294_v15 }
 0x9dd   :  { %v4616_v40 = vrot.slane %v4614_v12, 4  ;;  %v4623_v41 = vmul.f32 %v4614_v12, %v4614_v12 }
 0x9df   :  { %v4617_v42 = vadd.f32 %v4616_v40, %v4614_v12  ;;  %v4624_v43 = vrot.slane %v4623_v41, 4 }
 0x9e1   :  { %v4618_v61 = vrot.slane %v4617_v42, 2  ;;  %v4625_v20 = vadd.f32 %v4624_v43, %v4623_v41 }
 0x9e3   :  { %v4619_v44 = vadd.f32 %v4618_v61, %v4617_v42  ;;  %v4626_v24 = vrot.slane %v4625_v20, 2 }
 0x9e5   :  { %v4620_v45 = vrot.slane %v4619_v44, 1  ;;  %v4627_v46 = vadd.f32 %v4626_v24, %v4625_v20 }
 0x9e7   :  { %v4621_v51 = vadd.f32 %v4620_v45, %v4619_v44  ;;  %v4628_v53 = vrot.slane %v4627_v46, 1 }
 0x9e9   :  { %v4629_v54 = vadd.f32 %v4628_v53, %v4627_v46  ;;  %v4622_v55 = vadd.f32 %v4621_v51, %v7385_v5 }
 0x9eb   :  { %v4630_v56 = vadd.f32 %v4629_v54, %v7389_v35  ;;  %v4631_v57 = vmul.f32 0.045454547, %v4622_v55 }
 0x9ed   :  { %v4632_v47 = vmul.f32 0.045454547, %v4630_v56  ;;  %v4633_v15 = vmul.f32 %v4631_v57, %v4631_v57 }
 0x9ef   :  { %v4634_v59 = vsub.f32 %v4632_v47, %v4633_v15 }
 0x9f1   :  { %v4635_v50 = vmax.f32 %v4634_v59, 0.0 }
 0x9f3   :  { %v4637_v60 = vadd.f32 1e-05, %v4635_v50 }
 0x9f5   :  { %6813 = vrsqrt.f32 %v4637_v60 }
 0x9ff   :  { %v6814_v0 = vpop.eup %6813 }
 0xa00   :  { %v4639_v1 = vmul.f32 %v6814_v0, %v4636_v62 }
 0xa02   :  { %v4641_v2 = vmul.f32 %v4639_v1, %v4631_v57  ;;  %v4653_v3 = vrot.slane %v4639_v1, %v7258_v36 }
 0xa04   :  { %v4642_v4 = vsub.f32 %v4640_v23, %v4641_v2  ;;  %v4655_v6 = vmul.f32 %v4653_v3, %v7298_v16  ;;  %v4656_v5 = vmul.f32 %v4653_v3, %v7305_v31  ;;  %v4657_v35 = vmul.f32 %v4653_v3, %v7327_v63 }
 0xa05   :  { %v4658_v7 = vmul.f32 %v4653_v3, %v7351_v21  ;;  %v4659_v8 = vmul.f32 %v4653_v3, %v7378_v49  ;;  %v4660_v9 = vmul.f32 %v4653_v3, %v4614_v12 }
 0xa06   :  { %v4665_v10 = vrot.slane %v4642_v4, %v7258_v36  ;;  %v4679_v11 = vmax.f32 %v4642_v4, 0.0 }
 0xa08   :  { %v4804_v17 = vpack.c.bf16 %v4679_v11, %v4679_v11  ;;  %v4667_v18 = vadd.f32 %v4665_v10, %v4655_v6  ;;  %v4668_v19 = vadd.f32 %v4665_v10, %v4656_v5  ;;  %v4669_v14 = vadd.f32 %v4665_v10, %v4657_v35 }
 0xa09   :  { %v4670_v22 = vadd.f32 %v4665_v10, %v4658_v7  ;;  %v4671_v48 = vadd.f32 %v4665_v10, %v4659_v8  ;;  %v4672_v25 = vadd.f32 %v4665_v10, %v4660_v9 }
 0xa0a   :  { %5954 = vmatmul.mubr.bf16.vlgmr.msra.gmra.mrb[24].mxu1 %v4804_v17  ;;  %v4673_v16 = vmax.f32 %v4667_v18, 0.0  ;;  %v4674_v31 = vmax.f32 %v4668_v19, 0.0  ;;  %v4675_v52 = vmax.f32 %v4669_v14, 0.0 }
 0xa0b   :  { %v4676_v63 = vmax.f32 %v4670_v22, 0.0  ;;  %v4677_v38 = vmax.f32 %v4671_v48, 0.0  ;;  %v4678_v21 = vmax.f32 %v4672_v25, 0.0  ;;  %5965 = vmatprep.mubr.msk.bf16.mxu1 %vm7051_vm3, %v7050_v13  ;;  %5958 = vmatpush3.bf16.msra.mxu1 %v7455_v29 }
 0xa0c   :  { %v4680_v49 = vpack.c.bf16 %v4674_v31, %v4673_v16  ;;  %5959 = vmatprep.subr.bf16.mxu1 %v7050_v13 }
 0xa0d   :  { %v4681_v26 = vpack.c.bf16 %v4676_v63, %v4675_v52  ;;  %v4682_v27 = vpack.c.bf16 %v4678_v21, %v4677_v38 }
 0xa0e   :  { %5926 = vmatmul.mubr.bf16.vlgmr.msra.gmra.mrb[24].mxu0 %v4680_v49 }
 0xa0f   :  { %5929 = vmatprep.mubr.msk.bf16.mxu0 %vm7051_vm3, %v7050_v13  ;;  %5978 = vmatpush3.bf16.msra.mxu0 %v7455_v29 }
 0xa10   :  { %5979 = vmatprep.subr.bf16.mxu0 %v7050_v13  ;;  %5960 = vmatpush3.bf16.msra.mxu1 %v7461_v30 }
 0xa11   :  { %5961 = vmatprep.subr.bf16.mxu1 %v7050_v13 }
 0xa13   :  { %5980 = vmatpush3.bf16.msra.mxu0 %v7461_v30 }
 0xa14   :  { %5981 = vmatprep.subr.bf16.mxu0 %v7050_v13  ;;  %5962 = vmatpush3.bf16.msra.mxu1 %v7467_v32 }
 0xa15   :  { %5963 = vmatprep.subr.bf16.mxu1 %v7050_v13 }
 0xa16   :  { %5930 = vmatmul.mubr.bf16.gmra.mrb[28].mxu0 %v4681_v26 }
 0xa17   :  { %5933 = vmatprep.mubr.msk.bf16.mxu0 %vm7051_vm3, %v7050_v13  ;;  %5982 = vmatpush3.bf16.msra.mxu0 %v7467_v32 }
 0xa18   :  { %5983 = vmatprep.subr.bf16.mxu0 %v7050_v13  ;;  %5964 = vmatpush3.bf16.msra.mxu1 %v7473_v28 }
 0xa1b   :  { %5984 = vmatpush3.bf16.msra.mxu0 %v7473_v28 }
 0xa1c   :  { %5989 = vmatprep.subr.bf16.mxu0 %v7050_v13 }
 0xa1e   :  { %5934 = vmatmul.mubr.bf16.gmra.mrb[32].mxu0 %v4682_v27 }
 0xa1f   :  { %5985 = vmatprep.mubr.msk.bf16.mxu0 %vm7051_vm3, %v7050_v13 }
 0xadd   :  { %v7478_v33 = vpop.f32.mrb[24].mxu1 }
 0xade   :  { %v5955_v34 = vpop.f32.mrb[25].mxu1  ;;  %v4888_v52 = vmul.f32 %v7478_v33, %v7478_v33  ;;  %v4863_v21 = vmul.f32 -26.0, %v7478_v33 }
 0xadf   :  { %v4842_v37 = vpop.f32.mrb[26].mxu1 }
 0xae0   :  { %v5956_v39 = vpop.f32.mrb[27].mxu1  ;;  %v4889_v27 = vmul.f32 -26.0, %v4888_v52 }
 0xae1   :  { %v7480_v58 = vpop.f32.mrb[24].mxu0 }
 0xae2   :  { %v4865_v12 = vmul.f32 %v7480_v58, %v7480_v58  ;;  %v5927_v40 = vpop.f32.mrb[25].mxu0  ;;  %v4846_v42 = vsel %vm4845_vm4, %v7480_v58, 0.0 }
 0xae3   :  { %v7484_v41 = vpop.f32.mrb[26].mxu0 }
 0xae4   :  { %v4847_v43 = vsel %vm4845_vm4, %v7484_v41, 0.0  ;;  %v4866_v61 = vmul.f32 %v7484_v41, %v7484_v41  ;;  %v5928_v20 = vpop.f32.mrb[27].mxu0  ;;  %v4871_v24 = vsel %vm4845_vm4, %v4865_v12, 0.0 }
 0xae5   :  { %v4848_v44 = vadd.f32 %v4847_v43, %v4846_v42 }
 0xae6   :  { %v4872_v45 = vsel %vm4845_vm4, %v4866_v61, 0.0 }
 0xae7   :  { %v4873_v46 = vadd.f32 %v4872_v45, %v4871_v24 }
 0xae9   :  { %v7494_v51 = vpop.f32.mrb[28].mxu0 }
 0xaea   :  { %v4849_v53 = vsel %vm4845_vm4, %v7494_v51, 0.0  ;;  %v4867_v54 = vmul.f32 %v7494_v51, %v7494_v51  ;;  %v5931_v55 = vpop.f32.mrb[29].mxu0 }
 0xaeb   :  { %v4850_v56 = vadd.f32 %v4849_v53, %v4848_v44  ;;  %v4792_v57 = vpop.f32.mrb[30].mxu0  ;;  %v4896_v44 = vld [vmem:[#allocation11] sm:$0x1] }
 0xaec   :  { %v4874_v47 = vsel %vm4845_vm4, %v4867_v54, 0.0  ;;  %v4851_v15 = vsel %vm4845_vm4, %v4792_v57, 0.0  ;;  %v4868_v59 = vmul.f32 %v4792_v57, %v4792_v57  ;;  %v5932_v50 = vpop.f32.mrb[31].mxu0 }
 0xaed   :  { %v4875_v60 = vadd.f32 %v4874_v47, %v4873_v46  ;;  %v4852_v62 = vadd.f32 %v4851_v15, %v4850_v56  ;;  %v4900_v46 = vld [vmem:[#allocation13] sm:$0x1] }
 0xaee   :  { %v4876_v0 = vsel %vm4845_vm4, %v4868_v59, 0.0 }
 0xaef   :  { %v4877_v1 = vadd.f32 %v4876_v0, %v4875_v60 }
 0xaf1   :  { %v4797_v23 = vpop.f32.mrb[32].mxu0 }
 0xaf2   :  { %v4853_v2 = vsel %vm4845_vm4, %v4797_v23, 0.0  ;;  %v4869_v3 = vmul.f32 %v4797_v23, %v4797_v23  ;;  %v5935_v4 = vpop.f32.mrb[33].mxu0 }
 0xaf3   :  { %v4854_v6 = vadd.f32 %v4853_v2, %v4852_v62  ;;  %v4800_v5 = vpop.f32.mrb[34].mxu0 }
 0xaf4   :  { %v4878_v35 = vsel %vm4845_vm4, %v4869_v3, 0.0  ;;  %v4855_v7 = vsel %vm4845_vm4, %v4800_v5, 0.0  ;;  %v4870_v8 = vmul.f32 %v4800_v5, %v4800_v5  ;;  %v5936_v9 = vpop.f32.mrb[35].mxu0 }
 0xaf5   :  { %v4879_v10 = vadd.f32 %v4878_v35, %v4877_v1  ;;  %v4856_v11 = vadd.f32 %v4855_v7, %v4854_v6 }
 0xaf6   :  { %v4880_v17 = vsel %vm4845_vm4, %v4870_v8, 0.0 }
 0xaf7   :  { %v4857_v18 = vrot.slane %v4856_v11, 4  ;;  %v4881_v19 = vadd.f32 %v4880_v17, %v4879_v10 }
 0xaf9   :  { %v4858_v14 = vadd.f32 %v4857_v18, %v4856_v11  ;;  %v4882_v22 = vrot.slane %v4881_v19, 4 }
 0xafb   :  { %v4859_v48 = vrot.slane %v4858_v14, 2  ;;  %v4883_v25 = vadd.f32 %v4882_v22, %v4881_v19 }
 0xafd   :  { %v4860_v16 = vadd.f32 %v4859_v48, %v4858_v14  ;;  %v4884_v31 = vrot.slane %v4883_v25, 2 }
 0xaff   :  { %v4861_v63 = vrot.slane %v4860_v16, 1  ;;  %v4885_v38 = vadd.f32 %v4884_v31, %v4883_v25 }
 0xb01   :  { %v4862_v49 = vadd.f32 %v4861_v63, %v4860_v16  ;;  %v4886_v26 = vrot.slane %v4885_v38, 1 }
 0xb03   :  { %v4864_v34 = vadd.f32 %v4863_v21, %v4862_v49  ;;  %v4887_v37 = vadd.f32 %v4886_v26, %v4885_v38 }
 0xb05   :  { %v4890_v39 = vadd.f32 %v4889_v27, %v4887_v37  ;;  %v4891_v12 = vmul.f32 0.023809524, %v4864_v34 }
 0xb07   :  { %v4892_v40 = vmul.f32 0.023809524, %v4890_v39  ;;  %v4893_v42 = vmul.f32 %v4891_v12, %v4891_v12 }
 0xb09   :  { %v4894_v43 = vsub.f32 %v4892_v40, %v4893_v42 }
 0xb0b   :  { %v4895_v61 = vmax.f32 %v4894_v43, 0.0 }
 0xb0d   :  { %v4897_v20 = vadd.f32 1e-05, %v4895_v61 }
 0xb0f   :  { %6815 = vrsqrt.f32 %v4897_v20 }
 0xb19   :  { %v6816_v24 = vpop.eup %6815 }
 0xb1a   :  { %v4899_v45 = vmul.f32 %v6816_v24, %v4896_v44 }
 0xb1c   :  { %v4901_v53 = vmul.f32 %v4899_v45, %v4891_v12  ;;  %v4907_v54 = vrot.slane %v4899_v45, %v7258_v36  ;;  %v4933_v55 = vmul.f32 %v4899_v45, %v7478_v33 }
 0xb1e   :  { %v4902_v56 = vsub.f32 %v4900_v46, %v4901_v53  ;;  %v4914_v47 = vmul.f32 %v4907_v54, %v4800_v5  ;;  %v4909_v15 = vmul.f32 %v4907_v54, %v7480_v58  ;;  %v4910_v59 = vmul.f32 %v4907_v54, %v7484_v41 }
 0xb1f   :  { %v4911_v50 = vmul.f32 %v4907_v54, %v7494_v51  ;;  %v4912_v60 = vmul.f32 %v4907_v54, %v4792_v57  ;;  %v4913_v62 = vmul.f32 %v4907_v54, %v4797_v23 }
 0xb20   :  { %v4919_v0 = vrot.slane %v4902_v56, %v7258_v36  ;;  %v4934_v1 = vadd.f32 %v4933_v55, %v4902_v56 }
 0xb22   :  { %v4926_v2 = vadd.f32 %v4919_v0, %v4914_v47  ;;  %v4935_v3 = vmax.f32 %v4934_v1, 0.0  ;;  %v4921_v4 = vadd.f32 %v4919_v0, %v4909_v15  ;;  %v4922_v6 = vadd.f32 %v4919_v0, %v4910_v59 }
 0xb23   :  { %v4923_v35 = vadd.f32 %v4919_v0, %v4911_v50  ;;  %v4924_v7 = vadd.f32 %v4919_v0, %v4912_v60  ;;  %v4925_v33 = vadd.f32 %v4919_v0, %v4913_v62 }
 0xb24   :  { %v4932_v8 = vmax.f32 %v4926_v2, 0.0  ;;  %v5038_v5 = vpack.c.bf16 %v4935_v3, %v4935_v3  ;;  %v4927_v9 = vmax.f32 %v4921_v4, 0.0  ;;  %v4928_v58 = vmax.f32 %v4922_v6, 0.0 }
 0xb25   :  { %v4929_v10 = vmax.f32 %v4923_v35, 0.0  ;;  %v4930_v41 = vmax.f32 %v4924_v7, 0.0  ;;  %v4931_v11 = vmax.f32 %v4925_v33, 0.0 }
 0xb26   :  { %5986 = vmatmul.mubr.msk.bf16.vlgmr.msra.gmra.mrb[36].mxu0 %vm4845_vm4, %v5038_v5  ;;  %v4937_v51 = vpack.c.bf16 %v4928_v58, %v4927_v9 }
 0xb27   :  { %5990 = vmatpush3.bf16.msra.mxu0 %v7455_v29  ;;  %v4938_v36 = vpack.c.bf16 %v4930_v41, %v4929_v10  ;;  %5997 = vmatprep.mubr.msk.bf16.mxu0 %vm7051_vm3, %v7050_v13  ;;  %v4939_v57 = vpack.c.bf16 %v4932_v8, %v4931_v11  ;;  %v4936_v29 = vmax.f32 %v4902_v56, 0.0 }
 0xb28   :  { %5966 = vmatmul.mubr.msk.bf16.vlgmr.msra.gmra.mrb[28].mxu1 %vm4845_vm4, %v4937_v51  ;;  %5991 = vmatprep.subr.bf16.mxu0 %v7050_v13 }
 0xb29   :  { %5969 = vmatprep.mubr.msk.bf16.mxu1 %vm7051_vm3, %v7050_v13  ;;  %v5082_v23 = vpack.c.bf16 %v4936_v29, %v4936_v29 }
 0xb2b   :  { %5992 = vmatpush3.bf16.msra.mxu0 %v7461_v30 }
 0xb2c   :  { %5993 = vmatprep.subr.bf16.mxu0 %v7050_v13 }
 0xb2f   :  { %5994 = vmatpush3.bf16.msra.mxu0 %v7467_v32 }
 0xb30   :  { %5970 = vmatmul.mubr.msk.bf16.gmra.mrb[32].mxu1 %vm4845_vm4, %v4938_v36  ;;  %5995 = vmatprep.subr.bf16.mxu0 %v7050_v13 }
 0xb31   :  { %5973 = vmatprep.mubr.msk.bf16.mxu1 %vm7051_vm3, %v7050_v13 }
 0xb33   :  { %5996 = vmatpush3.bf16.msra.mxu0 %v7473_v28 }
 0xb36   :  { %5998 = vmatmul.mubr.msk.bf16.vlgmr.msra.gmra.mrb[40].mxu0 %vm4845_vm4, %v5082_v23 }
 0xb38   :  { %5974 = vmatmul.mubr.msk.bf16.gmra.mrb[36].mxu1 %vm4845_vm4, %v4939_v57 }
 0xbf9   :  { %v5076_v30 = vpop.f32.mrb[36].mxu0 }
 0xbfa   :  { %v5163_v17 = vsub.f32 0.0, %v5076_v30  ;;  %v5987_v18 = vpop.f32.mrb[37].mxu0 }
 0xbfb   :  { %v5015_v19 = vpop.f32.mrb[28].mxu1  ;;  %v5079_v32 = vpop.f32.mrb[38].mxu0 }
 0xbfc   :  { %v5164_v14 = vmul.f32 1.442695, %v5163_v17  ;;  %v5126_v22 = vsub.f32 0.0, %v5015_v19  ;;  %v5967_v48 = vpop.f32.mrb[29].mxu1  ;;  %v5988_v25 = vpop.f32.mrb[39].mxu0 }
 0xbfd   :  { %v5018_v16 = vpop.f32.mrb[30].mxu1 }
 0xbfe   :  { %6817 = vpow2.f32 %v5164_v14  ;;  %v5132_v31 = vmul.f32 1.442695, %v5126_v22  ;;  %v5127_v13 = vsub.f32 0.0, %v5018_v16  ;;  %v5968_v52 = vpop.f32.mrb[31].mxu1 }
 0xc00   :  { %6819 = vpow2.f32 %v5132_v31  ;;  %v5134_v28 = vmul.f32 1.442695, %v5127_v13 }
 0xc02   :  { %6821 = vpow2.f32 %v5134_v28 }
 0xc03   :  { %v5023_v63 = vpop.f32.mrb[32].mxu1 }
 0xc04   :  { %v5128_v38 = vsub.f32 0.0, %v5023_v63  ;;  %v5971_v21 = vpop.f32.mrb[33].mxu1 }
 0xc05   :  { %v5026_v49 = vpop.f32.mrb[34].mxu1 }
 0xc06   :  { %v5136_v26 = vmul.f32 1.442695, %v5128_v38  ;;  %v5129_v27 = vsub.f32 0.0, %v5026_v49  ;;  %v5972_v34 = vpop.f32.mrb[35].mxu1 }
 0xc08   :  { %v6818_v37 = vpop.eup %6817  ;;  %6823 = vpow2.f32 %v5136_v26  ;;  %v5138_v39 = vmul.f32 1.442695, %v5129_v27 }
 0xc09   :  { %v5166_v12 = vadd.f32 1.0, %v6818_v37  ;;  %v5120_v40 = vpop.f32.mrb[40].mxu0 }
 0xc0a   :  { %v6820_v42 = vpop.eup %6819  ;;  %6825 = vpow2.f32 %v5138_v39  ;;  %v5170_v43 = vsub.f32 0.0, %v5120_v40  ;;  %v5999_v61 = vpop.f32.mrb[41].mxu0 }
 0xc0b   :  { %6827 = vrcp.f32 %v5166_v12  ;;  %v5144_v20 = vadd.f32 1.0, %v6820_v42  ;;  %v5123_v44 = vpop.f32.mrb[42].mxu0  ;;  %v5031_v24 = vpop.f32.mrb[36].mxu1 }
 0xc0c   :  { %v6822_v45 = vpop.eup %6821  ;;  %v5171_v46 = vmul.f32 1.442695, %v5170_v43  ;;  %v5130_v53 = vsub.f32 0.0, %v5031_v24  ;;  %v6000_v54 = vpop.f32.mrb[43].mxu0 }
 0xc0d   :  { %v5975_v55 = vpop.f32.mrb[37].mxu1  ;;  %6829 = vrcp.f32 %v5144_v20  ;;  %v5145_v56 = vadd.f32 1.0, %v6822_v45 }
 0xc0e   :  { %v5034_v47 = vpop.f32.mrb[38].mxu1  ;;  %6831 = vpow2.f32 %v5171_v46  ;;  %v5140_v15 = vmul.f32 1.442695, %v5130_v53 }
 0xc0f   :  { %v5131_v59 = vsub.f32 0.0, %v5034_v47  ;;  %v5976_v50 = vpop.f32.mrb[39].mxu1  ;;  %6833 = vrcp.f32 %v5145_v56 }
 0xc10   :  { %6835 = vpow2.f32 %v5140_v15 }
 0xc11   :  { %v5142_v60 = vmul.f32 1.442695, %v5131_v59 }
 0xc12   :  { %v6824_v62 = vpop.eup %6823 }
 0xc13   :  { %6837 = vpow2.f32 %v5142_v60  ;;  %v5146_v0 = vadd.f32 1.0, %v6824_v62 }
 0xc14   :  { %v6826_v1 = vpop.eup %6825 }
 0xc15   :  { %v6828_v2 = vpop.eup %6827  ;;  %6839 = vrcp.f32 %v5146_v0  ;;  %v5147_v3 = vadd.f32 1.0, %v6826_v1 }
 0xc16   :  { %5169 = vst.msk [vmem:[%s7577_s11] sm:$0x1] %vm5168_vm5, %v6828_v2 }
 0xc17   :  { %v6830_v4 = vpop.eup %6829  ;;  %6841 = vrcp.f32 %v5147_v3 }
 0xc18   :  { %v6832_v6 = vpop.eup %6831  ;;  %5157 = vst.msk [vmem:[%s7576_s10] sm:$0xff] %vm5156_vm6, %v6830_v4 }
 0xc19   :  { %v6834_v35 = vpop.eup %6833  ;;  %v5173_v7 = vadd.f32 1.0, %v6832_v6 }
 0xc1a   :  { %v6836_v33 = vpop.eup %6835  ;;  %5158 = vst.msk [vmem:[%s7576_s10 + $0x8] sm:$0xff] %vm5156_vm6, %v6834_v35 }
 0xc1b   :  { %6843 = vrcp.f32 %v5173_v7  ;;  %v5148_v8 = vadd.f32 1.0, %v6836_v33 }
 0xc1d   :  { %v6838_v5 = vpop.eup %6837  ;;  %6845 = vrcp.f32 %v5148_v8 }
 0xc1e   :  { %v5149_v9 = vadd.f32 1.0, %v6838_v5 }
 0xc1f   :  { %v6840_v58 = vpop.eup %6839 }
 0xc20   :  { %6847 = vrcp.f32 %v5149_v9  ;;  %5159 = vst.msk [vmem:[%s7576_s10 + $0x10] sm:$0xff] %vm5156_vm6, %v6840_v58 }
 0xc21   :  { %v6842_v10 = vpop.eup %6841 }
 0xc22   :  { %5160 = vst.msk [vmem:[%s7576_s10 + $0x18] sm:$0xff] %vm5156_vm6, %v6842_v10 }
 0xc25   :  { %v6844_v41 = vpop.eup %6843 }
 0xc26   :  { %5175 = vst.msk [vmem:[%s7577_s11 + $0x1] sm:$0x1] %vm5168_vm5, %v6844_v41 }
 0xc27   :  { %v6846_v11 = vpop.eup %6845 }
 0xc28   :  { %5161 = vst.msk [vmem:[%s7576_s10 + $0x20] sm:$0xff] %vm5156_vm6, %v6846_v11 }
 0xc2a   :  { %v6848_v51 = vpop.eup %6847 }
 0xc2b   :  { %5162 = vst.msk [vmem:[%s7576_s10 + $0x28] sm:$0xff] %vm5156_vm6, %v6848_v51 }
 0xc2c   :  { %5184 = vsyncpa [#allocation4], 1 }
 0xc2d   :  { %5185 = vsyncpa [#allocation6], 1 }
 0xc2e   :  { %5186 = vsyncpa [#allocation9], 1 }
 0xc2f   :  { %5187 = vsyncpa [#allocation12], 1 }
 0xc30   :  { %5188 = vsyncpa [#allocation15], 1 }

</bundles_post_ra>
